<compile_context>
chip_gen: v7x
topology: tpu7x:2x2x1
jax: 0.10.0
libtpu: 0.0.40
codegen_flags: <defaults>
</compile_context>

<pallas_src>
import functools

import jax
import jax.numpy as jnp
from jax.experimental import pallas as pl
from jax.experimental.pallas import tpu as pltpu

_LANES = 128


# ----------------------------- Pallas kernel -------------------------------

def _conv_bn_relu_kernel(x_ref, w_ref, b_ref, o_ref, lhs_ref, *,
                         N, Hp, KH, KW, Hout, Wout, Cin, Cout,
                         stride, dilation, apply_relu):
    """Fused conv + folded-BN bias + ReLU over the whole (small) batch.

    x_ref:   (N*Hp, Wp, Cin)            padded NHWC images stacked along rows
    w_ref:   (KH*KW*Cin, Cout_p)        BN-folded weight, columns padded to 128
    b_ref:   (1, Cout)                  folded BN bias (f32)
    o_ref:   (N*Hout*Wout, Cout)        unpadded flattened output (f32)
    lhs_ref: (N*Hout, Wout, KH*KW*Cin)  VMEM scratch for the im2col LHS
    """
    M = Hout * Wout
    K = KH * KW * Cin

    # Pack the im2col LHS once into the VMEM scratch.  All loop bounds and
    # slice starts are Python ints, so this fully unrolls at trace time; the
    # HBM activation is read exactly once (by the pallas pipeline) and only
    # VMEM sees the KH*KW-fold replication.
    for n in range(N):
        for i in range(KH):
            for j in range(KW):
                r0 = n * Hp + i * dilation
                c0 = j * dilation
                if stride == 1:
                    tap = x_ref[pl.ds(r0, Hout), pl.ds(c0, Wout), :]
                else:
                    # TODO(synk): strided pl.ds path untested (stride=1 here).
                    tap = x_ref[pl.ds(r0, Hout, stride),
                                pl.ds(c0, Wout, stride), :]
                lhs_ref[pl.ds(n * Hout, Hout), :,
                        pl.ds((i * KW + j) * Cin, Cin)] = tap

    # Single MXU matmul: (N*M, K) x (K, Cout_p), f32 accumulation.
    lhs = lhs_ref[...].reshape(N * M, K)
    acc = jnp.dot(lhs, w_ref[...], preferred_element_type=jnp.float32)

    # f32 epilogue on the real channels only; padded MXU columns never reach HBM.
    y = acc[:, :Cout] + b_ref[...]
    if apply_relu:
        y = jnp.maximum(y, 0.0)
    o_ref[...] = y.astype(o_ref.dtype)


# ------------------------------ factory / wrapper ---------------------------

def make_basic_conv(conv_w, bn_gamma=None, bn_beta=None, bn_mean=None,
                    bn_var=None, conv_b=None, *, stride=1, padding=0,
                    dilation=1, groups=1, relu=True, bn=True, eps=1e-5,
                    compute_dtype=jnp.bfloat16):
    """Builds a BasicConv forward fn. Weight/BN prep is done ONCE, here."""
    Cout, Cin, KH, KW = conv_w.shape
    assert groups == 1, "groups != 1 not supported"  # TODO(synk): groups
    K = KH * KW * Cin

    conv_w = conv_w.astype(jnp.float32)
    if bn:
        scale = bn_gamma.astype(jnp.float32) / jnp.sqrt(
            bn_var.astype(jnp.float32) + eps)
        bias = bn_beta.astype(jnp.float32) - bn_mean.astype(jnp.float32) * scale
        if conv_b is not None:
            bias = bias + scale * conv_b.astype(jnp.float32)
    else:
        scale = jnp.ones((Cout,), jnp.float32)
        bias = (conv_b.astype(jnp.float32) if conv_b is not None
                else jnp.zeros((Cout,), jnp.float32))

    # (Cout, Cin, KH, KW) -> (KH*KW*Cin, Cout); fold the BN scale; pad the MXU
    # columns to a multiple of 128 (weight-only padding, done once at init).
    w = jnp.transpose(conv_w, (2, 3, 1, 0)).reshape(K, Cout) * scale[None, :]
    Cout_p = ((Cout + _LANES - 1) // _LANES) * _LANES
    if Cout_p != Cout:
        w = jnp.pad(w, ((0, 0), (0, Cout_p - Cout)))
    w = w.astype(compute_dtype)
    bias2d = bias.reshape(1, Cout).astype(jnp.float32)

    def forward(x_nchw):
        N, Cin_x, H, W = x_nchw.shape
        assert Cin_x == Cin
        Hp, Wp = H + 2 * padding, W + 2 * padding
        eff_kh = (KH - 1) * dilation + 1
        eff_kw = (KW - 1) * dilation + 1
        Hout = (Hp - eff_kh) // stride + 1
        Wout = (Wp - eff_kw) // stride + 1
        M = Hout * Wout

        # NCHW -> NHWC, pad spatially, and stack the images along rows so the
        # kernel sees one 3-D (N*Hp, Wp, Cin) slab (HBM read exactly once).
        # TODO(synk): drop these boundary transposes if the surrounding
        # network runs NHWC end-to-end.
        x = jnp.transpose(x_nchw, (0, 2, 3, 1))
        x = jnp.pad(x, ((0, 0), (padding, padding), (padding, padding), (0, 0)))
        x = x.reshape(N * Hp, Wp, Cin).astype(compute_dtype)

        kernel = functools.partial(
            _conv_bn_relu_kernel, N=N, Hp=Hp, KH=KH, KW=KW, Hout=Hout,
            Wout=Wout, Cin=Cin, Cout=Cout, stride=stride, dilation=dilation,
            apply_relu=relu)

        out = pl.pallas_call(
            kernel,
            out_shape=jax.ShapeDtypeStruct((N * M, Cout), jnp.float32),
            grid_spec=pltpu.PrefetchScalarGridSpec(
                num_scalar_prefetch=0,
                grid=(1,),  # single step: batch folded into the matmul M dim
                in_specs=[
                    pl.BlockSpec((N * Hp, Wp, Cin), lambda g: (0, 0, 0)),
                    pl.BlockSpec((K, Cout_p), lambda g: (0, 0)),
                    pl.BlockSpec((1, Cout), lambda g: (0, 0)),
                ],
                out_specs=pl.BlockSpec((N * M, Cout), lambda g: (0, 0)),
                scratch_shapes=[pltpu.VMEM((N * Hout, Wout, K), compute_dtype)],
            ),
            # TODO(synk): on v7x use pltpu.CORE_PARALLEL on a real grid axis
            # to occupy both TensorCores once shapes justify multiple steps.
            compiler_params=pltpu.CompilerParams(
                dimension_semantics=("arbitrary",)),
        )(x, w, bias2d)

        out = out.reshape(N, Hout, Wout, Cout)
        return jnp.transpose(out, (0, 3, 1, 2))

    return jax.jit(forward)


# ------------------------------- reference ----------------------------------

def _reference_forward(x_nchw, conv_w, bn_gamma, bn_beta, bn_mean, bn_var,
                       *, stride, padding, dilation, relu, bn, eps=1e-5):
    y = jax.lax.conv_general_dilated(
        x_nchw, conv_w,
        window_strides=(stride, stride),
        padding=[(padding, padding), (padding, padding)],
        rhs_dilation=(dilation, dilation),
        dimension_numbers=("NCHW", "OIHW", "NCHW"))
    if bn:
        scale = (bn_gamma / jnp.sqrt(bn_var + eps)).reshape(1, -1, 1, 1)
        bias = (bn_beta - bn_mean * bn_gamma / jnp.sqrt(bn_var + eps)
                ).reshape(1, -1, 1, 1)
        y = y * scale + bias
    if relu:
        y = jnp.maximum(y, 0.0)
    return y


# --------------------------------- main --------------------------------------

if __name__ == "__main__":
    # BasicConv(in_planes=4, out_planes=8, kernel_size=3, stride=1, padding=1,
    #           relu=True, bn=True, bias=False)
    N, Cin, H, W = 2, 4, 16, 16
    Cout, KH, KW = 8, 3, 3
    stride, padding, dilation = 1, 1, 1

    key = jax.random.PRNGKey(0)
    kx, kw, kg, kb, km, kv = jax.random.split(key, 6)

    x = jax.random.normal(kx, (N, Cin, H, W), dtype=jnp.float32)
    conv_w = jax.random.normal(kw, (Cout, Cin, KH, KW), dtype=jnp.float32) * 0.1
    bn_gamma = 1.0 + 0.1 * jax.random.normal(kg, (Cout,), dtype=jnp.float32)
    bn_beta = 0.1 * jax.random.normal(kb, (Cout,), dtype=jnp.float32)
    bn_mean = 0.1 * jax.random.normal(km, (Cout,), dtype=jnp.float32)
    bn_var = jnp.abs(1.0 + 0.1 * jax.random.normal(kv, (Cout,), dtype=jnp.float32))

    ref = _reference_forward(x, conv_w, bn_gamma, bn_beta, bn_mean, bn_var,
                             stride=stride, padding=padding, dilation=dilation,
                             relu=True, bn=True)
    ref = jax.block_until_ready(ref)

    # f32 streaming path (tight tolerance vs the XLA conv reference).
    fwd_f32 = make_basic_conv(conv_w, bn_gamma, bn_beta, bn_mean, bn_var,
                              stride=stride, padding=padding,
                              dilation=dilation, relu=True, bn=True,
                              compute_dtype=jnp.float32)
    out = jax.block_until_ready(fwd_f32(x))
    assert out.shape == (N, Cout, H, W), out.shape
    assert jnp.allclose(out, ref, atol=1e-4, rtol=1e-4), \
        float(jnp.max(jnp.abs(out - ref)))

    # Default bf16 streaming path (f32 MXU accumulation) — looser tolerance.
    fwd_bf16 = make_basic_conv(conv_w, bn_gamma, bn_beta, bn_mean, bn_var,
                               stride=stride, padding=padding,
                               dilation=dilation, relu=True, bn=True)
    out_bf16 = jax.block_until_ready(fwd_bf16(x))
    assert out_bf16.shape == (N, Cout, H, W), out_bf16.shape
    assert jnp.allclose(out_bf16, ref, atol=5e-2, rtol=5e-2), \
        float(jnp.max(jnp.abs(out_bf16 - ref)))

    print("KERNEL_OK")
</pallas_src>

<mosaic_0001>
module attributes {stable_mosaic.version = 11 : i64} {
  func.func @_conv_bn_relu_kernel(%arg0: i32, %arg1: memref<36x18x4xf32, #tpu.memory_space<vmem>>, %arg2: memref<36x128xf32, #tpu.memory_space<vmem>>, %arg3: memref<1x8xf32, #tpu.memory_space<vmem>>, %arg4: memref<512x8xf32, #tpu.memory_space<vmem>>, %arg5: memref<32x16x36xf32, #tpu.memory_space<vmem>>) attributes {dimension_semantics = [#tpu.dimension_semantics<arbitrary>], iteration_bounds = array<i64: 1>, scalar_prefetch = 0 : i64, scratch_operands = 1 : i64, tpu.core_type = #tpu.core_type<tc>, window_params = [{pipeline_mode = #tpu.pipeline_mode<synchronous>, transform_indices = @transform_0, window_bounds = array<i64: 36, 18, 4>}, {pipeline_mode = #tpu.pipeline_mode<synchronous>, transform_indices = @transform_1, window_bounds = array<i64: 36, 128>}, {pipeline_mode = #tpu.pipeline_mode<synchronous>, transform_indices = @transform_2, window_bounds = array<i64: 1, 8>}, {pipeline_mode = #tpu.pipeline_mode<synchronous>, transform_indices = @transform_3, window_bounds = array<i64: 512, 8>}]} {
    %c0 = arith.constant 0 : index
    %c0_0 = arith.constant 0 : index
    %c0_1 = arith.constant 0 : index
    %0 = vector.load %arg1[%c0, %c0_0, %c0_1] : memref<36x18x4xf32, #tpu.memory_space<vmem>>, vector<16x16x4xf32>
    %c0_2 = arith.constant 0 : index
    %c0_3 = arith.constant 0 : index
    %c0_4 = arith.constant 0 : index
    %1 = vector.load %arg5[%c0_2, %c0_3, %c0_4] : memref<32x16x36xf32, #tpu.memory_space<vmem>>, vector<16x16x4xf32>
    tpu.vector_store %arg5[%c0_2, %c0_3, %c0_4], %0 {strides = array<i32>} : memref<32x16x36xf32, #tpu.memory_space<vmem>>, vector<16x16x4xf32>,
    %c0_5 = arith.constant 0 : index
    %c1 = arith.constant 1 : index
    %c0_6 = arith.constant 0 : index
    %2 = vector.load %arg1[%c0_5, %c1, %c0_6] : memref<36x18x4xf32, #tpu.memory_space<vmem>>, vector<16x16x4xf32>
    %c0_7 = arith.constant 0 : index
    %c0_8 = arith.constant 0 : index
    %c4 = arith.constant 4 : index
    %3 = vector.load %arg5[%c0_7, %c0_8, %c4] : memref<32x16x36xf32, #tpu.memory_space<vmem>>, vector<16x16x4xf32>
    tpu.vector_store %arg5[%c0_7, %c0_8, %c4], %2 {strides = array<i32>} : memref<32x16x36xf32, #tpu.memory_space<vmem>>, vector<16x16x4xf32>,
    %c0_9 = arith.constant 0 : index
    %c2 = arith.constant 2 : index
    %c0_10 = arith.constant 0 : index
    %4 = vector.load %arg1[%c0_9, %c2, %c0_10] : memref<36x18x4xf32, #tpu.memory_space<vmem>>, vector<16x16x4xf32>
    %c0_11 = arith.constant 0 : index
    %c0_12 = arith.constant 0 : index
    %c8 = arith.constant 8 : index
    %5 = vector.load %arg5[%c0_11, %c0_12, %c8] : memref<32x16x36xf32, #tpu.memory_space<vmem>>, vector<16x16x4xf32>
    tpu.vector_store %arg5[%c0_11, %c0_12, %c8], %4 {strides = array<i32>} : memref<32x16x36xf32, #tpu.memory_space<vmem>>, vector<16x16x4xf32>,
    %c1_13 = arith.constant 1 : index
    %c0_14 = arith.constant 0 : index
    %c0_15 = arith.constant 0 : index
    %6 = vector.load %arg1[%c1_13, %c0_14, %c0_15] : memref<36x18x4xf32, #tpu.memory_space<vmem>>, vector<16x16x4xf32>
    %c0_16 = arith.constant 0 : index
    %c0_17 = arith.constant 0 : index
    %c12 = arith.constant 12 : index
    %7 = vector.load %arg5[%c0_16, %c0_17, %c12] : memref<32x16x36xf32, #tpu.memory_space<vmem>>, vector<16x16x4xf32>
    tpu.vector_store %arg5[%c0_16, %c0_17, %c12], %6 {strides = array<i32>} : memref<32x16x36xf32, #tpu.memory_space<vmem>>, vector<16x16x4xf32>,
    %c1_18 = arith.constant 1 : index
    %c1_19 = arith.constant 1 : index
    %c0_20 = arith.constant 0 : index
    %8 = vector.load %arg1[%c1_18, %c1_19, %c0_20] : memref<36x18x4xf32, #tpu.memory_space<vmem>>, vector<16x16x4xf32>
    %c0_21 = arith.constant 0 : index
    %c0_22 = arith.constant 0 : index
    %c16 = arith.constant 16 : index
    %9 = vector.load %arg5[%c0_21, %c0_22, %c16] : memref<32x16x36xf32, #tpu.memory_space<vmem>>, vector<16x16x4xf32>
    tpu.vector_store %arg5[%c0_21, %c0_22, %c16], %8 {strides = array<i32>} : memref<32x16x36xf32, #tpu.memory_space<vmem>>, vector<16x16x4xf32>,
    %c1_23 = arith.constant 1 : index
    %c2_24 = arith.constant 2 : index
    %c0_25 = arith.constant 0 : index
    %10 = vector.load %arg1[%c1_23, %c2_24, %c0_25] : memref<36x18x4xf32, #tpu.memory_space<vmem>>, vector<16x16x4xf32>
    %c0_26 = arith.constant 0 : index
    %c0_27 = arith.constant 0 : index
    %c20 = arith.constant 20 : index
    %11 = vector.load %arg5[%c0_26, %c0_27, %c20] : memref<32x16x36xf32, #tpu.memory_space<vmem>>, vector<16x16x4xf32>
    tpu.vector_store %arg5[%c0_26, %c0_27, %c20], %10 {strides = array<i32>} : memref<32x16x36xf32, #tpu.memory_space<vmem>>, vector<16x16x4xf32>,
    %c2_28 = arith.constant 2 : index
    %c0_29 = arith.constant 0 : index
    %c0_30 = arith.constant 0 : index
    %12 = vector.load %arg1[%c2_28, %c0_29, %c0_30] : memref<36x18x4xf32, #tpu.memory_space<vmem>>, vector<16x16x4xf32>
    %c0_31 = arith.constant 0 : index
    %c0_32 = arith.constant 0 : index
    %c24 = arith.constant 24 : index
    %13 = vector.load %arg5[%c0_31, %c0_32, %c24] : memref<32x16x36xf32, #tpu.memory_space<vmem>>, vector<16x16x4xf32>
    tpu.vector_store %arg5[%c0_31, %c0_32, %c24], %12 {strides = array<i32>} : memref<32x16x36xf32, #tpu.memory_space<vmem>>, vector<16x16x4xf32>,
    %c2_33 = arith.constant 2 : index
    %c1_34 = arith.constant 1 : index
    %c0_35 = arith.constant 0 : index
    %14 = vector.load %arg1[%c2_33, %c1_34, %c0_35] : memref<36x18x4xf32, #tpu.memory_space<vmem>>, vector<16x16x4xf32>
    %c0_36 = arith.constant 0 : index
    %c0_37 = arith.constant 0 : index
    %c28 = arith.constant 28 : index
    %15 = vector.load %arg5[%c0_36, %c0_37, %c28] : memref<32x16x36xf32, #tpu.memory_space<vmem>>, vector<16x16x4xf32>
    tpu.vector_store %arg5[%c0_36, %c0_37, %c28], %14 {strides = array<i32>} : memref<32x16x36xf32, #tpu.memory_space<vmem>>, vector<16x16x4xf32>,
    %c2_38 = arith.constant 2 : index
    %c2_39 = arith.constant 2 : index
    %c0_40 = arith.constant 0 : index
    %16 = vector.load %arg1[%c2_38, %c2_39, %c0_40] : memref<36x18x4xf32, #tpu.memory_space<vmem>>, vector<16x16x4xf32>
    %c0_41 = arith.constant 0 : index
    %c0_42 = arith.constant 0 : index
    %c32 = arith.constant 32 : index
    %17 = vector.load %arg5[%c0_41, %c0_42, %c32] : memref<32x16x36xf32, #tpu.memory_space<vmem>>, vector<16x16x4xf32>
    tpu.vector_store %arg5[%c0_41, %c0_42, %c32], %16 {strides = array<i32>} : memref<32x16x36xf32, #tpu.memory_space<vmem>>, vector<16x16x4xf32>,
    %c18 = arith.constant 18 : index
    %c0_43 = arith.constant 0 : index
    %c0_44 = arith.constant 0 : index
    %18 = vector.load %arg1[%c18, %c0_43, %c0_44] : memref<36x18x4xf32, #tpu.memory_space<vmem>>, vector<16x16x4xf32>
    %c16_45 = arith.constant 16 : index
    %c0_46 = arith.constant 0 : index
    %c0_47 = arith.constant 0 : index
    %19 = vector.load %arg5[%c16_45, %c0_46, %c0_47] : memref<32x16x36xf32, #tpu.memory_space<vmem>>, vector<16x16x4xf32>
    tpu.vector_store %arg5[%c16_45, %c0_46, %c0_47], %18 {strides = array<i32>} : memref<32x16x36xf32, #tpu.memory_space<vmem>>, vector<16x16x4xf32>,
    %c18_48 = arith.constant 18 : index
    %c1_49 = arith.constant 1 : index
    %c0_50 = arith.constant 0 : index
    %20 = vector.load %arg1[%c18_48, %c1_49, %c0_50] : memref<36x18x4xf32, #tpu.memory_space<vmem>>, vector<16x16x4xf32>
    %c16_51 = arith.constant 16 : index
    %c0_52 = arith.constant 0 : index
    %c4_53 = arith.constant 4 : index
    %21 = vector.load %arg5[%c16_51, %c0_52, %c4_53] : memref<32x16x36xf32, #tpu.memory_space<vmem>>, vector<16x16x4xf32>
    tpu.vector_store %arg5[%c16_51, %c0_52, %c4_53], %20 {strides = array<i32>} : memref<32x16x36xf32, #tpu.memory_space<vmem>>, vector<16x16x4xf32>,
    %c18_54 = arith.constant 18 : index
    %c2_55 = arith.constant 2 : index
    %c0_56 = arith.constant 0 : index
    %22 = vector.load %arg1[%c18_54, %c2_55, %c0_56] : memref<36x18x4xf32, #tpu.memory_space<vmem>>, vector<16x16x4xf32>
    %c16_57 = arith.constant 16 : index
    %c0_58 = arith.constant 0 : index
    %c8_59 = arith.constant 8 : index
    %23 = vector.load %arg5[%c16_57, %c0_58, %c8_59] : memref<32x16x36xf32, #tpu.memory_space<vmem>>, vector<16x16x4xf32>
    tpu.vector_store %arg5[%c16_57, %c0_58, %c8_59], %22 {strides = array<i32>} : memref<32x16x36xf32, #tpu.memory_space<vmem>>, vector<16x16x4xf32>,
    %c19 = arith.constant 19 : index
    %c0_60 = arith.constant 0 : index
    %c0_61 = arith.constant 0 : index
    %24 = vector.load %arg1[%c19, %c0_60, %c0_61] : memref<36x18x4xf32, #tpu.memory_space<vmem>>, vector<16x16x4xf32>
    %c16_62 = arith.constant 16 : index
    %c0_63 = arith.constant 0 : index
    %c12_64 = arith.constant 12 : index
    %25 = vector.load %arg5[%c16_62, %c0_63, %c12_64] : memref<32x16x36xf32, #tpu.memory_space<vmem>>, vector<16x16x4xf32>
    tpu.vector_store %arg5[%c16_62, %c0_63, %c12_64], %24 {strides = array<i32>} : memref<32x16x36xf32, #tpu.memory_space<vmem>>, vector<16x16x4xf32>,
    %c19_65 = arith.constant 19 : index
    %c1_66 = arith.constant 1 : index
    %c0_67 = arith.constant 0 : index
    %26 = vector.load %arg1[%c19_65, %c1_66, %c0_67] : memref<36x18x4xf32, #tpu.memory_space<vmem>>, vector<16x16x4xf32>
    %c16_68 = arith.constant 16 : index
    %c0_69 = arith.constant 0 : index
    %c16_70 = arith.constant 16 : index
    %27 = vector.load %arg5[%c16_68, %c0_69, %c16_70] : memref<32x16x36xf32, #tpu.memory_space<vmem>>, vector<16x16x4xf32>
    tpu.vector_store %arg5[%c16_68, %c0_69, %c16_70], %26 {strides = array<i32>} : memref<32x16x36xf32, #tpu.memory_space<vmem>>, vector<16x16x4xf32>,
    %c19_71 = arith.constant 19 : index
    %c2_72 = arith.constant 2 : index
    %c0_73 = arith.constant 0 : index
    %28 = vector.load %arg1[%c19_71, %c2_72, %c0_73] : memref<36x18x4xf32, #tpu.memory_space<vmem>>, vector<16x16x4xf32>
    %c16_74 = arith.constant 16 : index
    %c0_75 = arith.constant 0 : index
    %c20_76 = arith.constant 20 : index
    %29 = vector.load %arg5[%c16_74, %c0_75, %c20_76] : memref<32x16x36xf32, #tpu.memory_space<vmem>>, vector<16x16x4xf32>
    tpu.vector_store %arg5[%c16_74, %c0_75, %c20_76], %28 {strides = array<i32>} : memref<32x16x36xf32, #tpu.memory_space<vmem>>, vector<16x16x4xf32>,
    %c20_77 = arith.constant 20 : index
    %c0_78 = arith.constant 0 : index
    %c0_79 = arith.constant 0 : index
    %30 = vector.load %arg1[%c20_77, %c0_78, %c0_79] : memref<36x18x4xf32, #tpu.memory_space<vmem>>, vector<16x16x4xf32>
    %c16_80 = arith.constant 16 : index
    %c0_81 = arith.constant 0 : index
    %c24_82 = arith.constant 24 : index
    %31 = vector.load %arg5[%c16_80, %c0_81, %c24_82] : memref<32x16x36xf32, #tpu.memory_space<vmem>>, vector<16x16x4xf32>
    tpu.vector_store %arg5[%c16_80, %c0_81, %c24_82], %30 {strides = array<i32>} : memref<32x16x36xf32, #tpu.memory_space<vmem>>, vector<16x16x4xf32>,
    %c20_83 = arith.constant 20 : index
    %c1_84 = arith.constant 1 : index
    %c0_85 = arith.constant 0 : index
    %32 = vector.load %arg1[%c20_83, %c1_84, %c0_85] : memref<36x18x4xf32, #tpu.memory_space<vmem>>, vector<16x16x4xf32>
    %c16_86 = arith.constant 16 : index
    %c0_87 = arith.constant 0 : index
    %c28_88 = arith.constant 28 : index
    %33 = vector.load %arg5[%c16_86, %c0_87, %c28_88] : memref<32x16x36xf32, #tpu.memory_space<vmem>>, vector<16x16x4xf32>
    tpu.vector_store %arg5[%c16_86, %c0_87, %c28_88], %32 {strides = array<i32>} : memref<32x16x36xf32, #tpu.memory_space<vmem>>, vector<16x16x4xf32>,
    %c20_89 = arith.constant 20 : index
    %c2_90 = arith.constant 2 : index
    %c0_91 = arith.constant 0 : index
    %34 = vector.load %arg1[%c20_89, %c2_90, %c0_91] : memref<36x18x4xf32, #tpu.memory_space<vmem>>, vector<16x16x4xf32>
    %c16_92 = arith.constant 16 : index
    %c0_93 = arith.constant 0 : index
    %c32_94 = arith.constant 32 : index
    %35 = vector.load %arg5[%c16_92, %c0_93, %c32_94] : memref<32x16x36xf32, #tpu.memory_space<vmem>>, vector<16x16x4xf32>
    tpu.vector_store %arg5[%c16_92, %c0_93, %c32_94], %34 {strides = array<i32>} : memref<32x16x36xf32, #tpu.memory_space<vmem>>, vector<16x16x4xf32>,
    %c0_95 = arith.constant 0 : index
    %c0_96 = arith.constant 0 : index
    %c0_97 = arith.constant 0 : index
    %36 = vector.load %arg5[%c0_95, %c0_96, %c0_97] : memref<32x16x36xf32, #tpu.memory_space<vmem>>, vector<32x16x36xf32>
    %37 = vector.shape_cast %36 : vector<32x16x36xf32> to vector<512x36xf32>
    %c0_98 = arith.constant 0 : index
    %c0_99 = arith.constant 0 : index
    %38 = vector.load %arg2[%c0_98, %c0_99] : memref<36x128xf32, #tpu.memory_space<vmem>>, vector<36x128xf32>
    %cst = arith.constant dense<0.000000e+00> : vector<512x128xf32>
    %39 = tpu.matmul %37, %38, %cst {dimension_numbers = #tpu.dot_dimension_numbers<[1], [0], [0], [1], [0, 0, 1, 1], [], []>} : vector<512x36xf32>, vector<36x128xf32>, vector<512x128xf32> -> vector<512x128xf32>
    %40 = vector.extract_strided_slice %39 {offsets = [0, 0], sizes = [512, 8], strides = [1, 1]} : vector<512x128xf32> to vector<512x8xf32>
    %c0_100 = arith.constant 0 : index
    %c0_101 = arith.constant 0 : index
    %41 = vector.load %arg3[%c0_100, %c0_101] : memref<1x8xf32, #tpu.memory_space<vmem>>, vector<1x8xf32>
    %42 = vector.broadcast %41 : vector<1x8xf32> to vector<512x8xf32>
    %43 = arith.addf %40, %42 : vector<512x8xf32>
    %cst_102 = arith.constant 0.000000e+00 : f32
    %44 = vector.broadcast %cst_102 : f32 to vector<512x8xf32>
    %45 = arith.maximumf %43, %44 : vector<512x8xf32>
    %c0_103 = arith.constant 0 : index
    %c0_104 = arith.constant 0 : index
    %46 = vector.load %arg4[%c0_103, %c0_104] : memref<512x8xf32, #tpu.memory_space<vmem>>, vector<512x8xf32>
    tpu.vector_store %arg4[%c0_103, %c0_104], %45 {strides = array<i32>} : memref<512x8xf32, #tpu.memory_space<vmem>>, vector<512x8xf32>,
    return
  }
  func.func @transform_0(%arg0: i32) -> (i32, i32, i32) {
    %c0_i32 = arith.constant 0 : i32
    %c0_i32_0 = arith.constant 0 : i32
    %c0_i32_1 = arith.constant 0 : i32
    %c0_i32_2 = arith.constant 0 : i32
    return %c0_i32, %c0_i32_0, %c0_i32_1 : i32, i32, i32
  }
  func.func @transform_1(%arg0: i32) -> (i32, i32) {
    %c0_i32 = arith.constant 0 : i32
    %c0_i32_0 = arith.constant 0 : i32
    %c0_i32_1 = arith.constant 0 : i32
    return %c0_i32, %c0_i32_0 : i32, i32
  }
  func.func @transform_2(%arg0: i32) -> (i32, i32) {
    %c0_i32 = arith.constant 0 : i32
    %c0_i32_0 = arith.constant 0 : i32
    %c0_i32_1 = arith.constant 0 : i32
    return %c0_i32, %c0_i32_0 : i32, i32
  }
  func.func @transform_3(%arg0: i32) -> (i32, i32) {
    %c0_i32 = arith.constant 0 : i32
    %c0_i32_0 = arith.constant 0 : i32
    %c0_i32_1 = arith.constant 0 : i32
    return %c0_i32, %c0_i32_0 : i32, i32
  }
}

</mosaic_0001>

<bundles_post_ra>
// kernel: forward.1
= control target key start
LH: loop header
LB: loop body
LE: loop exit
PB: predicated region body
PF: predicated region fallthrough
CT: control target
= control target key end

     0   :  { %s4828_s16 = smov 4   ;;  %vm46_vm0 = vcmask 31744   ;;  %s4829_s14 = smov 8   ;;  %vm239_vm1 = vcmask 64544   ;;  %vm432_vm2 = vcmask 97344   ;;  %vm626_vm3 = vcmask 130144   ;;  %s7917_s0 = inlined_call_operand.vmem [shape: f32[36,18,4], index: 0, kind: input, shape index: {}]   ;;  %s7918_s1 = inlined_call_operand.vmem [shape: f32[36,128], index: 1, kind: input, shape index: {}]   ;;  %s7919_s2 = inlined_call_operand.vmem [shape: f32[1,8], index: 2, kind: input, shape index: {}]   ;;  %s7920_s3 = inlined_call_operand.vmem [shape: f32[512,8], index: 3, kind: output, shape index: {}]  }
   0x1   :  { %v79_v0 = vld [vmem:[%s7917_s0 + $0x1] sm:$0xff]  ;;  %v4862_v1 = vld [vmem:[%s7917_s0 + $0x19] sm:$0xff]  ;;  %v80_v2 = vld [vmem:[%s7917_s0 + $0x9] sm:$0xff]  ;;  %s4830_s26 = smov 12   ;;  %s4831_s4 = smov 16   ;;  %vm819_vm4 = vcmask 162944  }
   0x2   :  { %143 = vrot.lane.b32.xlu0 %v79_v0, %s4828_s16  ;;  %147 = vrot.lane.b32.xlu1 %v4862_v1, %s4828_s16  ;;  %v4873_v3 = vld [vmem:[%s7917_s0 + $0x21] sm:$0xff]  ;;  %v4881_v4 = vld [vmem:[%s7917_s0 + $0x31] sm:$0xff]  ;;  %s4832_s9 = smov 20   ;;  %s4833_s15 = smov 24   ;;  %vm1012_vm5 = vcmask 195744   ;;  %vm1206_vm6 = vcmask 228544  }
   0x3   :  { %v4886_v5 = vld [vmem:[%s7917_s0 + $0x39] sm:$0xff]  ;;  %v4895_v6 = vld [vmem:[%s7917_s0 + $0x49] sm:$0xff]  ;;  %v4900_v7 = vld [vmem:[%s7917_s0 + $0x51] sm:$0xff]  ;;  %s4834_s25 = smov 28   ;;  %vm3491_vm7 = vcmask 1043456   ;;  %s4835_s11 = smov 32  }
   0x4   :  { %v4909_v8 = vld [vmem:[%s7917_s0 + $0x61] sm:$0xff]  ;;  %v4914_v9 = vld [vmem:[%s7917_s0 + $0x69] sm:$0xff]  ;;  %v4923_v10 = vld [vmem:[%s7917_s0 + $0x79] sm:$0xff]  ;;  %vm1399_vm8 = vcmask 261344   ;;  %vm1592_vm9 = vcmask 294144   ;;  %vm3298_vm10 = vcmask 293888  }
   0x5   :  { %v4928_v11 = vld [vmem:[%s7917_s0 + $0x81] sm:$0xff]  ;;  %v4940_v13 = vld [vmem:[%s7917_s0 + $0x18] sm:$0xff]  ;;  %v4967_v18 = vld [vmem:[%s7917_s0 + $0xa9] sm:$0xff]  ;;  %vm4015_vm11 = vcmask 64512  }
   0x6   :  { %145 = vrot.lane.b32.xlu0 %v80_v2, %s4828_s16  ;;  %149 = vrot.lane.b32.xlu1 %v4873_v3, %s4828_s16  ;;  %v14_v12 = vld [vmem:[%s7917_s0] sm:$0xff]  ;;  %v4945_v14 = vld [vmem:[%s7917_s0 + $0x91] sm:$0xff]  ;;  %49 = vst.msk [vmem:[#allocation2 + $0x10] sm:$0xff] %vm46_vm0, %v4940_v13 }
   0x7   :  { %v4950_v15 = vld [vmem:[%s7917_s0 + $0x99] sm:$0xff]  ;;  %47 = vst.msk [vmem:[#allocation2] sm:$0xff] %vm46_vm0, %v14_v12  ;;  %v15_v16 = vld [vmem:[%s7917_s0 + $0x8] sm:$0xff]  ;;  %v4974_v19 = vld [vmem:[%s7917_s0 + $0x30] sm:$0xff] }
   0x8   :  { %48 = vst.msk [vmem:[#allocation2 + $0x8] sm:$0xff] %vm46_vm0, %v15_v16  ;;  %v4962_v17 = vld [vmem:[%s7917_s0 + $0x20] sm:$0xff]  ;;  %v4979_v20 = vld [vmem:[%s7917_s0 + $0x38] sm:$0xff]  ;;  %51 = vst.msk [vmem:[#allocation2 + $0x20] sm:$0xff] %vm46_vm0, %v4974_v19 }
   0x9   :  { %50 = vst.msk [vmem:[#allocation2 + $0x18] sm:$0xff] %vm46_vm0, %v4962_v17  ;;  %v4988_v21 = vld [vmem:[%s7917_s0 + $0xb1] sm:$0xff]  ;;  %52 = vst.msk [vmem:[#allocation2 + $0x28] sm:$0xff] %vm46_vm0, %v4979_v20  ;;  %v4997_v22 = vld [vmem:[%s7917_s0 + $0x48] sm:$0xff] }
   0xa   :  { %151 = vrot.lane.b32.xlu0 %v4881_v4, %s4828_s16  ;;  %153 = vrot.lane.b32.xlu1 %v4886_v5, %s4828_s16  ;;  %53 = vst.msk [vmem:[#allocation2 + $0x30] sm:$0xff] %vm46_vm0, %v4997_v22  ;;  %v5004_v23 = vld [vmem:[%s7917_s0 + $0x50] sm:$0xff]  ;;  %v5009_v24 = vld [vmem:[%s7917_s0 + $0x60] sm:$0xff] }
   0xb   :  { %v5014_v25 = vld [vmem:[%s7917_s0 + $0x68] sm:$0xff]  ;;  %54 = vst.msk [vmem:[#allocation2 + $0x38] sm:$0xff] %vm46_vm0, %v5004_v23  ;;  %55 = vst.msk [vmem:[#allocation2 + $0x40] sm:$0xff] %vm46_vm0, %v5009_v24  ;;  %v5025_v26 = vld [vmem:[%s7917_s0 + $0x78] sm:$0xff] }
   0xc   :  { %56 = vst.msk [vmem:[#allocation2 + $0x48] sm:$0xff] %vm46_vm0, %v5014_v25  ;;  %v5030_v27 = vld [vmem:[%s7917_s0 + $0x80] sm:$0xff]  ;;  %v5035_v28 = vld [vmem:[%s7917_s0 + $0x90] sm:$0xff]  ;;  %57 = vst.msk [vmem:[#allocation2 + $0x50] sm:$0xff] %vm46_vm0, %v5025_v26 }
   0xd   :  { %v5040_v29 = vld [vmem:[%s7917_s0 + $0xc1] sm:$0xff]  ;;  %v5045_v30 = vld [vmem:[%s7917_s0 + $0xc9] sm:$0xff]  ;;  %58 = vst.msk [vmem:[#allocation2 + $0x58] sm:$0xff] %vm46_vm0, %v5030_v27  ;;  %59 = vst.msk [vmem:[#allocation2 + $0x60] sm:$0xff] %vm46_vm0, %v5035_v28 }
   0xe   :  { %155 = vrot.lane.b32.xlu0 %v4895_v6, %s4828_s16  ;;  %157 = vrot.lane.b32.xlu1 %v4900_v7, %s4828_s16  ;;  %v5056_v31 = vld [vmem:[%s7917_s0 + $0x98] sm:$0xff]  ;;  %v5061_v32 = vld [vmem:[%s7917_s0 + $0xa8] sm:$0xff] }
   0xf   :  { %v5066_v33 = vld [vmem:[%s7917_s0 + $0xb0] sm:$0xff]  ;;  %60 = vst.msk [vmem:[#allocation2 + $0x68] sm:$0xff] %vm46_vm0, %v5056_v31  ;;  %61 = vst.msk [vmem:[#allocation2 + $0x70] sm:$0xff] %vm46_vm0, %v5061_v32  ;;  %v5081_v34 = vld [vmem:[%s7917_s0 + $0xc0] sm:$0xff] }
  0x10   :  { %62 = vst.msk [vmem:[#allocation2 + $0x78] sm:$0xff] %vm46_vm0, %v5066_v33  ;;  %v5086_v35 = vld [vmem:[%s7917_s0 + $0xc8] sm:$0xff]  ;;  %63 = vst.msk [vmem:[#allocation2 + $0x80] sm:$0xff] %vm46_vm0, %v5081_v34  ;;  %v5095_v36 = vld [vmem:[%s7917_s0 + $0xd8] sm:$0xff] }
  0x11   :  { %64 = vst.msk [vmem:[#allocation2 + $0x88] sm:$0xff] %vm46_vm0, %v5086_v35  ;;  %v5100_v37 = vld [vmem:[%s7917_s0 + $0xe0] sm:$0xff]  ;;  %v5105_v38 = vld [vmem:[%s7917_s0 + $0xf0] sm:$0xff]  ;;  %65 = vst.msk [vmem:[#allocation2 + $0x90] sm:$0xff] %vm46_vm0, %v5095_v36 }
  0x12   :  { %159 = vrot.lane.b32.xlu0 %v4909_v8, %s4828_s16  ;;  %161 = vrot.lane.b32.xlu1 %v4914_v9, %s4828_s16  ;;  %66 = vst.msk [vmem:[#allocation2 + $0x98] sm:$0xff] %vm46_vm0, %v5100_v37  ;;  %67 = vst.msk [vmem:[#allocation2 + $0xa0] sm:$0xff] %vm46_vm0, %v5105_v38  ;;  %v5116_v39 = vld [vmem:[%s7917_s0 + $0xf8] sm:$0xff]  ;;  %v5121_v40 = vld [vmem:[%s7917_s0 + $0x108] sm:$0xff] }
  0x13   :  { %v5126_v41 = vld [vmem:[%s7917_s0 + $0x110] sm:$0xff]  ;;  %68 = vst.msk [vmem:[#allocation2 + $0xa8] sm:$0xff] %vm46_vm0, %v5116_v39  ;;  %69 = vst.msk [vmem:[#allocation2 + $0xb0] sm:$0xff] %vm46_vm0, %v5121_v40  ;;  %v5141_v42 = vld [vmem:[%s7917_s0 + $0xd9] sm:$0xff] }
  0x14   :  { %70 = vst.msk [vmem:[#allocation2 + $0xb8] sm:$0xff] %vm46_vm0, %v5126_v41  ;;  %v5146_v43 = vld [vmem:[%s7917_s0 + $0xe1] sm:$0xff]  ;;  %v5169_v46 = vld [vmem:[%s7917_s0 + $0xf1] sm:$0xff]  ;;  %v5174_v47 = vld [vmem:[%s7917_s0 + $0xf9] sm:$0xff] }
  0x15   :  { %v5151_v44 = vld [vmem:[%s7917_s0 + $0x120] sm:$0xff]  ;;  %v5158_v45 = vld [vmem:[%s7917_s0 + $0x128] sm:$0xff]  ;;  %v5179_v48 = vld [vmem:[%s7917_s0 + $0x138] sm:$0xff] }
  0x16   :  { %163 = vrot.lane.b32.xlu0 %v4923_v10, %s4828_s16  ;;  %165 = vrot.lane.b32.xlu1 %v4928_v11, %s4828_s16  ;;  %71 = vst.msk [vmem:[#allocation2 + $0xc0] sm:$0xff] %vm46_vm0, %v5151_v44  ;;  %72 = vst.msk [vmem:[#allocation2 + $0xc8] sm:$0xff] %vm46_vm0, %v5158_v45  ;;  %v5186_v49 = vld [vmem:[%s7917_s0 + $0x140] sm:$0xff]  ;;  %v5197_v50 = vld [vmem:[%s7917_s0 + $0x109] sm:$0xff] }
  0x17   :  { %73 = vst.msk [vmem:[#allocation2 + $0xd0] sm:$0xff] %vm46_vm0, %v5179_v48  ;;  %74 = vst.msk [vmem:[#allocation2 + $0xd8] sm:$0xff] %vm46_vm0, %v5186_v49  ;;  %v5202_v51 = vld [vmem:[%s7917_s0 + $0x111] sm:$0xff]  ;;  %v5225_v54 = vld [vmem:[%s7917_s0 + $0x121] sm:$0xff] }
  0x18   :  { %v5207_v52 = vld [vmem:[%s7917_s0 + $0x150] sm:$0xff]  ;;  %v5214_v53 = vld [vmem:[%s7917_s0 + $0x158] sm:$0xff]  ;;  %v5235_v56 = vld [vmem:[%s7917_s0 + $0x168] sm:$0xff] }
  0x19   :  { %75 = vst.msk [vmem:[#allocation2 + $0xe0] sm:$0xff] %vm46_vm0, %v5207_v52  ;;  %76 = vst.msk [vmem:[#allocation2 + $0xe8] sm:$0xff] %vm46_vm0, %v5214_v53  ;;  %v5230_v55 = vld [vmem:[%s7917_s0 + $0x129] sm:$0xff]  ;;  %v5253_v58 = vld [vmem:[%s7917_s0 + $0x139] sm:$0xff] }
  0x1a   :  { %167 = vrot.lane.b32.xlu0 %v4945_v14, %s4828_s16  ;;  %169 = vrot.lane.b32.xlu1 %v4950_v15, %s4828_s16  ;;  %77 = vst.msk [vmem:[#allocation2 + $0xf0] sm:$0xff] %vm46_vm0, %v5235_v56  ;;  %v5242_v57 = vld [vmem:[%s7917_s0 + $0x170] sm:$0xff]  ;;  %v5258_v59 = vld [vmem:[%s7917_s0 + $0x141] sm:$0xff] }
  0x1b   :  { %78 = vst.msk [vmem:[#allocation2 + $0xf8] sm:$0xff] %vm46_vm0, %v5242_v57  ;;  %v5267_v60 = vld [vmem:[%s7917_s0 + $0x151] sm:$0xff]  ;;  %v5272_v61 = vld [vmem:[%s7917_s0 + $0x159] sm:$0xff]  ;;  %v5281_v62 = vld [vmem:[%s7917_s0 + $0x169] sm:$0xff] }
  0x1c   :  { %7951 = vst [vmem:[#allocation3_spill] sm:$0xff] %v5272_v61  ;;  %7952 = vst [vmem:[#allocation4_spill] sm:$0xff] %v5281_v62  ;;  %v5286_v63 = vld [vmem:[%s7917_s0 + $0x171] sm:$0xff]  ;;  %v272_v0 = vld [vmem:[%s7917_s0 + $0x2] sm:$0xff] }
  0x1d   :  { %7953 = vst [vmem:[#allocation5_spill] sm:$0xff] %v5286_v63  ;;  %v273_v2 = vld [vmem:[%s7917_s0 + $0xa] sm:$0xff]  ;;  %v5303_v12 = vld [vmem:[%s7917_s0 + $0x1a] sm:$0xff]  ;;  %v5308_v16 = vld [vmem:[%s7917_s0 + $0x22] sm:$0xff] }
  0x1e   :  { %171 = vrot.lane.b32.xlu0 %v4967_v18, %s4828_s16  ;;  %173 = vrot.lane.b32.xlu1 %v4988_v21, %s4828_s16  ;;  %7954 = vst [vmem:[#allocation6_spill] sm:$0xff] %v5303_v12  ;;  %7955 = vst [vmem:[#allocation7_spill] sm:$0xff] %v5308_v16 }
  0x22   :  { %175 = vrot.lane.b32.xlu0 %v5040_v29, %s4828_s16  ;;  %177 = vrot.lane.b32.xlu1 %v5045_v30, %s4828_s16 }
  0x26   :  { %179 = vrot.lane.b32.xlu0 %v5141_v42, %s4828_s16  ;;  %181 = vrot.lane.b32.xlu1 %v5146_v43, %s4828_s16 }
  0x2a   :  { %183 = vrot.lane.b32.xlu0 %v5169_v46, %s4828_s16  ;;  %185 = vrot.lane.b32.xlu1 %v5174_v47, %s4828_s16 }
  0x2e   :  { %187 = vrot.lane.b32.xlu0 %v5197_v50, %s4828_s16  ;;  %189 = vrot.lane.b32.xlu1 %v5202_v51, %s4828_s16 }
  0x32   :  { %191 = vrot.lane.b32.xlu0 %v5225_v54, %s4828_s16  ;;  %193 = vrot.lane.b32.xlu1 %v5230_v55, %s4828_s16 }
  0x36   :  { %195 = vrot.lane.b32.xlu0 %v5253_v58, %s4828_s16  ;;  %197 = vrot.lane.b32.xlu1 %v5258_v59, %s4828_s16 }
  0x3a   :  { %199 = vrot.lane.b32.xlu0 %v5267_v60, %s4828_s16  ;;  %201 = vrot.lane.b32.xlu1 %v5272_v61, %s4828_s16 }
  0x3e   :  { %203 = vrot.lane.b32.xlu0 %v5281_v62, %s4828_s16  ;;  %205 = vrot.lane.b32.xlu1 %v5286_v63, %s4828_s16 }
  0x42   :  { %336 = vrot.lane.b32.xlu0 %v272_v0, %s4829_s14  ;;  %338 = vrot.lane.b32.xlu1 %v273_v2, %s4829_s14  ;;  %v5317_v0 = vld [vmem:[%s7917_s0 + $0x32] sm:$0xff]  ;;  %v5322_v2 = vld [vmem:[%s7917_s0 + $0x3a] sm:$0xff] }
  0x43   :  { %7956 = vst [vmem:[#allocation8_spill] sm:$0xff] %v5317_v0  ;;  %7957 = vst [vmem:[#allocation9_spill] sm:$0xff] %v5322_v2 }
  0x46   :  { %340 = vrot.lane.b32.xlu0 %v5303_v12, %s4829_s14  ;;  %342 = vrot.lane.b32.xlu1 %v5308_v16, %s4829_s14  ;;  %v5331_v16 = vld [vmem:[%s7917_s0 + $0x4a] sm:$0xff]  ;;  %v5336_v12 = vld [vmem:[%s7917_s0 + $0x52] sm:$0xff] }
  0x47   :  { %7958 = vst [vmem:[#allocation10_spill] sm:$0xff] %v5331_v16  ;;  %7959 = vst [vmem:[#allocation11_spill] sm:$0xff] %v5336_v12 }
  0x4a   :  { %344 = vrot.lane.b32.xlu0 %v5317_v0, %s4829_s14  ;;  %346 = vrot.lane.b32.xlu1 %v5322_v2, %s4829_s14  ;;  %v5345_v2 = vld [vmem:[%s7917_s0 + $0x62] sm:$0xff]  ;;  %v5350_v0 = vld [vmem:[%s7917_s0 + $0x6a] sm:$0xff] }
  0x4b   :  { %7960 = vst [vmem:[#allocation12_spill] sm:$0xff] %v5345_v2  ;;  %7961 = vst [vmem:[#allocation13_spill] sm:$0xff] %v5350_v0 }
  0x4e   :  { %348 = vrot.lane.b32.xlu0 %v5331_v16, %s4829_s14  ;;  %350 = vrot.lane.b32.xlu1 %v5336_v12, %s4829_s14  ;;  %v5359_v12 = vld [vmem:[%s7917_s0 + $0x7a] sm:$0xff]  ;;  %v5364_v16 = vld [vmem:[%s7917_s0 + $0x82] sm:$0xff] }
  0x4f   :  { %7962 = vst [vmem:[#allocation14_spill] sm:$0xff] %v5359_v12  ;;  %7963 = vst [vmem:[#allocation15_spill] sm:$0xff] %v5364_v16 }
  0x52   :  { %352 = vrot.lane.b32.xlu0 %v5345_v2, %s4829_s14  ;;  %354 = vrot.lane.b32.xlu1 %v5350_v0, %s4829_s14  ;;  %v5373_v0 = vld [vmem:[%s7917_s0 + $0x92] sm:$0xff]  ;;  %v5378_v2 = vld [vmem:[%s7917_s0 + $0x9a] sm:$0xff] }
  0x53   :  { %7964 = vst [vmem:[#allocation16_spill] sm:$0xff] %v5373_v0  ;;  %7965 = vst [vmem:[#allocation17_spill] sm:$0xff] %v5378_v2 }
  0x56   :  { %356 = vrot.lane.b32.xlu0 %v5359_v12, %s4829_s14  ;;  %358 = vrot.lane.b32.xlu1 %v5364_v16, %s4829_s14  ;;  %v5387_v16 = vld [vmem:[%s7917_s0 + $0xaa] sm:$0xff]  ;;  %v5392_v12 = vld [vmem:[%s7917_s0 + $0xb2] sm:$0xff] }
  0x57   :  { %7966 = vst [vmem:[#allocation18_spill] sm:$0xff] %v5387_v16  ;;  %7967 = vst [vmem:[#allocation19_spill] sm:$0xff] %v5392_v12 }
  0x5a   :  { %360 = vrot.lane.b32.xlu0 %v5373_v0, %s4829_s14  ;;  %362 = vrot.lane.b32.xlu1 %v5378_v2, %s4829_s14  ;;  %v5401_v2 = vld [vmem:[%s7917_s0 + $0xc2] sm:$0xff]  ;;  %v5406_v0 = vld [vmem:[%s7917_s0 + $0xca] sm:$0xff] }
  0x5b   :  { %7968 = vst [vmem:[#allocation20_spill] sm:$0xff] %v5401_v2  ;;  %7969 = vst [vmem:[#allocation21_spill] sm:$0xff] %v5406_v0 }
  0x5e   :  { %364 = vrot.lane.b32.xlu0 %v5387_v16, %s4829_s14  ;;  %366 = vrot.lane.b32.xlu1 %v5392_v12, %s4829_s14  ;;  %v5415_v12 = vld [vmem:[%s7917_s0 + $0xda] sm:$0xff]  ;;  %v5420_v16 = vld [vmem:[%s7917_s0 + $0xe2] sm:$0xff] }
  0x5f   :  { %7970 = vst [vmem:[#allocation22_spill] sm:$0xff] %v5415_v12  ;;  %7971 = vst [vmem:[#allocation23_spill] sm:$0xff] %v5420_v16 }
  0x62   :  { %368 = vrot.lane.b32.xlu0 %v5401_v2, %s4829_s14  ;;  %370 = vrot.lane.b32.xlu1 %v5406_v0, %s4829_s14  ;;  %v5429_v0 = vld [vmem:[%s7917_s0 + $0xf2] sm:$0xff]  ;;  %v5434_v2 = vld [vmem:[%s7917_s0 + $0xfa] sm:$0xff] }
  0x63   :  { %7972 = vst [vmem:[#allocation24_spill] sm:$0xff] %v5429_v0  ;;  %7973 = vst [vmem:[#allocation25_spill] sm:$0xff] %v5434_v2 }
  0x66   :  { %372 = vrot.lane.b32.xlu0 %v5415_v12, %s4829_s14  ;;  %374 = vrot.lane.b32.xlu1 %v5420_v16, %s4829_s14  ;;  %v5443_v16 = vld [vmem:[%s7917_s0 + $0x10a] sm:$0xff]  ;;  %v5448_v12 = vld [vmem:[%s7917_s0 + $0x112] sm:$0xff] }
  0x67   :  { %7974 = vst [vmem:[#allocation26_spill] sm:$0xff] %v5443_v16  ;;  %7975 = vst [vmem:[#allocation27_spill] sm:$0xff] %v5448_v12 }
  0x6a   :  { %376 = vrot.lane.b32.xlu0 %v5429_v0, %s4829_s14  ;;  %378 = vrot.lane.b32.xlu1 %v5434_v2, %s4829_s14  ;;  %v5457_v2 = vld [vmem:[%s7917_s0 + $0x122] sm:$0xff]  ;;  %v5462_v0 = vld [vmem:[%s7917_s0 + $0x12a] sm:$0xff] }
  0x6b   :  { %7976 = vst [vmem:[#allocation28_spill] sm:$0xff] %v5457_v2  ;;  %7977 = vst [vmem:[#allocation29_spill] sm:$0xff] %v5462_v0 }
  0x6e   :  { %380 = vrot.lane.b32.xlu0 %v5443_v16, %s4829_s14  ;;  %382 = vrot.lane.b32.xlu1 %v5448_v12, %s4829_s14  ;;  %v5471_v12 = vld [vmem:[%s7917_s0 + $0x13a] sm:$0xff]  ;;  %v5476_v16 = vld [vmem:[%s7917_s0 + $0x142] sm:$0xff] }
  0x6f   :  { %7978 = vst [vmem:[#allocation30_spill] sm:$0xff] %v5471_v12  ;;  %7979 = vst [vmem:[#allocation31_spill] sm:$0xff] %v5476_v16 }
  0x72   :  { %384 = vrot.lane.b32.xlu0 %v5457_v2, %s4829_s14  ;;  %386 = vrot.lane.b32.xlu1 %v5462_v0, %s4829_s14  ;;  %v5487_v0 = vld [vmem:[%s7917_s0 + $0x152] sm:$0xff]  ;;  %v5492_v2 = vld [vmem:[%s7917_s0 + $0x15a] sm:$0xff] }
  0x73   :  { %7980 = vst [vmem:[#allocation32_spill] sm:$0xff] %v5492_v2 }
  0x74   :  { %v144_v63 = vpop.permute.xlu0 %143  ;;  %v148_v62 = vpop.permute.xlu1 %147 }
  0x75   :  { %240 = vst.msk [vmem:[#allocation2] sm:$0xff] %vm239_vm1, %v144_v63  ;;  %242 = vst.msk [vmem:[#allocation2 + $0x10] sm:$0xff] %vm239_vm1, %v148_v62  ;;  %v5503_v62 = vld [vmem:[%s7917_s0 + $0x16a] sm:$0xff] }
  0x76   :  { %388 = vrot.lane.b32.xlu0 %v5471_v12, %s4829_s14  ;;  %390 = vrot.lane.b32.xlu1 %v5476_v16, %s4829_s14  ;;  %v5508_v16 = vld [vmem:[%s7917_s0 + $0x172] sm:$0xff] }
  0x78   :  { %v146_v61 = vpop.permute.xlu0 %145  ;;  %v150_v63 = vpop.permute.xlu1 %149 }
  0x79   :  { %241 = vst.msk [vmem:[#allocation2 + $0x8] sm:$0xff] %vm239_vm1, %v146_v61  ;;  %243 = vst.msk [vmem:[#allocation2 + $0x18] sm:$0xff] %vm239_vm1, %v150_v63 }
  0x7a   :  { %392 = vrot.lane.b32.xlu0 %v5487_v0, %s4829_s14  ;;  %394 = vrot.lane.b32.xlu1 %v5492_v2, %s4829_s14 }
  0x7c   :  { %v152_v12 = vpop.permute.xlu0 %151  ;;  %v154_v61 = vpop.permute.xlu1 %153 }
  0x7d   :  { %244 = vst.msk [vmem:[#allocation2 + $0x20] sm:$0xff] %vm239_vm1, %v152_v12  ;;  %245 = vst.msk [vmem:[#allocation2 + $0x28] sm:$0xff] %vm239_vm1, %v154_v61 }
  0x7e   :  { %396 = vrot.lane.b32.xlu0 %v5503_v62, %s4829_s14  ;;  %398 = vrot.lane.b32.xlu1 %v5508_v16, %s4829_s14 }
  0x80   :  { %v156_v63 = vpop.permute.xlu0 %155  ;;  %v158_v2 = vpop.permute.xlu1 %157 }
  0x81   :  { %246 = vst.msk [vmem:[#allocation2 + $0x30] sm:$0xff] %vm239_vm1, %v156_v63  ;;  %247 = vst.msk [vmem:[#allocation2 + $0x38] sm:$0xff] %vm239_vm1, %v158_v2 }
  0x82   :  { %530 = vrot.lane.b32.xlu0 %v4940_v13, %s4830_s26  ;;  %532 = vrot.lane.b32.xlu1 %v4962_v17, %s4830_s26 }
  0x84   :  { %v160_v12 = vpop.permute.xlu0 %159  ;;  %v162_v61 = vpop.permute.xlu1 %161 }
  0x85   :  { %248 = vst.msk [vmem:[#allocation2 + $0x40] sm:$0xff] %vm239_vm1, %v160_v12  ;;  %249 = vst.msk [vmem:[#allocation2 + $0x48] sm:$0xff] %vm239_vm1, %v162_v61 }
  0x86   :  { %534 = vrot.lane.b32.xlu0 %v4974_v19, %s4830_s26  ;;  %536 = vrot.lane.b32.xlu1 %v4979_v20, %s4830_s26 }
  0x88   :  { %v164_v2 = vpop.permute.xlu0 %163  ;;  %v166_v63 = vpop.permute.xlu1 %165 }
  0x89   :  { %250 = vst.msk [vmem:[#allocation2 + $0x50] sm:$0xff] %vm239_vm1, %v164_v2  ;;  %251 = vst.msk [vmem:[#allocation2 + $0x58] sm:$0xff] %vm239_vm1, %v166_v63 }
  0x8a   :  { %538 = vrot.lane.b32.xlu0 %v4997_v22, %s4830_s26  ;;  %540 = vrot.lane.b32.xlu1 %v5004_v23, %s4830_s26 }
  0x8c   :  { %v168_v13 = vpop.permute.xlu0 %167  ;;  %v170_v17 = vpop.permute.xlu1 %169 }
  0x8d   :  { %252 = vst.msk [vmem:[#allocation2 + $0x60] sm:$0xff] %vm239_vm1, %v168_v13  ;;  %253 = vst.msk [vmem:[#allocation2 + $0x68] sm:$0xff] %vm239_vm1, %v170_v17 }
  0x8e   :  { %542 = vrot.lane.b32.xlu0 %v5009_v24, %s4830_s26  ;;  %544 = vrot.lane.b32.xlu1 %v5014_v25, %s4830_s26 }
  0x90   :  { %v172_v12 = vpop.permute.xlu0 %171  ;;  %v174_v61 = vpop.permute.xlu1 %173 }
  0x91   :  { %254 = vst.msk [vmem:[#allocation2 + $0x70] sm:$0xff] %vm239_vm1, %v172_v12  ;;  %255 = vst.msk [vmem:[#allocation2 + $0x78] sm:$0xff] %vm239_vm1, %v174_v61 }
  0x92   :  { %546 = vrot.lane.b32.xlu0 %v5025_v26, %s4830_s26  ;;  %548 = vrot.lane.b32.xlu1 %v5030_v27, %s4830_s26 }
  0x94   :  { %v176_v2 = vpop.permute.xlu0 %175  ;;  %v178_v63 = vpop.permute.xlu1 %177 }
  0x95   :  { %256 = vst.msk [vmem:[#allocation2 + $0x80] sm:$0xff] %vm239_vm1, %v176_v2  ;;  %257 = vst.msk [vmem:[#allocation2 + $0x88] sm:$0xff] %vm239_vm1, %v178_v63 }
  0x96   :  { %550 = vrot.lane.b32.xlu0 %v5035_v28, %s4830_s26  ;;  %552 = vrot.lane.b32.xlu1 %v5056_v31, %s4830_s26 }
  0x98   :  { %v180_v13 = vpop.permute.xlu0 %179  ;;  %v182_v17 = vpop.permute.xlu1 %181 }
  0x99   :  { %258 = vst.msk [vmem:[#allocation2 + $0x90] sm:$0xff] %vm239_vm1, %v180_v13  ;;  %259 = vst.msk [vmem:[#allocation2 + $0x98] sm:$0xff] %vm239_vm1, %v182_v17 }
  0x9a   :  { %554 = vrot.lane.b32.xlu0 %v5061_v32, %s4830_s26  ;;  %556 = vrot.lane.b32.xlu1 %v5066_v33, %s4830_s26 }
  0x9c   :  { %v184_v12 = vpop.permute.xlu0 %183  ;;  %v186_v61 = vpop.permute.xlu1 %185 }
  0x9d   :  { %260 = vst.msk [vmem:[#allocation2 + $0xa0] sm:$0xff] %vm239_vm1, %v184_v12  ;;  %261 = vst.msk [vmem:[#allocation2 + $0xa8] sm:$0xff] %vm239_vm1, %v186_v61 }
  0x9e   :  { %558 = vrot.lane.b32.xlu0 %v5081_v34, %s4830_s26  ;;  %560 = vrot.lane.b32.xlu1 %v5086_v35, %s4830_s26 }
  0xa0   :  { %v188_v2 = vpop.permute.xlu0 %187  ;;  %v190_v63 = vpop.permute.xlu1 %189 }
  0xa1   :  { %262 = vst.msk [vmem:[#allocation2 + $0xb0] sm:$0xff] %vm239_vm1, %v188_v2  ;;  %263 = vst.msk [vmem:[#allocation2 + $0xb8] sm:$0xff] %vm239_vm1, %v190_v63 }
  0xa2   :  { %562 = vrot.lane.b32.xlu0 %v5095_v36, %s4830_s26  ;;  %564 = vrot.lane.b32.xlu1 %v5100_v37, %s4830_s26 }
  0xa4   :  { %v192_v13 = vpop.permute.xlu0 %191  ;;  %v194_v17 = vpop.permute.xlu1 %193 }
  0xa5   :  { %264 = vst.msk [vmem:[#allocation2 + $0xc0] sm:$0xff] %vm239_vm1, %v192_v13  ;;  %265 = vst.msk [vmem:[#allocation2 + $0xc8] sm:$0xff] %vm239_vm1, %v194_v17 }
  0xa6   :  { %566 = vrot.lane.b32.xlu0 %v5105_v38, %s4830_s26  ;;  %568 = vrot.lane.b32.xlu1 %v5116_v39, %s4830_s26 }
  0xa8   :  { %v196_v12 = vpop.permute.xlu0 %195  ;;  %v198_v61 = vpop.permute.xlu1 %197 }
  0xa9   :  { %266 = vst.msk [vmem:[#allocation2 + $0xd0] sm:$0xff] %vm239_vm1, %v196_v12  ;;  %267 = vst.msk [vmem:[#allocation2 + $0xd8] sm:$0xff] %vm239_vm1, %v198_v61 }
  0xaa   :  { %570 = vrot.lane.b32.xlu0 %v5121_v40, %s4830_s26  ;;  %572 = vrot.lane.b32.xlu1 %v5126_v41, %s4830_s26 }
  0xac   :  { %v200_v2 = vpop.permute.xlu0 %199  ;;  %v202_v63 = vpop.permute.xlu1 %201 }
  0xad   :  { %268 = vst.msk [vmem:[#allocation2 + $0xe0] sm:$0xff] %vm239_vm1, %v200_v2  ;;  %269 = vst.msk [vmem:[#allocation2 + $0xe8] sm:$0xff] %vm239_vm1, %v202_v63 }
  0xae   :  { %574 = vrot.lane.b32.xlu0 %v5151_v44, %s4830_s26  ;;  %576 = vrot.lane.b32.xlu1 %v5158_v45, %s4830_s26 }
  0xb0   :  { %v204_v13 = vpop.permute.xlu0 %203  ;;  %v206_v17 = vpop.permute.xlu1 %205 }
  0xb1   :  { %270 = vst.msk [vmem:[#allocation2 + $0xf0] sm:$0xff] %vm239_vm1, %v204_v13  ;;  %271 = vst.msk [vmem:[#allocation2 + $0xf8] sm:$0xff] %vm239_vm1, %v206_v17  ;;  %v5609_v13 = vld [vmem:[%s7917_s0 + $0x180] sm:$0xff]  ;;  %v5614_v17 = vld [vmem:[%s7917_s0 + $0x188] sm:$0xff] }
  0xb2   :  { %578 = vrot.lane.b32.xlu0 %v5179_v48, %s4830_s26  ;;  %580 = vrot.lane.b32.xlu1 %v5186_v49, %s4830_s26 }
  0xb4   :  { %v337_v12 = vpop.permute.xlu0 %336  ;;  %v339_v61 = vpop.permute.xlu1 %338 }
  0xb5   :  { %433 = vst.msk [vmem:[#allocation2] sm:$0xff] %vm432_vm2, %v337_v12  ;;  %434 = vst.msk [vmem:[#allocation2 + $0x8] sm:$0xff] %vm432_vm2, %v339_v61 }
  0xb6   :  { %582 = vrot.lane.b32.xlu0 %v5207_v52, %s4830_s26  ;;  %584 = vrot.lane.b32.xlu1 %v5214_v53, %s4830_s26 }
  0xb8   :  { %v341_v2 = vpop.permute.xlu0 %340  ;;  %v343_v63 = vpop.permute.xlu1 %342 }
  0xb9   :  { %435 = vst.msk [vmem:[#allocation2 + $0x10] sm:$0xff] %vm432_vm2, %v341_v2  ;;  %436 = vst.msk [vmem:[#allocation2 + $0x18] sm:$0xff] %vm432_vm2, %v343_v63 }
  0xba   :  { %586 = vrot.lane.b32.xlu0 %v5235_v56, %s4830_s26  ;;  %588 = vrot.lane.b32.xlu1 %v5242_v57, %s4830_s26 }
  0xbc   :  { %v345_v12 = vpop.permute.xlu0 %344  ;;  %v347_v61 = vpop.permute.xlu1 %346 }
  0xbd   :  { %437 = vst.msk [vmem:[#allocation2 + $0x20] sm:$0xff] %vm432_vm2, %v345_v12  ;;  %438 = vst.msk [vmem:[#allocation2 + $0x28] sm:$0xff] %vm432_vm2, %v347_v61 }
  0xbe   :  { %590 = vrot.lane.b32.xlu0 %v5609_v13, %s4830_s26  ;;  %592 = vrot.lane.b32.xlu1 %v5614_v17, %s4830_s26 }
  0xc0   :  { %v349_v2 = vpop.permute.xlu0 %348  ;;  %v351_v63 = vpop.permute.xlu1 %350 }
  0xc1   :  { %439 = vst.msk [vmem:[#allocation2 + $0x30] sm:$0xff] %vm432_vm2, %v349_v2  ;;  %440 = vst.msk [vmem:[#allocation2 + $0x38] sm:$0xff] %vm432_vm2, %v351_v63 }
  0xc2   :  { %723 = vrot.lane.b32.xlu0 %v4862_v1, %s4831_s4  ;;  %725 = vrot.lane.b32.xlu1 %v4873_v3, %s4831_s4 }
  0xc4   :  { %v353_v12 = vpop.permute.xlu0 %352  ;;  %v355_v61 = vpop.permute.xlu1 %354 }
  0xc5   :  { %441 = vst.msk [vmem:[#allocation2 + $0x40] sm:$0xff] %vm432_vm2, %v353_v12  ;;  %442 = vst.msk [vmem:[#allocation2 + $0x48] sm:$0xff] %vm432_vm2, %v355_v61  ;;  %v5715_v61 = vld [vmem:[%s7917_s0 + $0x181] sm:$0xff] }
  0xc6   :  { %727 = vrot.lane.b32.xlu0 %v4881_v4, %s4831_s4  ;;  %729 = vrot.lane.b32.xlu1 %v4886_v5, %s4831_s4 }
  0xc8   :  { %v357_v2 = vpop.permute.xlu0 %356  ;;  %v359_v63 = vpop.permute.xlu1 %358 }
  0xc9   :  { %443 = vst.msk [vmem:[#allocation2 + $0x50] sm:$0xff] %vm432_vm2, %v357_v2  ;;  %444 = vst.msk [vmem:[#allocation2 + $0x58] sm:$0xff] %vm432_vm2, %v359_v63 }
  0xca   :  { %731 = vrot.lane.b32.xlu0 %v4895_v6, %s4831_s4  ;;  %733 = vrot.lane.b32.xlu1 %v4900_v7, %s4831_s4 }
  0xcc   :  { %v361_v1 = vpop.permute.xlu0 %360  ;;  %v363_v3 = vpop.permute.xlu1 %362 }
  0xcd   :  { %445 = vst.msk [vmem:[#allocation2 + $0x60] sm:$0xff] %vm432_vm2, %v361_v1  ;;  %446 = vst.msk [vmem:[#allocation2 + $0x68] sm:$0xff] %vm432_vm2, %v363_v3 }
  0xce   :  { %735 = vrot.lane.b32.xlu0 %v4909_v8, %s4831_s4  ;;  %737 = vrot.lane.b32.xlu1 %v4914_v9, %s4831_s4 }
  0xd0   :  { %v365_v4 = vpop.permute.xlu0 %364  ;;  %v367_v5 = vpop.permute.xlu1 %366 }
  0xd1   :  { %447 = vst.msk [vmem:[#allocation2 + $0x70] sm:$0xff] %vm432_vm2, %v365_v4  ;;  %448 = vst.msk [vmem:[#allocation2 + $0x78] sm:$0xff] %vm432_vm2, %v367_v5  ;;  %v7984_v4 = vld [vmem:[#allocation6_spill] sm:$0xff]  ;;  %v7985_v5 = vld [vmem:[#allocation7_spill] sm:$0xff] }
  0xd2   :  { %739 = vrot.lane.b32.xlu0 %v4923_v10, %s4831_s4  ;;  %741 = vrot.lane.b32.xlu1 %v4928_v11, %s4831_s4 }
  0xd4   :  { %v369_v6 = vpop.permute.xlu0 %368  ;;  %v371_v7 = vpop.permute.xlu1 %370 }
  0xd5   :  { %449 = vst.msk [vmem:[#allocation2 + $0x80] sm:$0xff] %vm432_vm2, %v369_v6  ;;  %450 = vst.msk [vmem:[#allocation2 + $0x88] sm:$0xff] %vm432_vm2, %v371_v7 }
  0xd6   :  { %743 = vrot.lane.b32.xlu0 %v4945_v14, %s4831_s4  ;;  %745 = vrot.lane.b32.xlu1 %v4950_v15, %s4831_s4 }
  0xd8   :  { %v373_v8 = vpop.permute.xlu0 %372  ;;  %v375_v9 = vpop.permute.xlu1 %374 }
  0xd9   :  { %451 = vst.msk [vmem:[#allocation2 + $0x90] sm:$0xff] %vm432_vm2, %v373_v8  ;;  %452 = vst.msk [vmem:[#allocation2 + $0x98] sm:$0xff] %vm432_vm2, %v375_v9  ;;  %v7986_v8 = vld [vmem:[#allocation8_spill] sm:$0xff]  ;;  %v7987_v9 = vld [vmem:[#allocation9_spill] sm:$0xff] }
  0xda   :  { %747 = vrot.lane.b32.xlu0 %v4967_v18, %s4831_s4  ;;  %749 = vrot.lane.b32.xlu1 %v4988_v21, %s4831_s4 }
  0xdc   :  { %v377_v10 = vpop.permute.xlu0 %376  ;;  %v379_v11 = vpop.permute.xlu1 %378 }
  0xdd   :  { %453 = vst.msk [vmem:[#allocation2 + $0xa0] sm:$0xff] %vm432_vm2, %v377_v10  ;;  %454 = vst.msk [vmem:[#allocation2 + $0xa8] sm:$0xff] %vm432_vm2, %v379_v11 }
  0xde   :  { %751 = vrot.lane.b32.xlu0 %v5040_v29, %s4831_s4  ;;  %753 = vrot.lane.b32.xlu1 %v5045_v30, %s4831_s4 }
  0xe0   :  { %v381_v14 = vpop.permute.xlu0 %380  ;;  %v383_v15 = vpop.permute.xlu1 %382 }
  0xe1   :  { %455 = vst.msk [vmem:[#allocation2 + $0xb0] sm:$0xff] %vm432_vm2, %v381_v14  ;;  %456 = vst.msk [vmem:[#allocation2 + $0xb8] sm:$0xff] %vm432_vm2, %v383_v15  ;;  %v7988_v14 = vld [vmem:[#allocation10_spill] sm:$0xff]  ;;  %v7989_v15 = vld [vmem:[#allocation11_spill] sm:$0xff] }
  0xe2   :  { %755 = vrot.lane.b32.xlu0 %v5141_v42, %s4831_s4  ;;  %757 = vrot.lane.b32.xlu1 %v5146_v43, %s4831_s4 }
  0xe4   :  { %v385_v18 = vpop.permute.xlu0 %384  ;;  %v387_v21 = vpop.permute.xlu1 %386 }
  0xe5   :  { %457 = vst.msk [vmem:[#allocation2 + $0xc0] sm:$0xff] %vm432_vm2, %v385_v18  ;;  %458 = vst.msk [vmem:[#allocation2 + $0xc8] sm:$0xff] %vm432_vm2, %v387_v21 }
  0xe6   :  { %759 = vrot.lane.b32.xlu0 %v5169_v46, %s4831_s4  ;;  %761 = vrot.lane.b32.xlu1 %v5174_v47, %s4831_s4 }
  0xe8   :  { %v389_v29 = vpop.permute.xlu0 %388  ;;  %v391_v30 = vpop.permute.xlu1 %390 }
  0xe9   :  { %459 = vst.msk [vmem:[#allocation2 + $0xd0] sm:$0xff] %vm432_vm2, %v389_v29  ;;  %460 = vst.msk [vmem:[#allocation2 + $0xd8] sm:$0xff] %vm432_vm2, %v391_v30  ;;  %v7990_v29 = vld [vmem:[#allocation12_spill] sm:$0xff]  ;;  %v7991_v30 = vld [vmem:[#allocation13_spill] sm:$0xff] }
  0xea   :  { %763 = vrot.lane.b32.xlu0 %v5197_v50, %s4831_s4  ;;  %765 = vrot.lane.b32.xlu1 %v5202_v51, %s4831_s4 }
  0xec   :  { %v393_v42 = vpop.permute.xlu0 %392  ;;  %v395_v43 = vpop.permute.xlu1 %394 }
  0xed   :  { %461 = vst.msk [vmem:[#allocation2 + $0xe0] sm:$0xff] %vm432_vm2, %v393_v42  ;;  %462 = vst.msk [vmem:[#allocation2 + $0xe8] sm:$0xff] %vm432_vm2, %v395_v43 }
  0xee   :  { %767 = vrot.lane.b32.xlu0 %v5225_v54, %s4831_s4  ;;  %769 = vrot.lane.b32.xlu1 %v5230_v55, %s4831_s4  ;;  %v7981_v54 = vld [vmem:[#allocation3_spill] sm:$0xff] }
  0xf0   :  { %v397_v46 = vpop.permute.xlu0 %396  ;;  %v399_v47 = vpop.permute.xlu1 %398 }
  0xf1   :  { %463 = vst.msk [vmem:[#allocation2 + $0xf0] sm:$0xff] %vm432_vm2, %v397_v46  ;;  %464 = vst.msk [vmem:[#allocation2 + $0xf8] sm:$0xff] %vm432_vm2, %v399_v47  ;;  %v7992_v46 = vld [vmem:[#allocation14_spill] sm:$0xff]  ;;  %v7993_v47 = vld [vmem:[#allocation15_spill] sm:$0xff] }
  0xf2   :  { %771 = vrot.lane.b32.xlu0 %v5253_v58, %s4831_s4  ;;  %773 = vrot.lane.b32.xlu1 %v5258_v59, %s4831_s4  ;;  %v7982_v58 = vld [vmem:[#allocation4_spill] sm:$0xff]  ;;  %v7983_v59 = vld [vmem:[#allocation5_spill] sm:$0xff] }
  0xf4   :  { %v531_v50 = vpop.permute.xlu0 %530  ;;  %v533_v51 = vpop.permute.xlu1 %532 }
  0xf5   :  { %627 = vst.msk [vmem:[#allocation2] sm:$0xff] %vm626_vm3, %v531_v50  ;;  %628 = vst.msk [vmem:[#allocation2 + $0x8] sm:$0xff] %vm626_vm3, %v533_v51 }
  0xf6   :  { %775 = vrot.lane.b32.xlu0 %v5267_v60, %s4831_s4  ;;  %777 = vrot.lane.b32.xlu1 %v7981_v54, %s4831_s4  ;;  %v5720_v60 = vld [vmem:[%s7917_s0 + $0x189] sm:$0xff] }
  0xf7   :  { %v7994_v54 = vld [vmem:[#allocation16_spill] sm:$0xff] }
  0xf8   :  { %v535_v55 = vpop.permute.xlu0 %534  ;;  %v537_v12 = vpop.permute.xlu1 %536 }
  0xf9   :  { %629 = vst.msk [vmem:[#allocation2 + $0x10] sm:$0xff] %vm626_vm3, %v535_v55  ;;  %630 = vst.msk [vmem:[#allocation2 + $0x18] sm:$0xff] %vm626_vm3, %v537_v12  ;;  %v7995_v55 = vld [vmem:[#allocation17_spill] sm:$0xff] }
  0xfa   :  { %779 = vrot.lane.b32.xlu0 %v7982_v58, %s4831_s4  ;;  %781 = vrot.lane.b32.xlu1 %v7983_v59, %s4831_s4  ;;  %v7996_v59 = vld [vmem:[#allocation18_spill] sm:$0xff] }
  0xfc   :  { %v539_v2 = vpop.permute.xlu0 %538  ;;  %v541_v63 = vpop.permute.xlu1 %540 }
  0xfd   :  { %631 = vst.msk [vmem:[#allocation2 + $0x20] sm:$0xff] %vm626_vm3, %v539_v2  ;;  %632 = vst.msk [vmem:[#allocation2 + $0x28] sm:$0xff] %vm626_vm3, %v541_v63  ;;  %v7997_v2 = vld [vmem:[#allocation19_spill] sm:$0xff] }
  0xfe   :  { %783 = vrot.lane.b32.xlu0 %v5715_v61, %s4831_s4  ;;  %785 = vrot.lane.b32.xlu1 %v5720_v60, %s4831_s4 }
 0x100   :  { %v543_v1 = vpop.permute.xlu0 %542  ;;  %v545_v3 = vpop.permute.xlu1 %544 }
 0x101   :  { %633 = vst.msk [vmem:[#allocation2 + $0x30] sm:$0xff] %vm626_vm3, %v543_v1  ;;  %634 = vst.msk [vmem:[#allocation2 + $0x38] sm:$0xff] %vm626_vm3, %v545_v3  ;;  %v7998_v3 = vld [vmem:[#allocation20_spill] sm:$0xff] }
 0x102   :  { %916 = vrot.lane.b32.xlu0 %v7984_v4, %s4832_s9  ;;  %918 = vrot.lane.b32.xlu1 %v7985_v5, %s4832_s9  ;;  %v7999_v4 = vld [vmem:[#allocation21_spill] sm:$0xff] }
 0x104   :  { %v547_v6 = vpop.permute.xlu0 %546  ;;  %v549_v7 = vpop.permute.xlu1 %548 }
 0x105   :  { %635 = vst.msk [vmem:[#allocation2 + $0x40] sm:$0xff] %vm626_vm3, %v547_v6  ;;  %636 = vst.msk [vmem:[#allocation2 + $0x48] sm:$0xff] %vm626_vm3, %v549_v7  ;;  %v8000_v7 = vld [vmem:[#allocation22_spill] sm:$0xff] }
 0x106   :  { %920 = vrot.lane.b32.xlu0 %v7986_v8, %s4832_s9  ;;  %922 = vrot.lane.b32.xlu1 %v7987_v9, %s4832_s9  ;;  %v8001_v8 = vld [vmem:[#allocation23_spill] sm:$0xff] }
 0x108   :  { %v551_v10 = vpop.permute.xlu0 %550  ;;  %v553_v11 = vpop.permute.xlu1 %552 }
 0x109   :  { %637 = vst.msk [vmem:[#allocation2 + $0x50] sm:$0xff] %vm626_vm3, %v551_v10  ;;  %638 = vst.msk [vmem:[#allocation2 + $0x58] sm:$0xff] %vm626_vm3, %v553_v11  ;;  %v8002_v11 = vld [vmem:[#allocation24_spill] sm:$0xff] }
 0x10a   :  { %924 = vrot.lane.b32.xlu0 %v7988_v14, %s4832_s9  ;;  %926 = vrot.lane.b32.xlu1 %v7989_v15, %s4832_s9  ;;  %v8003_v14 = vld [vmem:[#allocation25_spill] sm:$0xff] }
 0x10c   :  { %v555_v18 = vpop.permute.xlu0 %554  ;;  %v557_v21 = vpop.permute.xlu1 %556 }
 0x10d   :  { %639 = vst.msk [vmem:[#allocation2 + $0x60] sm:$0xff] %vm626_vm3, %v555_v18  ;;  %640 = vst.msk [vmem:[#allocation2 + $0x68] sm:$0xff] %vm626_vm3, %v557_v21  ;;  %v8004_v21 = vld [vmem:[#allocation26_spill] sm:$0xff] }
 0x10e   :  { %928 = vrot.lane.b32.xlu0 %v7990_v29, %s4832_s9  ;;  %930 = vrot.lane.b32.xlu1 %v7991_v30, %s4832_s9  ;;  %v8005_v29 = vld [vmem:[#allocation27_spill] sm:$0xff] }
 0x110   :  { %v559_v42 = vpop.permute.xlu0 %558  ;;  %v561_v43 = vpop.permute.xlu1 %560 }
 0x111   :  { %641 = vst.msk [vmem:[#allocation2 + $0x70] sm:$0xff] %vm626_vm3, %v559_v42  ;;  %642 = vst.msk [vmem:[#allocation2 + $0x78] sm:$0xff] %vm626_vm3, %v561_v43  ;;  %v8006_v43 = vld [vmem:[#allocation28_spill] sm:$0xff] }
 0x112   :  { %932 = vrot.lane.b32.xlu0 %v7992_v46, %s4832_s9  ;;  %934 = vrot.lane.b32.xlu1 %v7993_v47, %s4832_s9  ;;  %v8007_v46 = vld [vmem:[#allocation29_spill] sm:$0xff] }
 0x114   :  { %v563_v50 = vpop.permute.xlu0 %562  ;;  %v565_v51 = vpop.permute.xlu1 %564 }
 0x115   :  { %643 = vst.msk [vmem:[#allocation2 + $0x80] sm:$0xff] %vm626_vm3, %v563_v50  ;;  %644 = vst.msk [vmem:[#allocation2 + $0x88] sm:$0xff] %vm626_vm3, %v565_v51  ;;  %v8008_v51 = vld [vmem:[#allocation30_spill] sm:$0xff] }
 0x116   :  { %936 = vrot.lane.b32.xlu0 %v7994_v54, %s4832_s9  ;;  %938 = vrot.lane.b32.xlu1 %v7995_v55, %s4832_s9  ;;  %v8009_v54 = vld [vmem:[#allocation31_spill] sm:$0xff] }
 0x118   :  { %v567_v12 = vpop.permute.xlu0 %566  ;;  %v569_v58 = vpop.permute.xlu1 %568 }
 0x119   :  { %645 = vst.msk [vmem:[#allocation2 + $0x90] sm:$0xff] %vm626_vm3, %v567_v12  ;;  %646 = vst.msk [vmem:[#allocation2 + $0x98] sm:$0xff] %vm626_vm3, %v569_v58  ;;  %v8010_v58 = vld [vmem:[#allocation32_spill] sm:$0xff] }
 0x11a   :  { %940 = vrot.lane.b32.xlu0 %v7996_v59, %s4832_s9  ;;  %942 = vrot.lane.b32.xlu1 %v7997_v2, %s4832_s9 }
 0x11c   :  { %v571_v63 = vpop.permute.xlu0 %570  ;;  %v573_v1 = vpop.permute.xlu1 %572 }
 0x11d   :  { %647 = vst.msk [vmem:[#allocation2 + $0xa0] sm:$0xff] %vm626_vm3, %v571_v63  ;;  %648 = vst.msk [vmem:[#allocation2 + $0xa8] sm:$0xff] %vm626_vm3, %v573_v1  ;;  %v5821_v63 = vld [vmem:[%s7917_s0 + $0x182] sm:$0xff] }
 0x11e   :  { %944 = vrot.lane.b32.xlu0 %v7998_v3, %s4832_s9  ;;  %946 = vrot.lane.b32.xlu1 %v7999_v4, %s4832_s9 }
 0x120   :  { %v575_v5 = vpop.permute.xlu0 %574  ;;  %v577_v6 = vpop.permute.xlu1 %576 }
 0x121   :  { %649 = vst.msk [vmem:[#allocation2 + $0xb0] sm:$0xff] %vm626_vm3, %v575_v5  ;;  %650 = vst.msk [vmem:[#allocation2 + $0xb8] sm:$0xff] %vm626_vm3, %v577_v6 }
 0x122   :  { %948 = vrot.lane.b32.xlu0 %v8000_v7, %s4832_s9  ;;  %950 = vrot.lane.b32.xlu1 %v8001_v8, %s4832_s9 }
 0x124   :  { %v579_v9 = vpop.permute.xlu0 %578  ;;  %v581_v10 = vpop.permute.xlu1 %580 }
 0x125   :  { %651 = vst.msk [vmem:[#allocation2 + $0xc0] sm:$0xff] %vm626_vm3, %v579_v9  ;;  %652 = vst.msk [vmem:[#allocation2 + $0xc8] sm:$0xff] %vm626_vm3, %v581_v10  ;;  %v4214_v10 = vld [vmem:[%s7917_s0 + $0x49] sm:$0xff] }
 0x126   :  { %952 = vrot.lane.b32.xlu0 %v8002_v11, %s4832_s9  ;;  %954 = vrot.lane.b32.xlu1 %v8003_v14, %s4832_s9  ;;  %v4215_v11 = vld [vmem:[%s7917_s0 + $0x51] sm:$0xff] }
 0x128   :  { %v583_v15 = vpop.permute.xlu0 %582  ;;  %v585_v18 = vpop.permute.xlu1 %584 }
 0x129   :  { %653 = vst.msk [vmem:[#allocation2 + $0xd0] sm:$0xff] %vm626_vm3, %v583_v15  ;;  %654 = vst.msk [vmem:[#allocation2 + $0xd8] sm:$0xff] %vm626_vm3, %v585_v18  ;;  %v4216_v18 = vld [vmem:[%s7917_s0 + $0x61] sm:$0xff] }
 0x12a   :  { %956 = vrot.lane.b32.xlu0 %v8004_v21, %s4832_s9  ;;  %958 = vrot.lane.b32.xlu1 %v8005_v29, %s4832_s9  ;;  %v4217_v21 = vld [vmem:[%s7917_s0 + $0x69] sm:$0xff] }
 0x12c   :  { %v587_v30 = vpop.permute.xlu0 %586  ;;  %v589_v42 = vpop.permute.xlu1 %588 }
 0x12d   :  { %655 = vst.msk [vmem:[#allocation2 + $0xe0] sm:$0xff] %vm626_vm3, %v587_v30  ;;  %656 = vst.msk [vmem:[#allocation2 + $0xe8] sm:$0xff] %vm626_vm3, %v589_v42  ;;  %v4218_v42 = vld [vmem:[%s7917_s0 + $0x79] sm:$0xff] }
 0x12e   :  { %960 = vrot.lane.b32.xlu0 %v8006_v43, %s4832_s9  ;;  %962 = vrot.lane.b32.xlu1 %v8007_v46, %s4832_s9  ;;  %v4219_v43 = vld [vmem:[%s7917_s0 + $0x81] sm:$0xff] }
 0x130   :  { %v591_v47 = vpop.permute.xlu0 %590  ;;  %v593_v50 = vpop.permute.xlu1 %592 }
 0x131   :  { %657 = vst.msk [vmem:[#allocation2 + $0xf0] sm:$0xff] %vm626_vm3, %v591_v47  ;;  %658 = vst.msk [vmem:[#allocation2 + $0xf8] sm:$0xff] %vm626_vm3, %v593_v50  ;;  %v4220_v50 = vld [vmem:[%s7917_s0 + $0x91] sm:$0xff] }
 0x132   :  { %964 = vrot.lane.b32.xlu0 %v8008_v51, %s4832_s9  ;;  %966 = vrot.lane.b32.xlu1 %v8009_v54, %s4832_s9  ;;  %v4221_v51 = vld [vmem:[%s7917_s0 + $0x99] sm:$0xff] }
 0x134   :  { %v724_v55 = vpop.permute.xlu0 %723  ;;  %v726_v12 = vpop.permute.xlu1 %725 }
 0x135   :  { %820 = vst.msk [vmem:[#allocation2] sm:$0xff] %vm819_vm4, %v724_v55  ;;  %821 = vst.msk [vmem:[#allocation2 + $0x8] sm:$0xff] %vm819_vm4, %v726_v12  ;;  %v4222_v12 = vld [vmem:[%s7917_s0 + $0xa9] sm:$0xff] }
 0x136   :  { %968 = vrot.lane.b32.xlu0 %v5487_v0, %s4832_s9  ;;  %970 = vrot.lane.b32.xlu1 %v8010_v58, %s4832_s9  ;;  %v5826_v0 = vld [vmem:[%s7917_s0 + $0x18a] sm:$0xff] }
 0x137   :  { %v4223_v58 = vld [vmem:[%s7917_s0 + $0xb1] sm:$0xff] }
 0x138   :  { %v728_v59 = vpop.permute.xlu0 %727  ;;  %v730_v2 = vpop.permute.xlu1 %729 }
 0x139   :  { %822 = vst.msk [vmem:[#allocation2 + $0x10] sm:$0xff] %vm819_vm4, %v728_v59  ;;  %823 = vst.msk [vmem:[#allocation2 + $0x18] sm:$0xff] %vm819_vm4, %v730_v2 }
 0x13a   :  { %972 = vrot.lane.b32.xlu0 %v5503_v62, %s4832_s9  ;;  %974 = vrot.lane.b32.xlu1 %v5508_v16, %s4832_s9 }
 0x13c   :  { %v732_v1 = vpop.permute.xlu0 %731  ;;  %v734_v3 = vpop.permute.xlu1 %733 }
 0x13d   :  { %824 = vst.msk [vmem:[#allocation2 + $0x20] sm:$0xff] %vm819_vm4, %v732_v1  ;;  %825 = vst.msk [vmem:[#allocation2 + $0x28] sm:$0xff] %vm819_vm4, %v734_v3  ;;  %v4224_v1 = vld [vmem:[%s7917_s0 + $0xc1] sm:$0xff]  ;;  %v4225_v3 = vld [vmem:[%s7917_s0 + $0xc9] sm:$0xff] }
 0x13e   :  { %976 = vrot.lane.b32.xlu0 %v5821_v63, %s4832_s9  ;;  %978 = vrot.lane.b32.xlu1 %v5826_v0, %s4832_s9 }
 0x140   :  { %v736_v16 = vpop.permute.xlu0 %735  ;;  %v738_v62 = vpop.permute.xlu1 %737 }
 0x141   :  { %826 = vst.msk [vmem:[#allocation2 + $0x30] sm:$0xff] %vm819_vm4, %v736_v16  ;;  %827 = vst.msk [vmem:[#allocation2 + $0x38] sm:$0xff] %vm819_vm4, %v738_v62 }
 0x142   :  { %1110 = vrot.lane.b32.xlu0 %v4974_v19, %s4833_s15  ;;  %1112 = vrot.lane.b32.xlu1 %v4979_v20, %s4833_s15 }
 0x144   :  { %v740_v4 = vpop.permute.xlu0 %739  ;;  %v742_v5 = vpop.permute.xlu1 %741 }
 0x145   :  { %828 = vst.msk [vmem:[#allocation2 + $0x40] sm:$0xff] %vm819_vm4, %v740_v4  ;;  %829 = vst.msk [vmem:[#allocation2 + $0x48] sm:$0xff] %vm819_vm4, %v742_v5  ;;  %v4226_v4 = vld [vmem:[%s7917_s0 + $0xd9] sm:$0xff]  ;;  %v4227_v5 = vld [vmem:[%s7917_s0 + $0xe1] sm:$0xff] }
 0x146   :  { %1114 = vrot.lane.b32.xlu0 %v4997_v22, %s4833_s15  ;;  %1116 = vrot.lane.b32.xlu1 %v5004_v23, %s4833_s15 }
 0x148   :  { %v744_v6 = vpop.permute.xlu0 %743  ;;  %v746_v7 = vpop.permute.xlu1 %745 }
 0x149   :  { %830 = vst.msk [vmem:[#allocation2 + $0x50] sm:$0xff] %vm819_vm4, %v744_v6  ;;  %831 = vst.msk [vmem:[#allocation2 + $0x58] sm:$0xff] %vm819_vm4, %v746_v7 }
 0x14a   :  { %1118 = vrot.lane.b32.xlu0 %v5009_v24, %s4833_s15  ;;  %1120 = vrot.lane.b32.xlu1 %v5014_v25, %s4833_s15 }
 0x14c   :  { %v748_v19 = vpop.permute.xlu0 %747  ;;  %v750_v20 = vpop.permute.xlu1 %749 }
 0x14d   :  { %832 = vst.msk [vmem:[#allocation2 + $0x60] sm:$0xff] %vm819_vm4, %v748_v19  ;;  %833 = vst.msk [vmem:[#allocation2 + $0x68] sm:$0xff] %vm819_vm4, %v750_v20  ;;  %v4228_v19 = vld [vmem:[%s7917_s0 + $0xf1] sm:$0xff]  ;;  %v4229_v20 = vld [vmem:[%s7917_s0 + $0xf9] sm:$0xff] }
 0x14e   :  { %1122 = vrot.lane.b32.xlu0 %v5025_v26, %s4833_s15  ;;  %1124 = vrot.lane.b32.xlu1 %v5030_v27, %s4833_s15 }
 0x150   :  { %v752_v22 = vpop.permute.xlu0 %751  ;;  %v754_v23 = vpop.permute.xlu1 %753 }
 0x151   :  { %834 = vst.msk [vmem:[#allocation2 + $0x70] sm:$0xff] %vm819_vm4, %v752_v22  ;;  %835 = vst.msk [vmem:[#allocation2 + $0x78] sm:$0xff] %vm819_vm4, %v754_v23 }
 0x152   :  { %1126 = vrot.lane.b32.xlu0 %v5035_v28, %s4833_s15  ;;  %1128 = vrot.lane.b32.xlu1 %v5056_v31, %s4833_s15 }
 0x154   :  { %v756_v24 = vpop.permute.xlu0 %755  ;;  %v758_v25 = vpop.permute.xlu1 %757 }
 0x155   :  { %836 = vst.msk [vmem:[#allocation2 + $0x80] sm:$0xff] %vm819_vm4, %v756_v24  ;;  %837 = vst.msk [vmem:[#allocation2 + $0x88] sm:$0xff] %vm819_vm4, %v758_v25  ;;  %v4230_v24 = vld [vmem:[%s7917_s0 + $0x109] sm:$0xff]  ;;  %v4231_v25 = vld [vmem:[%s7917_s0 + $0x111] sm:$0xff] }
 0x156   :  { %1130 = vrot.lane.b32.xlu0 %v5061_v32, %s4833_s15  ;;  %1132 = vrot.lane.b32.xlu1 %v5066_v33, %s4833_s15 }
 0x158   :  { %v760_v26 = vpop.permute.xlu0 %759  ;;  %v762_v27 = vpop.permute.xlu1 %761 }
 0x159   :  { %838 = vst.msk [vmem:[#allocation2 + $0x90] sm:$0xff] %vm819_vm4, %v760_v26  ;;  %839 = vst.msk [vmem:[#allocation2 + $0x98] sm:$0xff] %vm819_vm4, %v762_v27 }
 0x15a   :  { %1134 = vrot.lane.b32.xlu0 %v5081_v34, %s4833_s15  ;;  %1136 = vrot.lane.b32.xlu1 %v5086_v35, %s4833_s15 }
 0x15c   :  { %v764_v28 = vpop.permute.xlu0 %763  ;;  %v766_v31 = vpop.permute.xlu1 %765 }
 0x15d   :  { %840 = vst.msk [vmem:[#allocation2 + $0xa0] sm:$0xff] %vm819_vm4, %v764_v28  ;;  %841 = vst.msk [vmem:[#allocation2 + $0xa8] sm:$0xff] %vm819_vm4, %v766_v31  ;;  %v4232_v28 = vld [vmem:[%s7917_s0 + $0x121] sm:$0xff]  ;;  %v4233_v31 = vld [vmem:[%s7917_s0 + $0x129] sm:$0xff] }
 0x15e   :  { %1138 = vrot.lane.b32.xlu0 %v5095_v36, %s4833_s15  ;;  %1140 = vrot.lane.b32.xlu1 %v5100_v37, %s4833_s15 }
 0x160   :  { %v768_v32 = vpop.permute.xlu0 %767  ;;  %v770_v33 = vpop.permute.xlu1 %769 }
 0x161   :  { %842 = vst.msk [vmem:[#allocation2 + $0xb0] sm:$0xff] %vm819_vm4, %v768_v32  ;;  %843 = vst.msk [vmem:[#allocation2 + $0xb8] sm:$0xff] %vm819_vm4, %v770_v33 }
 0x162   :  { %1142 = vrot.lane.b32.xlu0 %v5105_v38, %s4833_s15  ;;  %1144 = vrot.lane.b32.xlu1 %v5116_v39, %s4833_s15 }
 0x164   :  { %v772_v34 = vpop.permute.xlu0 %771  ;;  %v774_v35 = vpop.permute.xlu1 %773 }
 0x165   :  { %844 = vst.msk [vmem:[#allocation2 + $0xc0] sm:$0xff] %vm819_vm4, %v772_v34  ;;  %845 = vst.msk [vmem:[#allocation2 + $0xc8] sm:$0xff] %vm819_vm4, %v774_v35  ;;  %v4234_v34 = vld [vmem:[%s7917_s0 + $0x139] sm:$0xff]  ;;  %v4235_v35 = vld [vmem:[%s7917_s0 + $0x141] sm:$0xff] }
 0x166   :  { %1146 = vrot.lane.b32.xlu0 %v5121_v40, %s4833_s15  ;;  %1148 = vrot.lane.b32.xlu1 %v5126_v41, %s4833_s15 }
 0x168   :  { %v776_v36 = vpop.permute.xlu0 %775  ;;  %v778_v37 = vpop.permute.xlu1 %777 }
 0x169   :  { %846 = vst.msk [vmem:[#allocation2 + $0xd0] sm:$0xff] %vm819_vm4, %v776_v36  ;;  %847 = vst.msk [vmem:[#allocation2 + $0xd8] sm:$0xff] %vm819_vm4, %v778_v37 }
 0x16a   :  { %1150 = vrot.lane.b32.xlu0 %v5151_v44, %s4833_s15  ;;  %1152 = vrot.lane.b32.xlu1 %v5158_v45, %s4833_s15 }
 0x16c   :  { %v780_v38 = vpop.permute.xlu0 %779  ;;  %v782_v39 = vpop.permute.xlu1 %781 }
 0x16d   :  { %848 = vst.msk [vmem:[#allocation2 + $0xe0] sm:$0xff] %vm819_vm4, %v780_v38  ;;  %849 = vst.msk [vmem:[#allocation2 + $0xe8] sm:$0xff] %vm819_vm4, %v782_v39  ;;  %v4236_v38 = vld [vmem:[%s7917_s0 + $0x151] sm:$0xff]  ;;  %v4237_v39 = vld [vmem:[%s7917_s0 + $0x159] sm:$0xff] }
 0x16e   :  { %1154 = vrot.lane.b32.xlu0 %v5179_v48, %s4833_s15  ;;  %1156 = vrot.lane.b32.xlu1 %v5186_v49, %s4833_s15 }
 0x170   :  { %v784_v40 = vpop.permute.xlu0 %783  ;;  %v786_v41 = vpop.permute.xlu1 %785 }
 0x171   :  { %850 = vst.msk [vmem:[#allocation2 + $0xf0] sm:$0xff] %vm819_vm4, %v784_v40  ;;  %851 = vst.msk [vmem:[#allocation2 + $0xf8] sm:$0xff] %vm819_vm4, %v786_v41 }
 0x172   :  { %1158 = vrot.lane.b32.xlu0 %v5207_v52, %s4833_s15  ;;  %1160 = vrot.lane.b32.xlu1 %v5214_v53, %s4833_s15  ;;  %v4210_v52 = vld [vmem:[%s7917_s0 + $0x198] sm:$0xff]  ;;  %v4211_v53 = vld [vmem:[%s7917_s0 + $0x1a0] sm:$0xff] }
 0x174   :  { %v917_v44 = vpop.permute.xlu0 %916  ;;  %v919_v45 = vpop.permute.xlu1 %918 }
 0x175   :  { %1013 = vst.msk [vmem:[#allocation2] sm:$0xff] %vm1012_vm5, %v917_v44  ;;  %1014 = vst.msk [vmem:[#allocation2 + $0x8] sm:$0xff] %vm1012_vm5, %v919_v45  ;;  %v3293_v44 = vld [vmem:[%s7918_s1] sm:$0xff]  ;;  %v3294_v45 = vld [vmem:[%s7918_s1 + $0x8] sm:$0xff] }
 0x176   :  { %1162 = vrot.lane.b32.xlu0 %v5235_v56, %s4833_s15  ;;  %1164 = vrot.lane.b32.xlu1 %v5242_v57, %s4833_s15 }
 0x178   :  { %v921_v48 = vpop.permute.xlu0 %920  ;;  %v923_v49 = vpop.permute.xlu1 %922 }
 0x179   :  { %1015 = vst.msk [vmem:[#allocation2 + $0x10] sm:$0xff] %vm1012_vm5, %v921_v48  ;;  %1016 = vst.msk [vmem:[#allocation2 + $0x18] sm:$0xff] %vm1012_vm5, %v923_v49  ;;  %v4805_v48 = vpack.c.bf16 %v3294_v45, %v3293_v44  ;;  %v4238_v49 = vld [vmem:[%s7917_s0 + $0x169] sm:$0xff] }
 0x17a   :  { %1166 = vrot.lane.b32.xlu0 %v5609_v13, %s4833_s15  ;;  %1168 = vrot.lane.b32.xlu1 %v5614_v17, %s4833_s15  ;;  %v4212_v13 = vld [vmem:[%s7917_s0 + $0x31] sm:$0xff]  ;;  %v4213_v17 = vld [vmem:[%s7917_s0 + $0x39] sm:$0xff] }
 0x17b   :  { %4806 = vmatprep.subr.bf16.mxu0 %v4805_v48  ;;  %4813 = vmatprep.subr.bf16.mxu1 %v4805_v48  ;;  %v4267_v44 = vld [vmem:[%s7917_s0 + $0x142] sm:$0xff] }
 0x17c   :  { %v925_v56 = vpop.permute.xlu0 %924  ;;  %v927_v57 = vpop.permute.xlu1 %926  ;;  %4808 = vmatpush3.bf16.msra.mxu0 %v4805_v48  ;;  %4816 = vmatpush3.bf16.msra.mxu1 %v4805_v48 }
 0x17d   :  { %1017 = vst.msk [vmem:[#allocation2 + $0x20] sm:$0xff] %vm1012_vm5, %v925_v56  ;;  %1018 = vst.msk [vmem:[#allocation2 + $0x28] sm:$0xff] %vm1012_vm5, %v927_v57  ;;  %v3295_v57 = vld [vmem:[%s7918_s1 + $0x10] sm:$0xff] }
 0x17e   :  { %1170 = vrot.lane.b32.xlu0 %v4210_v52, %s4833_s15  ;;  %1172 = vrot.lane.b32.xlu1 %v4211_v53, %s4833_s15  ;;  %v4239_v52 = vld [vmem:[%s7917_s0 + $0x171] sm:$0xff] }
 0x180   :  { %v929_v8 = vpop.permute.xlu0 %928  ;;  %v931_v9 = vpop.permute.xlu1 %930 }
 0x181   :  { %1019 = vst.msk [vmem:[#allocation2 + $0x30] sm:$0xff] %vm1012_vm5, %v929_v8  ;;  %1020 = vst.msk [vmem:[#allocation2 + $0x38] sm:$0xff] %vm1012_vm5, %v931_v9 }
 0x182   :  { %1303 = vrot.lane.b32.xlu0 %v4212_v13, %s4834_s25  ;;  %1305 = vrot.lane.b32.xlu1 %v4213_v17, %s4834_s25  ;;  %v3296_v13 = vld [vmem:[%s7918_s1 + $0x18] sm:$0xff] }
 0x183   :  { %v4809_v17 = vpack.c.bf16 %v3296_v13, %v3295_v57  ;;  %v4270_v57 = vld [vmem:[%s7917_s0 + $0x16a] sm:$0xff]  ;;  %v4271_v13 = vld [vmem:[%s7917_s0 + $0x172] sm:$0xff] }
 0x184   :  { %v933_v14 = vpop.permute.xlu0 %932  ;;  %v935_v15 = vpop.permute.xlu1 %934 }
 0x185   :  { %1021 = vst.msk [vmem:[#allocation2 + $0x40] sm:$0xff] %vm1012_vm5, %v933_v14  ;;  %1022 = vst.msk [vmem:[#allocation2 + $0x48] sm:$0xff] %vm1012_vm5, %v935_v15  ;;  %4810 = vmatprep.subr.bf16.mxu0 %v4809_v17  ;;  %4814 = vmatprep.subr.bf16.mxu1 %v4809_v17  ;;  %v4243_v14 = vld [vmem:[%s7917_s0 + $0x1a1] sm:$0xff] }
 0x186   :  { %1307 = vrot.lane.b32.xlu0 %v4214_v10, %s4834_s25  ;;  %1309 = vrot.lane.b32.xlu1 %v4215_v11, %s4834_s25  ;;  %v3297_v10 = vld [vmem:[%s7918_s1 + $0x20] sm:$0xf] }
 0x187   :  { %4812 = vmatpush3.bf16.msra.mxu0 %v4809_v17  ;;  %4817 = vmatpush3.bf16.msra.mxu1 %v4809_v17  ;;  %v4242_v11 = vld [vmem:[%s7917_s0 + $0x199] sm:$0xff]  ;;  %v4276_v17 = vld [vmem:[%s7917_s0 + $0x1b0] sm:$0xff] }
 0x188   :  { %v937_v29 = vpop.permute.xlu0 %936  ;;  %v939_v30 = vpop.permute.xlu1 %938  ;;  %4707 = vmatprep.subr.msk.mxu0 %vm3491_vm7, %v3297_v10  ;;  %4815 = vmatprep.subr.msk.mxu1 %vm3491_vm7, %v3297_v10  ;;  %1659 = vst.msk [vmem:[#allocation2 + $0x100] sm:$0xff] %vm46_vm0, %v4276_v17  ;;  %v4298_v17 = vld [vmem:[%s7917_s0 + $0x2b8] sm:$0xff] }
 0x189   :  { %1023 = vst.msk [vmem:[#allocation2 + $0x50] sm:$0xff] %vm1012_vm5, %v937_v29  ;;  %1024 = vst.msk [vmem:[#allocation2 + $0x58] sm:$0xff] %vm1012_vm5, %v939_v30  ;;  %v4246_v30 = vld [vmem:[%s7917_s0 + $0x4a] sm:$0xff] }
 0x18a   :  { %1311 = vrot.lane.b32.xlu0 %v4216_v18, %s4834_s25  ;;  %1313 = vrot.lane.b32.xlu1 %v4217_v21, %s4834_s25  ;;  %v4245_v18 = vld [vmem:[%s7917_s0 + $0x3a] sm:$0xff]  ;;  %1681 = vst.msk [vmem:[#allocation2 + $0x1b0] sm:$0xff] %vm46_vm0, %v4298_v17  ;;  %v4340_v17 = vld [vmem:[%s7917_s0 + $0x1b2] sm:$0xff] }
 0x18b   :  { %4708 = vmatpush3.msk.msra.mxu0 %vm3491_vm7, %v3297_v10  ;;  %4818 = vmatpush3.msk.msra.mxu1 %vm3491_vm7, %v3297_v10  ;;  %v4277_v10 = vld [vmem:[%s7917_s0 + $0x1b8] sm:$0xff] }
 0x18c   :  { %v941_v46 = vpop.permute.xlu0 %940  ;;  %v943_v47 = vpop.permute.xlu1 %942  ;;  %1660 = vst.msk [vmem:[#allocation2 + $0x108] sm:$0xff] %vm46_vm0, %v4277_v10  ;;  %v4299_v10 = vld [vmem:[%s7917_s0 + $0x2c0] sm:$0xff] }
 0x18d   :  { %1025 = vst.msk [vmem:[#allocation2 + $0x60] sm:$0xff] %vm1012_vm5, %v941_v46  ;;  %1026 = vst.msk [vmem:[#allocation2 + $0x68] sm:$0xff] %vm1012_vm5, %v943_v47  ;;  %v4248_v47 = vld [vmem:[%s7917_s0 + $0x62] sm:$0xff] }
 0x18e   :  { %1315 = vrot.lane.b32.xlu0 %v4218_v42, %s4834_s25  ;;  %1317 = vrot.lane.b32.xlu1 %v4219_v43, %s4834_s25  ;;  %v4247_v42 = vld [vmem:[%s7917_s0 + $0x52] sm:$0xff]  ;;  %1682 = vst.msk [vmem:[#allocation2 + $0x1b8] sm:$0xff] %vm46_vm0, %v4299_v10 }
 0x190   :  { %v945_v54 = vpop.permute.xlu0 %944  ;;  %v947_v55 = vpop.permute.xlu1 %946 }
 0x191   :  { %1027 = vst.msk [vmem:[#allocation2 + $0x70] sm:$0xff] %vm1012_vm5, %v945_v54  ;;  %1028 = vst.msk [vmem:[#allocation2 + $0x78] sm:$0xff] %vm1012_vm5, %v947_v55  ;;  %v4250_v55 = vld [vmem:[%s7917_s0 + $0x7a] sm:$0xff] }
 0x192   :  { %1319 = vrot.lane.b32.xlu0 %v4220_v50, %s4834_s25  ;;  %1321 = vrot.lane.b32.xlu1 %v4221_v51, %s4834_s25  ;;  %v4249_v50 = vld [vmem:[%s7917_s0 + $0x6a] sm:$0xff] }
 0x194   :  { %v949_v59 = vpop.permute.xlu0 %948  ;;  %v951_v2 = vpop.permute.xlu1 %950 }
 0x195   :  { %1029 = vst.msk [vmem:[#allocation2 + $0x80] sm:$0xff] %vm1012_vm5, %v949_v59  ;;  %1030 = vst.msk [vmem:[#allocation2 + $0x88] sm:$0xff] %vm1012_vm5, %v951_v2  ;;  %v4252_v2 = vld [vmem:[%s7917_s0 + $0x92] sm:$0xff] }
 0x196   :  { %1323 = vrot.lane.b32.xlu0 %v4222_v12, %s4834_s25  ;;  %1325 = vrot.lane.b32.xlu1 %v4223_v58, %s4834_s25  ;;  %v4251_v12 = vld [vmem:[%s7917_s0 + $0x82] sm:$0xff] }
 0x198   :  { %v953_v16 = vpop.permute.xlu0 %952  ;;  %v955_v62 = vpop.permute.xlu1 %954 }
 0x199   :  { %1031 = vst.msk [vmem:[#allocation2 + $0x90] sm:$0xff] %vm1012_vm5, %v953_v16  ;;  %1032 = vst.msk [vmem:[#allocation2 + $0x98] sm:$0xff] %vm1012_vm5, %v955_v62  ;;  %v4254_v62 = vld [vmem:[%s7917_s0 + $0xaa] sm:$0xff] }
 0x19a   :  { %1327 = vrot.lane.b32.xlu0 %v4224_v1, %s4834_s25  ;;  %1329 = vrot.lane.b32.xlu1 %v4225_v3, %s4834_s25  ;;  %v4253_v1 = vld [vmem:[%s7917_s0 + $0x9a] sm:$0xff] }
 0x19c   :  { %v957_v6 = vpop.permute.xlu0 %956  ;;  %v959_v7 = vpop.permute.xlu1 %958 }
 0x19d   :  { %1033 = vst.msk [vmem:[#allocation2 + $0xa0] sm:$0xff] %vm1012_vm5, %v957_v6  ;;  %1034 = vst.msk [vmem:[#allocation2 + $0xa8] sm:$0xff] %vm1012_vm5, %v959_v7  ;;  %v4256_v7 = vld [vmem:[%s7917_s0 + $0xc2] sm:$0xff] }
 0x19e   :  { %1331 = vrot.lane.b32.xlu0 %v4226_v4, %s4834_s25  ;;  %1333 = vrot.lane.b32.xlu1 %v4227_v5, %s4834_s25  ;;  %v4255_v4 = vld [vmem:[%s7917_s0 + $0xb2] sm:$0xff] }
 0x1a0   :  { %v961_v22 = vpop.permute.xlu0 %960  ;;  %v963_v23 = vpop.permute.xlu1 %962 }
 0x1a1   :  { %1035 = vst.msk [vmem:[#allocation2 + $0xb0] sm:$0xff] %vm1012_vm5, %v961_v22  ;;  %1036 = vst.msk [vmem:[#allocation2 + $0xb8] sm:$0xff] %vm1012_vm5, %v963_v23  ;;  %v4258_v23 = vld [vmem:[%s7917_s0 + $0xda] sm:$0xff] }
 0x1a2   :  { %1335 = vrot.lane.b32.xlu0 %v4228_v19, %s4834_s25  ;;  %1337 = vrot.lane.b32.xlu1 %v4229_v20, %s4834_s25  ;;  %v4257_v19 = vld [vmem:[%s7917_s0 + $0xca] sm:$0xff] }
 0x1a4   :  { %v965_v26 = vpop.permute.xlu0 %964  ;;  %v967_v27 = vpop.permute.xlu1 %966 }
 0x1a5   :  { %1037 = vst.msk [vmem:[#allocation2 + $0xc0] sm:$0xff] %vm1012_vm5, %v965_v26  ;;  %1038 = vst.msk [vmem:[#allocation2 + $0xc8] sm:$0xff] %vm1012_vm5, %v967_v27  ;;  %v4260_v27 = vld [vmem:[%s7917_s0 + $0xf2] sm:$0xff] }
 0x1a6   :  { %1339 = vrot.lane.b32.xlu0 %v4230_v24, %s4834_s25  ;;  %1341 = vrot.lane.b32.xlu1 %v4231_v25, %s4834_s25  ;;  %v4259_v24 = vld [vmem:[%s7917_s0 + $0xe2] sm:$0xff] }
 0x1a8   :  { %v969_v32 = vpop.permute.xlu0 %968  ;;  %v971_v33 = vpop.permute.xlu1 %970 }
 0x1a9   :  { %1039 = vst.msk [vmem:[#allocation2 + $0xd0] sm:$0xff] %vm1012_vm5, %v969_v32  ;;  %1040 = vst.msk [vmem:[#allocation2 + $0xd8] sm:$0xff] %vm1012_vm5, %v971_v33  ;;  %v4262_v33 = vld [vmem:[%s7917_s0 + $0x10a] sm:$0xff] }
 0x1aa   :  { %1343 = vrot.lane.b32.xlu0 %v4232_v28, %s4834_s25  ;;  %1345 = vrot.lane.b32.xlu1 %v4233_v31, %s4834_s25  ;;  %v4261_v28 = vld [vmem:[%s7917_s0 + $0xfa] sm:$0xff] }
 0x1ac   :  { %v973_v36 = vpop.permute.xlu0 %972  ;;  %v975_v37 = vpop.permute.xlu1 %974 }
 0x1ad   :  { %1041 = vst.msk [vmem:[#allocation2 + $0xe0] sm:$0xff] %vm1012_vm5, %v973_v36  ;;  %1042 = vst.msk [vmem:[#allocation2 + $0xe8] sm:$0xff] %vm1012_vm5, %v975_v37  ;;  %v4264_v37 = vld [vmem:[%s7917_s0 + $0x122] sm:$0xff] }
 0x1ae   :  { %1347 = vrot.lane.b32.xlu0 %v4234_v34, %s4834_s25  ;;  %1349 = vrot.lane.b32.xlu1 %v4235_v35, %s4834_s25  ;;  %v4263_v34 = vld [vmem:[%s7917_s0 + $0x112] sm:$0xff] }
 0x1b0   :  { %v977_v40 = vpop.permute.xlu0 %976  ;;  %v979_v41 = vpop.permute.xlu1 %978 }
 0x1b1   :  { %1043 = vst.msk [vmem:[#allocation2 + $0xf0] sm:$0xff] %vm1012_vm5, %v977_v40  ;;  %1044 = vst.msk [vmem:[#allocation2 + $0xf8] sm:$0xff] %vm1012_vm5, %v979_v41  ;;  %v4266_v41 = vld [vmem:[%s7917_s0 + $0x13a] sm:$0xff] }
 0x1b2   :  { %1351 = vrot.lane.b32.xlu0 %v4236_v38, %s4834_s25  ;;  %1353 = vrot.lane.b32.xlu1 %v4237_v39, %s4834_s25  ;;  %v4265_v38 = vld [vmem:[%s7917_s0 + $0x12a] sm:$0xff] }
 0x1b4   :  { %v1111_v53 = vpop.permute.xlu0 %1110  ;;  %v1113_v56 = vpop.permute.xlu1 %1112 }
 0x1b5   :  { %1207 = vst.msk [vmem:[#allocation2] sm:$0xff] %vm1206_vm6, %v1111_v53  ;;  %1208 = vst.msk [vmem:[#allocation2 + $0x8] sm:$0xff] %vm1206_vm6, %v1113_v56 }
 0x1b6   :  { %1355 = vrot.lane.b32.xlu0 %v4238_v49, %s4834_s25  ;;  %1357 = vrot.lane.b32.xlu1 %v4239_v52, %s4834_s25  ;;  %v4268_v49 = vld [vmem:[%s7917_s0 + $0x152] sm:$0xff]  ;;  %v4269_v52 = vld [vmem:[%s7917_s0 + $0x15a] sm:$0xff] }
 0x1b8   :  { %v1115_v8 = vpop.permute.xlu0 %1114  ;;  %v1117_v9 = vpop.permute.xlu1 %1116 }
 0x1b9   :  { %1209 = vst.msk [vmem:[#allocation2 + $0x10] sm:$0xff] %vm1206_vm6, %v1115_v8  ;;  %1210 = vst.msk [vmem:[#allocation2 + $0x18] sm:$0xff] %vm1206_vm6, %v1117_v9 }
 0x1ba   :  { %1359 = vrot.lane.b32.xlu0 %v5715_v61, %s4834_s25  ;;  %1361 = vrot.lane.b32.xlu1 %v5720_v60, %s4834_s25  ;;  %v4244_v60 = vld [vmem:[%s7917_s0 + $0x32] sm:$0xff] }
 0x1bc   :  { %v1119_v15 = vpop.permute.xlu0 %1118  ;;  %v1121_v61 = vpop.permute.xlu1 %1120 }
 0x1bd   :  { %1211 = vst.msk [vmem:[#allocation2 + $0x20] sm:$0xff] %vm1206_vm6, %v1119_v15  ;;  %1212 = vst.msk [vmem:[#allocation2 + $0x28] sm:$0xff] %vm1206_vm6, %v1121_v61  ;;  %v6263_v61 = vld [vmem:[%s7917_s0 + $0x1d0] sm:$0xff] }
 0x1be   :  { %1363 = vrot.lane.b32.xlu0 %v4242_v11, %s4834_s25  ;;  %1365 = vrot.lane.b32.xlu1 %v4243_v14, %s4834_s25  ;;  %v6256_v11 = vld [vmem:[%s7917_s0 + $0x1c8] sm:$0xff]  ;;  %1662 = vst.msk [vmem:[#allocation2 + $0x118] sm:$0xff] %vm46_vm0, %v6263_v61 }
 0x1bf   :  { %1661 = vst.msk [vmem:[#allocation2 + $0x110] sm:$0xff] %vm46_vm0, %v6256_v11 }
 0x1c0   :  { %v1123_v21 = vpop.permute.xlu0 %1122  ;;  %v1125_v29 = vpop.permute.xlu1 %1124 }
 0x1c1   :  { %1213 = vst.msk [vmem:[#allocation2 + $0x30] sm:$0xff] %vm1206_vm6, %v1123_v21  ;;  %1214 = vst.msk [vmem:[#allocation2 + $0x38] sm:$0xff] %vm1206_vm6, %v1125_v29  ;;  %v6282_v21 = vld [vmem:[%s7917_s0 + $0x1e0] sm:$0xff] }
 0x1c2   :  { %1496 = vrot.lane.b32.xlu0 %v4244_v60, %s4835_s11  ;;  %1498 = vrot.lane.b32.xlu1 %v4245_v18, %s4835_s11  ;;  %v4274_v60 = vld [vmem:[%s7917_s0 + $0x19a] sm:$0xff]  ;;  %v4275_v18 = vld [vmem:[%s7917_s0 + $0x1a2] sm:$0xff]  ;;  %1663 = vst.msk [vmem:[#allocation2 + $0x120] sm:$0xff] %vm46_vm0, %v6282_v21 }
 0x1c4   :  { %v1127_v43 = vpop.permute.xlu0 %1126  ;;  %v1129_v46 = vpop.permute.xlu1 %1128 }
 0x1c5   :  { %1215 = vst.msk [vmem:[#allocation2 + $0x40] sm:$0xff] %vm1206_vm6, %v1127_v43  ;;  %1216 = vst.msk [vmem:[#allocation2 + $0x48] sm:$0xff] %vm1206_vm6, %v1129_v46  ;;  %v6306_v43 = vld [vmem:[%s7917_s0 + $0x1f8] sm:$0xff] }
 0x1c6   :  { %1500 = vrot.lane.b32.xlu0 %v4246_v30, %s4835_s11  ;;  %1502 = vrot.lane.b32.xlu1 %v4247_v42, %s4835_s11  ;;  %v4309_v42 = vld [vmem:[%s7917_s0 + $0x1b9] sm:$0xff]  ;;  %1665 = vst.msk [vmem:[#allocation2 + $0x130] sm:$0xff] %vm46_vm0, %v6306_v43 }
 0x1c8   :  { %v1131_v51 = vpop.permute.xlu0 %1130  ;;  %v1133_v54 = vpop.permute.xlu1 %1132 }
 0x1c9   :  { %1217 = vst.msk [vmem:[#allocation2 + $0x50] sm:$0xff] %vm1206_vm6, %v1131_v51  ;;  %1218 = vst.msk [vmem:[#allocation2 + $0x58] sm:$0xff] %vm1206_vm6, %v1133_v54  ;;  %v6324_v51 = vld [vmem:[%s7917_s0 + $0x1c9] sm:$0xff]  ;;  %v6329_v54 = vld [vmem:[%s7917_s0 + $0x1d1] sm:$0xff] }
 0x1ca   :  { %1504 = vrot.lane.b32.xlu0 %v4248_v47, %s4835_s11  ;;  %1506 = vrot.lane.b32.xlu1 %v4249_v50, %s4835_s11  ;;  %v6313_v50 = vld [vmem:[%s7917_s0 + $0x200] sm:$0xff] }
 0x1cb   :  { %1666 = vst.msk [vmem:[#allocation2 + $0x138] sm:$0xff] %vm46_vm0, %v6313_v50 }
 0x1cc   :  { %v1135_v58 = vpop.permute.xlu0 %1134  ;;  %v1137_v59 = vpop.permute.xlu1 %1136 }
 0x1cd   :  { %1219 = vst.msk [vmem:[#allocation2 + $0x60] sm:$0xff] %vm1206_vm6, %v1135_v58  ;;  %1220 = vst.msk [vmem:[#allocation2 + $0x68] sm:$0xff] %vm1206_vm6, %v1137_v59  ;;  %v6341_v59 = vld [vmem:[%s7917_s0 + $0x218] sm:$0xff] }
 0x1ce   :  { %1508 = vrot.lane.b32.xlu0 %v4250_v55, %s4835_s11  ;;  %1510 = vrot.lane.b32.xlu1 %v4251_v12, %s4835_s11  ;;  %v6334_v55 = vld [vmem:[%s7917_s0 + $0x210] sm:$0xff]  ;;  %1668 = vst.msk [vmem:[#allocation2 + $0x148] sm:$0xff] %vm46_vm0, %v6341_v59 }
 0x1cf   :  { %1667 = vst.msk [vmem:[#allocation2 + $0x140] sm:$0xff] %vm46_vm0, %v6334_v55 }
 0x1d0   :  { %v1139_v3 = vpop.permute.xlu0 %1138  ;;  %v1141_v16 = vpop.permute.xlu1 %1140 }
 0x1d1   :  { %1221 = vst.msk [vmem:[#allocation2 + $0x70] sm:$0xff] %vm1206_vm6, %v1139_v3  ;;  %1222 = vst.msk [vmem:[#allocation2 + $0x78] sm:$0xff] %vm1206_vm6, %v1141_v16  ;;  %v6364_v3 = vld [vmem:[%s7917_s0 + $0x228] sm:$0xff] }
 0x1d2   :  { %1512 = vrot.lane.b32.xlu0 %v4252_v2, %s4835_s11  ;;  %1514 = vrot.lane.b32.xlu1 %v4253_v1, %s4835_s11  ;;  %v6354_v2 = vld [vmem:[%s7917_s0 + $0x1e1] sm:$0xff]  ;;  %v6359_v1 = vld [vmem:[%s7917_s0 + $0x1e9] sm:$0xff]  ;;  %1669 = vst.msk [vmem:[#allocation2 + $0x150] sm:$0xff] %vm46_vm0, %v6364_v3 }
 0x1d4   :  { %v1143_v5 = vpop.permute.xlu0 %1142  ;;  %v1145_v6 = vpop.permute.xlu1 %1144 }
 0x1d5   :  { %1223 = vst.msk [vmem:[#allocation2 + $0x80] sm:$0xff] %vm1206_vm6, %v1143_v5  ;;  %1224 = vst.msk [vmem:[#allocation2 + $0x88] sm:$0xff] %vm1206_vm6, %v1145_v6  ;;  %v4314_v5 = vld [vmem:[%s7917_s0 + $0x1f9] sm:$0xff]  ;;  %v4315_v6 = vld [vmem:[%s7917_s0 + $0x201] sm:$0xff] }
 0x1d6   :  { %1516 = vrot.lane.b32.xlu0 %v4254_v62, %s4835_s11  ;;  %1518 = vrot.lane.b32.xlu1 %v4255_v4, %s4835_s11  ;;  %v6371_v4 = vld [vmem:[%s7917_s0 + $0x230] sm:$0xff] }
 0x1d7   :  { %1670 = vst.msk [vmem:[#allocation2 + $0x158] sm:$0xff] %vm46_vm0, %v6371_v4 }
 0x1d8   :  { %v1147_v20 = vpop.permute.xlu0 %1146  ;;  %v1149_v22 = vpop.permute.xlu1 %1148 }
 0x1d9   :  { %1225 = vst.msk [vmem:[#allocation2 + $0x90] sm:$0xff] %vm1206_vm6, %v1147_v20  ;;  %1226 = vst.msk [vmem:[#allocation2 + $0x98] sm:$0xff] %vm1206_vm6, %v1149_v22  ;;  %v6397_v22 = vld [vmem:[%s7917_s0 + $0x248] sm:$0xff] }
 0x1da   :  { %1520 = vrot.lane.b32.xlu0 %v4256_v7, %s4835_s11  ;;  %1522 = vrot.lane.b32.xlu1 %v4257_v19, %s4835_s11  ;;  %v6390_v7 = vld [vmem:[%s7917_s0 + $0x240] sm:$0xff]  ;;  %1672 = vst.msk [vmem:[#allocation2 + $0x168] sm:$0xff] %vm46_vm0, %v6397_v22 }
 0x1db   :  { %1671 = vst.msk [vmem:[#allocation2 + $0x160] sm:$0xff] %vm46_vm0, %v6390_v7 }
 0x1dc   :  { %v1151_v25 = vpop.permute.xlu0 %1150  ;;  %v1153_v26 = vpop.permute.xlu1 %1152 }
 0x1dd   :  { %1227 = vst.msk [vmem:[#allocation2 + $0xa0] sm:$0xff] %vm1206_vm6, %v1151_v25  ;;  %1228 = vst.msk [vmem:[#allocation2 + $0xa8] sm:$0xff] %vm1206_vm6, %v1153_v26  ;;  %v6414_v25 = vld [vmem:[%s7917_s0 + $0x258] sm:$0xff] }
 0x1de   :  { %1524 = vrot.lane.b32.xlu0 %v4258_v23, %s4835_s11  ;;  %1526 = vrot.lane.b32.xlu1 %v4259_v24, %s4835_s11  ;;  %v4316_v23 = vld [vmem:[%s7917_s0 + $0x211] sm:$0xff]  ;;  %v4317_v24 = vld [vmem:[%s7917_s0 + $0x219] sm:$0xff]  ;;  %1673 = vst.msk [vmem:[#allocation2 + $0x170] sm:$0xff] %vm46_vm0, %v6414_v25 }
 0x1e0   :  { %v1155_v31 = vpop.permute.xlu0 %1154  ;;  %v1157_v32 = vpop.permute.xlu1 %1156 }
 0x1e1   :  { %1229 = vst.msk [vmem:[#allocation2 + $0xb0] sm:$0xff] %vm1206_vm6, %v1155_v31  ;;  %1230 = vst.msk [vmem:[#allocation2 + $0xb8] sm:$0xff] %vm1206_vm6, %v1157_v32  ;;  %v4318_v31 = vld [vmem:[%s7917_s0 + $0x229] sm:$0xff]  ;;  %v4319_v32 = vld [vmem:[%s7917_s0 + $0x231] sm:$0xff] }
 0x1e2   :  { %1528 = vrot.lane.b32.xlu0 %v4260_v27, %s4835_s11  ;;  %1530 = vrot.lane.b32.xlu1 %v4261_v28, %s4835_s11  ;;  %v6421_v28 = vld [vmem:[%s7917_s0 + $0x260] sm:$0xff] }
 0x1e3   :  { %1674 = vst.msk [vmem:[#allocation2 + $0x178] sm:$0xff] %vm46_vm0, %v6421_v28 }
 0x1e4   :  { %v1159_v35 = vpop.permute.xlu0 %1158  ;;  %v1161_v36 = vpop.permute.xlu1 %1160 }
 0x1e5   :  { %1231 = vst.msk [vmem:[#allocation2 + $0xc0] sm:$0xff] %vm1206_vm6, %v1159_v35  ;;  %1232 = vst.msk [vmem:[#allocation2 + $0xc8] sm:$0xff] %vm1206_vm6, %v1161_v36  ;;  %v6445_v36 = vld [vmem:[%s7917_s0 + $0x278] sm:$0xff] }
 0x1e6   :  { %1532 = vrot.lane.b32.xlu0 %v4262_v33, %s4835_s11  ;;  %1534 = vrot.lane.b32.xlu1 %v4263_v34, %s4835_s11  ;;  %v6438_v33 = vld [vmem:[%s7917_s0 + $0x270] sm:$0xff]  ;;  %1676 = vst.msk [vmem:[#allocation2 + $0x188] sm:$0xff] %vm46_vm0, %v6445_v36 }
 0x1e7   :  { %1675 = vst.msk [vmem:[#allocation2 + $0x180] sm:$0xff] %vm46_vm0, %v6438_v33 }
 0x1e8   :  { %v1163_v39 = vpop.permute.xlu0 %1162  ;;  %v1165_v40 = vpop.permute.xlu1 %1164 }
 0x1e9   :  { %1233 = vst.msk [vmem:[#allocation2 + $0xd0] sm:$0xff] %vm1206_vm6, %v1163_v39  ;;  %1234 = vst.msk [vmem:[#allocation2 + $0xd8] sm:$0xff] %vm1206_vm6, %v1165_v40  ;;  %v6462_v39 = vld [vmem:[%s7917_s0 + $0x288] sm:$0xff] }
 0x1ea   :  { %1536 = vrot.lane.b32.xlu0 %v4264_v37, %s4835_s11  ;;  %1538 = vrot.lane.b32.xlu1 %v4265_v38, %s4835_s11  ;;  %v4320_v37 = vld [vmem:[%s7917_s0 + $0x241] sm:$0xff]  ;;  %v4321_v38 = vld [vmem:[%s7917_s0 + $0x249] sm:$0xff]  ;;  %1677 = vst.msk [vmem:[#allocation2 + $0x190] sm:$0xff] %vm46_vm0, %v6462_v39 }
 0x1ec   :  { %v1167_v45 = vpop.permute.xlu0 %1166  ;;  %v1169_v48 = vpop.permute.xlu1 %1168 }
 0x1ed   :  { %1235 = vst.msk [vmem:[#allocation2 + $0xe0] sm:$0xff] %vm1206_vm6, %v1167_v45  ;;  %1236 = vst.msk [vmem:[#allocation2 + $0xe8] sm:$0xff] %vm1206_vm6, %v1169_v48  ;;  %v4322_v45 = vld [vmem:[%s7917_s0 + $0x259] sm:$0xff]  ;;  %v4323_v48 = vld [vmem:[%s7917_s0 + $0x261] sm:$0xff] }
 0x1ee   :  { %1540 = vrot.lane.b32.xlu0 %v4266_v41, %s4835_s11  ;;  %1542 = vrot.lane.b32.xlu1 %v4267_v44, %s4835_s11  ;;  %v6469_v44 = vld [vmem:[%s7917_s0 + $0x290] sm:$0xff] }
 0x1ef   :  { %1678 = vst.msk [vmem:[#allocation2 + $0x198] sm:$0xff] %vm46_vm0, %v6469_v44 }
 0x1f0   :  { %v1171_v53 = vpop.permute.xlu0 %1170  ;;  %v1173_v56 = vpop.permute.xlu1 %1172 }
 0x1f1   :  { %1237 = vst.msk [vmem:[#allocation2 + $0xf0] sm:$0xff] %vm1206_vm6, %v1171_v53  ;;  %1238 = vst.msk [vmem:[#allocation2 + $0xf8] sm:$0xff] %vm1206_vm6, %v1173_v56  ;;  %v4297_v56 = vld [vmem:[%s7917_s0 + $0x2a8] sm:$0xff] }
 0x1f2   :  { %1544 = vrot.lane.b32.xlu0 %v4268_v49, %s4835_s11  ;;  %1546 = vrot.lane.b32.xlu1 %v4269_v52, %s4835_s11  ;;  %v4296_v49 = vld [vmem:[%s7917_s0 + $0x2a0] sm:$0xff]  ;;  %1680 = vst.msk [vmem:[#allocation2 + $0x1a8] sm:$0xff] %vm46_vm0, %v4297_v56 }
 0x1f3   :  { %1679 = vst.msk [vmem:[#allocation2 + $0x1a0] sm:$0xff] %vm46_vm0, %v4296_v49  ;;  %v4338_v49 = vld [vmem:[%s7917_s0 + $0x319] sm:$0xff] }
 0x1f4   :  { %v1304_v8 = vpop.permute.xlu0 %1303  ;;  %v1306_v9 = vpop.permute.xlu1 %1305 }
 0x1f5   :  { %1400 = vst.msk [vmem:[#allocation2] sm:$0xff] %vm1399_vm8, %v1304_v8  ;;  %1401 = vst.msk [vmem:[#allocation2 + $0x8] sm:$0xff] %vm1399_vm8, %v1306_v9 }
 0x1f6   :  { %1548 = vrot.lane.b32.xlu0 %v4270_v57, %s4835_s11  ;;  %1550 = vrot.lane.b32.xlu1 %v4271_v13, %s4835_s11  ;;  %v4324_v57 = vld [vmem:[%s7917_s0 + $0x271] sm:$0xff]  ;;  %v4325_v13 = vld [vmem:[%s7917_s0 + $0x279] sm:$0xff] }
 0x1f8   :  { %v1308_v14 = vpop.permute.xlu0 %1307  ;;  %v1310_v15 = vpop.permute.xlu1 %1309 }
 0x1f9   :  { %1402 = vst.msk [vmem:[#allocation2 + $0x10] sm:$0xff] %vm1399_vm8, %v1308_v14  ;;  %1403 = vst.msk [vmem:[#allocation2 + $0x18] sm:$0xff] %vm1399_vm8, %v1310_v15  ;;  %v4326_v14 = vld [vmem:[%s7917_s0 + $0x289] sm:$0xff]  ;;  %v4327_v15 = vld [vmem:[%s7917_s0 + $0x291] sm:$0xff] }
 0x1fa   :  { %1552 = vrot.lane.b32.xlu0 %v5821_v63, %s4835_s11  ;;  %1554 = vrot.lane.b32.xlu1 %v5826_v0, %s4835_s11  ;;  %v6289_v63 = vld [vmem:[%s7917_s0 + $0x1e8] sm:$0xff]  ;;  %v4308_v0 = vld [vmem:[%s7917_s0 + $0x1b1] sm:$0xff] }
 0x1fb   :  { %1664 = vst.msk [vmem:[#allocation2 + $0x128] sm:$0xff] %vm46_vm0, %v6289_v63 }
 0x1fc   :  { %v1312_v29 = vpop.permute.xlu0 %1311  ;;  %v1314_v30 = vpop.permute.xlu1 %1313 }
 0x1fd   :  { %1404 = vst.msk [vmem:[#allocation2 + $0x20] sm:$0xff] %vm1399_vm8, %v1312_v29  ;;  %1405 = vst.msk [vmem:[#allocation2 + $0x28] sm:$0xff] %vm1399_vm8, %v1314_v30  ;;  %v4301_v30 = vld [vmem:[%s7917_s0 + $0x2d8] sm:$0xff] }
 0x1fe   :  { %1556 = vrot.lane.b32.xlu0 %v4274_v60, %s4835_s11  ;;  %1558 = vrot.lane.b32.xlu1 %v4275_v18, %s4835_s11  ;;  %v4300_v60 = vld [vmem:[%s7917_s0 + $0x2d0] sm:$0xff]  ;;  %1684 = vst.msk [vmem:[#allocation2 + $0x1c8] sm:$0xff] %vm46_vm0, %v4301_v30 }
 0x1ff   :  { %1683 = vst.msk [vmem:[#allocation2 + $0x1c0] sm:$0xff] %vm46_vm0, %v4300_v60  ;;  %v6632_v60 = vld [vmem:[%s7917_s0 + $0x1ca] sm:$0xff] }
 0x200   :  { %v1316_v46 = vpop.permute.xlu0 %1315  ;;  %v1318_v47 = vpop.permute.xlu1 %1317 }
 0x201   :  { %1406 = vst.msk [vmem:[#allocation2 + $0x30] sm:$0xff] %vm1399_vm8, %v1316_v46  ;;  %1407 = vst.msk [vmem:[#allocation2 + $0x38] sm:$0xff] %vm1399_vm8, %v1318_v47  ;;  %v4302_v46 = vld [vmem:[%s7917_s0 + $0x2e8] sm:$0xff] }
 0x202   :  { %1755 = vrot.lane.b32.xlu0 %v4308_v0, %s4828_s16  ;;  %1757 = vrot.lane.b32.xlu1 %v4309_v42, %s4828_s16  ;;  %v4328_v0 = vld [vmem:[%s7917_s0 + $0x2a1] sm:$0xff]  ;;  %v4329_v42 = vld [vmem:[%s7917_s0 + $0x2a9] sm:$0xff]  ;;  %1685 = vst.msk [vmem:[#allocation2 + $0x1d0] sm:$0xff] %vm46_vm0, %v4302_v46 }
 0x203   :  { %v6650_v46 = vld [vmem:[%s7917_s0 + $0x1e2] sm:$0xff] }
 0x204   :  { %v1320_v12 = vpop.permute.xlu0 %1319  ;;  %v1322_v58 = vpop.permute.xlu1 %1321 }
 0x205   :  { %1408 = vst.msk [vmem:[#allocation2 + $0x40] sm:$0xff] %vm1399_vm8, %v1320_v12  ;;  %1409 = vst.msk [vmem:[#allocation2 + $0x48] sm:$0xff] %vm1399_vm8, %v1322_v58  ;;  %v4303_v58 = vld [vmem:[%s7917_s0 + $0x2f0] sm:$0xff] }
 0x206   :  { %1759 = vrot.lane.b32.xlu0 %v6324_v51, %s4828_s16  ;;  %1761 = vrot.lane.b32.xlu1 %v6329_v54, %s4828_s16  ;;  %1686 = vst.msk [vmem:[#allocation2 + $0x1d8] sm:$0xff] %vm46_vm0, %v4303_v58 }
 0x208   :  { %v1324_v16 = vpop.permute.xlu0 %1323  ;;  %v1326_v62 = vpop.permute.xlu1 %1325 }
 0x209   :  { %1410 = vst.msk [vmem:[#allocation2 + $0x50] sm:$0xff] %vm1399_vm8, %v1324_v16  ;;  %1411 = vst.msk [vmem:[#allocation2 + $0x58] sm:$0xff] %vm1399_vm8, %v1326_v62  ;;  %v4330_v16 = vld [vmem:[%s7917_s0 + $0x2b9] sm:$0xff]  ;;  %v4331_v62 = vld [vmem:[%s7917_s0 + $0x2c1] sm:$0xff] }
 0x20a   :  { %1763 = vrot.lane.b32.xlu0 %v6354_v2, %s4828_s16  ;;  %1765 = vrot.lane.b32.xlu1 %v6359_v1, %s4828_s16 }
 0x20c   :  { %v1328_v19 = vpop.permute.xlu0 %1327  ;;  %v1330_v20 = vpop.permute.xlu1 %1329 }
 0x20d   :  { %1412 = vst.msk [vmem:[#allocation2 + $0x60] sm:$0xff] %vm1399_vm8, %v1328_v19  ;;  %1413 = vst.msk [vmem:[#allocation2 + $0x68] sm:$0xff] %vm1399_vm8, %v1330_v20  ;;  %v4305_v20 = vld [vmem:[%s7917_s0 + $0x308] sm:$0xff] }
 0x20e   :  { %1767 = vrot.lane.b32.xlu0 %v4314_v5, %s4828_s16  ;;  %1769 = vrot.lane.b32.xlu1 %v4315_v6, %s4828_s16  ;;  %v4304_v5 = vld [vmem:[%s7917_s0 + $0x300] sm:$0xff]  ;;  %1688 = vst.msk [vmem:[#allocation2 + $0x1e8] sm:$0xff] %vm46_vm0, %v4305_v20 }
 0x20f   :  { %1687 = vst.msk [vmem:[#allocation2 + $0x1e0] sm:$0xff] %vm46_vm0, %v4304_v5  ;;  %v6668_v5 = vld [vmem:[%s7917_s0 + $0x1fa] sm:$0xff] }
 0x210   :  { %v1332_v26 = vpop.permute.xlu0 %1331  ;;  %v1334_v27 = vpop.permute.xlu1 %1333 }
 0x211   :  { %1414 = vst.msk [vmem:[#allocation2 + $0x70] sm:$0xff] %vm1399_vm8, %v1332_v26  ;;  %1415 = vst.msk [vmem:[#allocation2 + $0x78] sm:$0xff] %vm1399_vm8, %v1334_v27  ;;  %v4306_v26 = vld [vmem:[%s7917_s0 + $0x318] sm:$0xff] }
 0x212   :  { %1771 = vrot.lane.b32.xlu0 %v4316_v23, %s4828_s16  ;;  %1773 = vrot.lane.b32.xlu1 %v4317_v24, %s4828_s16  ;;  %v4332_v23 = vld [vmem:[%s7917_s0 + $0x2d1] sm:$0xff]  ;;  %v4333_v24 = vld [vmem:[%s7917_s0 + $0x2d9] sm:$0xff]  ;;  %1689 = vst.msk [vmem:[#allocation2 + $0x1f0] sm:$0xff] %vm46_vm0, %v4306_v26 }
 0x213   :  { %v6686_v26 = vld [vmem:[%s7917_s0 + $0x212] sm:$0xff] }
 0x214   :  { %v1336_v34 = vpop.permute.xlu0 %1335  ;;  %v1338_v35 = vpop.permute.xlu1 %1337 }
 0x215   :  { %1416 = vst.msk [vmem:[#allocation2 + $0x80] sm:$0xff] %vm1399_vm8, %v1336_v34  ;;  %1417 = vst.msk [vmem:[#allocation2 + $0x88] sm:$0xff] %vm1399_vm8, %v1338_v35  ;;  %v4334_v34 = vld [vmem:[%s7917_s0 + $0x2e9] sm:$0xff]  ;;  %v4335_v35 = vld [vmem:[%s7917_s0 + $0x2f1] sm:$0xff] }
 0x216   :  { %1775 = vrot.lane.b32.xlu0 %v4318_v31, %s4828_s16  ;;  %1777 = vrot.lane.b32.xlu1 %v4319_v32, %s4828_s16  ;;  %v4307_v32 = vld [vmem:[%s7917_s0 + $0x320] sm:$0xff] }
 0x217   :  { %1690 = vst.msk [vmem:[#allocation2 + $0x1f8] sm:$0xff] %vm46_vm0, %v4307_v32 }
 0x218   :  { %v1340_v40 = vpop.permute.xlu0 %1339  ;;  %v1342_v41 = vpop.permute.xlu1 %1341 }
 0x219   :  { %1418 = vst.msk [vmem:[#allocation2 + $0x90] sm:$0xff] %vm1399_vm8, %v1340_v40  ;;  %1419 = vst.msk [vmem:[#allocation2 + $0x98] sm:$0xff] %vm1399_vm8, %v1342_v41  ;;  %v4336_v40 = vld [vmem:[%s7917_s0 + $0x301] sm:$0xff]  ;;  %v4337_v41 = vld [vmem:[%s7917_s0 + $0x309] sm:$0xff] }
 0x21a   :  { %1779 = vrot.lane.b32.xlu0 %v4320_v37, %s4828_s16  ;;  %1781 = vrot.lane.b32.xlu1 %v4321_v38, %s4828_s16 }
 0x21c   :  { %v1344_v52 = vpop.permute.xlu0 %1343  ;;  %v1346_v53 = vpop.permute.xlu1 %1345 }
 0x21d   :  { %1420 = vst.msk [vmem:[#allocation2 + $0xa0] sm:$0xff] %vm1399_vm8, %v1344_v52  ;;  %1421 = vst.msk [vmem:[#allocation2 + $0xa8] sm:$0xff] %vm1399_vm8, %v1346_v53 }
 0x21e   :  { %1783 = vrot.lane.b32.xlu0 %v4322_v45, %s4828_s16  ;;  %1785 = vrot.lane.b32.xlu1 %v4323_v48, %s4828_s16 }
 0x220   :  { %v1348_v8 = vpop.permute.xlu0 %1347  ;;  %v1350_v9 = vpop.permute.xlu1 %1349 }
 0x221   :  { %1422 = vst.msk [vmem:[#allocation2 + $0xb0] sm:$0xff] %vm1399_vm8, %v1348_v8  ;;  %1423 = vst.msk [vmem:[#allocation2 + $0xb8] sm:$0xff] %vm1399_vm8, %v1350_v9 }
 0x222   :  { %1787 = vrot.lane.b32.xlu0 %v4324_v57, %s4828_s16  ;;  %1789 = vrot.lane.b32.xlu1 %v4325_v13, %s4828_s16  ;;  %v4339_v13 = vld [vmem:[%s7917_s0 + $0x321] sm:$0xff] }
 0x224   :  { %v1352_v18 = vpop.permute.xlu0 %1351  ;;  %v1354_v29 = vpop.permute.xlu1 %1353 }
 0x225   :  { %1424 = vst.msk [vmem:[#allocation2 + $0xc0] sm:$0xff] %vm1399_vm8, %v1352_v18  ;;  %1425 = vst.msk [vmem:[#allocation2 + $0xc8] sm:$0xff] %vm1399_vm8, %v1354_v29 }
 0x226   :  { %1791 = vrot.lane.b32.xlu0 %v4326_v14, %s4828_s16  ;;  %1793 = vrot.lane.b32.xlu1 %v4327_v15, %s4828_s16  ;;  %v4341_v15 = vld [vmem:[%s7917_s0 + $0x1ba] sm:$0xff] }
 0x228   :  { %v1356_v47 = vpop.permute.xlu0 %1355  ;;  %v1358_v12 = vpop.permute.xlu1 %1357 }
 0x229   :  { %1426 = vst.msk [vmem:[#allocation2 + $0xd0] sm:$0xff] %vm1399_vm8, %v1356_v47  ;;  %1427 = vst.msk [vmem:[#allocation2 + $0xd8] sm:$0xff] %vm1399_vm8, %v1358_v12 }
 0x22a   :  { %1795 = vrot.lane.b32.xlu0 %v4328_v0, %s4828_s16  ;;  %1797 = vrot.lane.b32.xlu1 %v4329_v42, %s4828_s16  ;;  %v6637_v42 = vld [vmem:[%s7917_s0 + $0x1d2] sm:$0xff] }
 0x22c   :  { %v1360_v6 = vpop.permute.xlu0 %1359  ;;  %v1362_v19 = vpop.permute.xlu1 %1361 }
 0x22d   :  { %1428 = vst.msk [vmem:[#allocation2 + $0xe0] sm:$0xff] %vm1399_vm8, %v1360_v6  ;;  %1429 = vst.msk [vmem:[#allocation2 + $0xe8] sm:$0xff] %vm1399_vm8, %v1362_v19 }
 0x22e   :  { %1799 = vrot.lane.b32.xlu0 %v4330_v16, %s4828_s16  ;;  %1801 = vrot.lane.b32.xlu1 %v4331_v62, %s4828_s16  ;;  %v6655_v62 = vld [vmem:[%s7917_s0 + $0x1ea] sm:$0xff] }
 0x230   :  { %v1364_v27 = vpop.permute.xlu0 %1363  ;;  %v1366_v31 = vpop.permute.xlu1 %1365 }
 0x231   :  { %1430 = vst.msk [vmem:[#allocation2 + $0xf0] sm:$0xff] %vm1399_vm8, %v1364_v27  ;;  %1431 = vst.msk [vmem:[#allocation2 + $0xf8] sm:$0xff] %vm1399_vm8, %v1366_v31 }
 0x232   :  { %1803 = vrot.lane.b32.xlu0 %v4332_v23, %s4828_s16  ;;  %1805 = vrot.lane.b32.xlu1 %v4333_v24, %s4828_s16  ;;  %v6673_v24 = vld [vmem:[%s7917_s0 + $0x202] sm:$0xff] }
 0x234   :  { %v1497_v37 = vpop.permute.xlu0 %1496  ;;  %v1499_v38 = vpop.permute.xlu1 %1498 }
 0x235   :  { %1593 = vst.msk [vmem:[#allocation2] sm:$0xff] %vm1592_vm9, %v1497_v37  ;;  %1594 = vst.msk [vmem:[#allocation2 + $0x8] sm:$0xff] %vm1592_vm9, %v1499_v38  ;;  %v6704_v37 = vld [vmem:[%s7917_s0 + $0x22a] sm:$0xff] }
 0x236   :  { %1807 = vrot.lane.b32.xlu0 %v4334_v34, %s4828_s16  ;;  %1809 = vrot.lane.b32.xlu1 %v4335_v35, %s4828_s16  ;;  %v6691_v35 = vld [vmem:[%s7917_s0 + $0x21a] sm:$0xff] }
 0x238   :  { %v1501_v45 = vpop.permute.xlu0 %1500  ;;  %v1503_v48 = vpop.permute.xlu1 %1502 }
 0x239   :  { %1595 = vst.msk [vmem:[#allocation2 + $0x10] sm:$0xff] %vm1592_vm9, %v1501_v45  ;;  %1596 = vst.msk [vmem:[#allocation2 + $0x18] sm:$0xff] %vm1592_vm9, %v1503_v48  ;;  %v6709_v48 = vld [vmem:[%s7917_s0 + $0x232] sm:$0xff] }
 0x23a   :  { %1811 = vrot.lane.b32.xlu0 %v4336_v40, %s4828_s16  ;;  %1813 = vrot.lane.b32.xlu1 %v4337_v41, %s4828_s16 }
 0x23c   :  { %v1505_v52 = vpop.permute.xlu0 %1504  ;;  %v1507_v53 = vpop.permute.xlu1 %1506  ;;  %v3229_v56 = vld [vmem:[#allocation2] sm:$0xff]  ;;  %v3230_v57 = vld [vmem:[#allocation2 + $0x8] sm:$0xff] }
 0x23d   :  { %1597 = vst.msk [vmem:[#allocation2 + $0x20] sm:$0xff] %vm1592_vm9, %v1505_v52  ;;  %1598 = vst.msk [vmem:[#allocation2 + $0x28] sm:$0xff] %vm1592_vm9, %v1507_v53  ;;  %4709 = vmatprep.mubr.msk.f32.mxu0 %vm3298_vm10, %v3229_v56 }
 0x23e   :  { %1815 = vrot.lane.b32.xlu0 %v4338_v49, %s4828_s16  ;;  %4710 = vmatmul.mubr.msk.f32.vlgmr.msra.gmra.mrb[0].mxu0 %vm3298_vm10, %v3230_v57  ;;  %v6722_v49 = vld [vmem:[%s7917_s0 + $0x242] sm:$0xff] }
 0x23f   :  { %1817 = vrot.lane.b32.xlu1 %v4339_v13, %s4828_s16  ;;  %v6727_v13 = vld [vmem:[%s7917_s0 + $0x24a] sm:$0xff] }
 0x240   :  { %v1509_v8 = vpop.permute.xlu0 %1508  ;;  %v1511_v9 = vpop.permute.xlu1 %1510  ;;  %v3231_v10 = vld [vmem:[#allocation2 + $0x10] sm:$0xff]  ;;  %v3232_v14 = vld [vmem:[#allocation2 + $0x18] sm:$0xff] }
 0x241   :  { %1599 = vst.msk [vmem:[#allocation2 + $0x30] sm:$0xff] %vm1592_vm9, %v1509_v8  ;;  %1600 = vst.msk [vmem:[#allocation2 + $0x38] sm:$0xff] %vm1592_vm9, %v1511_v9  ;;  %4712 = vmatprep.mubr.msk.f32.mxu0 %vm3298_vm10, %v3231_v10 }
 0x242   :  { %1947 = vrot.lane.b32.xlu0 %v4340_v17, %s4829_s14  ;;  %4713 = vmatmul.mubr.msk.f32.gmra.mrb[2].mxu0 %vm3298_vm10, %v3232_v14  ;;  %v6740_v17 = vld [vmem:[%s7917_s0 + $0x25a] sm:$0xff] }
 0x243   :  { %1949 = vrot.lane.b32.xlu1 %v4341_v15, %s4829_s14  ;;  %v4355_v15 = vld [vmem:[%s7917_s0 + $0x262] sm:$0xff] }
 0x244   :  { %v1513_v18 = vpop.permute.xlu0 %1512  ;;  %v1515_v29 = vpop.permute.xlu1 %1514  ;;  %v3233_v30 = vld [vmem:[#allocation2 + $0x20] sm:$0xff]  ;;  %v3234_v0 = vld [vmem:[#allocation2 + $0x28] sm:$0xff] }
 0x245   :  { %1601 = vst.msk [vmem:[#allocation2 + $0x40] sm:$0xff] %vm1592_vm9, %v1513_v18  ;;  %1602 = vst.msk [vmem:[#allocation2 + $0x48] sm:$0xff] %vm1592_vm9, %v1515_v29  ;;  %4715 = vmatprep.mubr.msk.f32.mxu0 %vm3298_vm10, %v3233_v30  ;;  %v4356_v18 = vld [vmem:[%s7917_s0 + $0x272] sm:$0xff] }
 0x246   :  { %1951 = vrot.lane.b32.xlu0 %v6632_v60, %s4829_s14  ;;  %4716 = vmatmul.mubr.msk.f32.gmra.mrb[4].mxu0 %vm3298_vm10, %v3234_v0 }
 0x247   :  { %1953 = vrot.lane.b32.xlu1 %v6637_v42, %s4829_s14 }
 0x248   :  { %v1517_v47 = vpop.permute.xlu0 %1516  ;;  %v1519_v12 = vpop.permute.xlu1 %1518  ;;  %v3235_v58 = vld [vmem:[#allocation2 + $0x30] sm:$0xff]  ;;  %v3236_v16 = vld [vmem:[#allocation2 + $0x38] sm:$0xff] }
 0x249   :  { %1603 = vst.msk [vmem:[#allocation2 + $0x50] sm:$0xff] %vm1592_vm9, %v1517_v47  ;;  %1604 = vst.msk [vmem:[#allocation2 + $0x58] sm:$0xff] %vm1592_vm9, %v1519_v12  ;;  %4718 = vmatprep.mubr.msk.f32.mxu0 %vm3298_vm10, %v3235_v58  ;;  %v4357_v12 = vld [vmem:[%s7917_s0 + $0x27a] sm:$0xff]  ;;  %v4358_v58 = vld [vmem:[%s7917_s0 + $0x28a] sm:$0xff] }
 0x24a   :  { %1955 = vrot.lane.b32.xlu0 %v6650_v46, %s4829_s14  ;;  %4719 = vmatmul.mubr.msk.f32.gmra.mrb[6].mxu0 %vm3298_vm10, %v3236_v16 }
 0x24b   :  { %1957 = vrot.lane.b32.xlu1 %v6655_v62, %s4829_s14 }
 0x24c   :  { %v1521_v6 = vpop.permute.xlu0 %1520  ;;  %v1523_v19 = vpop.permute.xlu1 %1522  ;;  %v3237_v20 = vld [vmem:[#allocation2 + $0x40] sm:$0xff]  ;;  %v3238_v23 = vld [vmem:[#allocation2 + $0x48] sm:$0xff] }
 0x24d   :  { %1605 = vst.msk [vmem:[#allocation2 + $0x60] sm:$0xff] %vm1592_vm9, %v1521_v6  ;;  %1606 = vst.msk [vmem:[#allocation2 + $0x68] sm:$0xff] %vm1592_vm9, %v1523_v19  ;;  %4721 = vmatprep.mubr.msk.f32.mxu0 %vm3298_vm10, %v3237_v20 }
 0x24e   :  { %1959 = vrot.lane.b32.xlu0 %v6668_v5, %s4829_s14  ;;  %4722 = vmatmul.mubr.msk.f32.gmra.mrb[8].mxu0 %vm3298_vm10, %v3238_v23  ;;  %v4359_v23 = vld [vmem:[%s7917_s0 + $0x292] sm:$0xff] }
 0x24f   :  { %1961 = vrot.lane.b32.xlu1 %v6673_v24, %s4829_s14 }
 0x250   :  { %v1525_v27 = vpop.permute.xlu0 %1524  ;;  %v1527_v31 = vpop.permute.xlu1 %1526  ;;  %v3239_v32 = vld [vmem:[#allocation2 + $0x50] sm:$0xff]  ;;  %v3240_v34 = vld [vmem:[#allocation2 + $0x58] sm:$0xff] }
 0x251   :  { %1607 = vst.msk [vmem:[#allocation2 + $0x70] sm:$0xff] %vm1592_vm9, %v1525_v27  ;;  %1608 = vst.msk [vmem:[#allocation2 + $0x78] sm:$0xff] %vm1592_vm9, %v1527_v31  ;;  %4724 = vmatprep.mubr.msk.f32.mxu0 %vm3298_vm10, %v3239_v32  ;;  %v4360_v27 = vld [vmem:[%s7917_s0 + $0x2a2] sm:$0xff] }
 0x252   :  { %1963 = vrot.lane.b32.xlu0 %v6686_v26, %s4829_s14  ;;  %4725 = vmatmul.mubr.msk.f32.gmra.mrb[10].mxu0 %vm3298_vm10, %v3240_v34 }
 0x253   :  { %1965 = vrot.lane.b32.xlu1 %v6691_v35, %s4829_s14 }
 0x254   :  { %v1529_v38 = vpop.permute.xlu0 %1528  ;;  %v1531_v40 = vpop.permute.xlu1 %1530  ;;  %v3241_v41 = vld [vmem:[#allocation2 + $0x60] sm:$0xff]  ;;  %v3242_v45 = vld [vmem:[#allocation2 + $0x68] sm:$0xff] }
 0x255   :  { %1609 = vst.msk [vmem:[#allocation2 + $0x80] sm:$0xff] %vm1592_vm9, %v1529_v38  ;;  %1610 = vst.msk [vmem:[#allocation2 + $0x88] sm:$0xff] %vm1592_vm9, %v1531_v40  ;;  %4727 = vmatprep.mubr.msk.f32.mxu0 %vm3298_vm10, %v3241_v41  ;;  %v4361_v40 = vld [vmem:[%s7917_s0 + $0x2aa] sm:$0xff]  ;;  %v4362_v41 = vld [vmem:[%s7917_s0 + $0x2ba] sm:$0xff] }
 0x256   :  { %1967 = vrot.lane.b32.xlu0 %v6704_v37, %s4829_s14  ;;  %4728 = vmatmul.mubr.msk.f32.gmra.mrb[12].mxu0 %vm3298_vm10, %v3242_v45 }
 0x257   :  { %1969 = vrot.lane.b32.xlu1 %v6709_v48, %s4829_s14 }
 0x258   :  { %v1533_v52 = vpop.permute.xlu0 %1532  ;;  %v1535_v53 = vpop.permute.xlu1 %1534  ;;  %v3243_v56 = vld [vmem:[#allocation2 + $0x70] sm:$0xff]  ;;  %v3244_v57 = vld [vmem:[#allocation2 + $0x78] sm:$0xff] }
 0x259   :  { %1611 = vst.msk [vmem:[#allocation2 + $0x90] sm:$0xff] %vm1592_vm9, %v1533_v52  ;;  %1612 = vst.msk [vmem:[#allocation2 + $0x98] sm:$0xff] %vm1592_vm9, %v1535_v53  ;;  %4730 = vmatprep.mubr.msk.f32.mxu0 %vm3298_vm10, %v3243_v56 }
 0x25a   :  { %1971 = vrot.lane.b32.xlu0 %v6722_v49, %s4829_s14  ;;  %4731 = vmatmul.mubr.msk.f32.gmra.mrb[14].mxu0 %vm3298_vm10, %v3244_v57  ;;  %v4363_v57 = vld [vmem:[%s7917_s0 + $0x2c2] sm:$0xff] }
 0x25b   :  { %1973 = vrot.lane.b32.xlu1 %v6727_v13, %s4829_s14 }
 0x25c   :  { %v1537_v8 = vpop.permute.xlu0 %1536  ;;  %v1539_v9 = vpop.permute.xlu1 %1538  ;;  %v3245_v10 = vld [vmem:[#allocation2 + $0x80] sm:$0xff]  ;;  %v3246_v14 = vld [vmem:[#allocation2 + $0x88] sm:$0xff] }
 0x25d   :  { %1613 = vst.msk [vmem:[#allocation2 + $0xa0] sm:$0xff] %vm1592_vm9, %v1537_v8  ;;  %1614 = vst.msk [vmem:[#allocation2 + $0xa8] sm:$0xff] %vm1592_vm9, %v1539_v9  ;;  %4733 = vmatprep.mubr.msk.f32.mxu0 %vm3298_vm10, %v3245_v10  ;;  %v4364_v8 = vld [vmem:[%s7917_s0 + $0x2d2] sm:$0xff] }
 0x25e   :  { %1975 = vrot.lane.b32.xlu0 %v6740_v17, %s4829_s14  ;;  %4734 = vmatmul.mubr.msk.f32.gmra.mrb[16].mxu0 %vm3298_vm10, %v3246_v14 }
 0x25f   :  { %1977 = vrot.lane.b32.xlu1 %v4355_v15, %s4829_s14 }
 0x260   :  { %v1541_v29 = vpop.permute.xlu0 %1540  ;;  %v1543_v30 = vpop.permute.xlu1 %1542  ;;  %v3247_v0 = vld [vmem:[#allocation2 + $0x90] sm:$0xff]  ;;  %v3248_v47 = vld [vmem:[#allocation2 + $0x98] sm:$0xff] }
 0x261   :  { %1615 = vst.msk [vmem:[#allocation2 + $0xb0] sm:$0xff] %vm1592_vm9, %v1541_v29  ;;  %1616 = vst.msk [vmem:[#allocation2 + $0xb8] sm:$0xff] %vm1592_vm9, %v1543_v30  ;;  %4736 = vmatprep.mubr.msk.f32.mxu0 %vm3298_vm10, %v3247_v0  ;;  %v4366_v29 = vld [vmem:[%s7917_s0 + $0x2ea] sm:$0xff] }
 0x262   :  { %1979 = vrot.lane.b32.xlu0 %v4356_v18, %s4829_s14  ;;  %4737 = vmatmul.mubr.msk.f32.gmra.mrb[18].mxu0 %vm3298_vm10, %v3248_v47  ;;  %v4365_v18 = vld [vmem:[%s7917_s0 + $0x2da] sm:$0xff] }
 0x263   :  { %1981 = vrot.lane.b32.xlu1 %v4357_v12, %s4829_s14 }
 0x264   :  { %v1545_v16 = vpop.permute.xlu0 %1544  ;;  %v1547_v6 = vpop.permute.xlu1 %1546  ;;  %v3249_v19 = vld [vmem:[#allocation2 + $0xa0] sm:$0xff]  ;;  %v3250_v20 = vld [vmem:[#allocation2 + $0xa8] sm:$0xff] }
 0x265   :  { %1617 = vst.msk [vmem:[#allocation2 + $0xc0] sm:$0xff] %vm1592_vm9, %v1545_v16  ;;  %1618 = vst.msk [vmem:[#allocation2 + $0xc8] sm:$0xff] %vm1592_vm9, %v1547_v6  ;;  %4739 = vmatprep.mubr.msk.f32.mxu0 %vm3298_vm10, %v3249_v19  ;;  %v4368_v16 = vld [vmem:[%s7917_s0 + $0x302] sm:$0xff] }
 0x266   :  { %1983 = vrot.lane.b32.xlu0 %v4358_v58, %s4829_s14  ;;  %4740 = vmatmul.mubr.msk.f32.gmra.mrb[20].mxu0 %vm3298_vm10, %v3250_v20  ;;  %v4367_v58 = vld [vmem:[%s7917_s0 + $0x2f2] sm:$0xff] }
 0x267   :  { %1985 = vrot.lane.b32.xlu1 %v4359_v23, %s4829_s14 }
 0x268   :  { %v1549_v31 = vpop.permute.xlu0 %1548  ;;  %v1551_v32 = vpop.permute.xlu1 %1550  ;;  %v3251_v34 = vld [vmem:[#allocation2 + $0xb0] sm:$0xff]  ;;  %v3252_v38 = vld [vmem:[#allocation2 + $0xb8] sm:$0xff] }
 0x269   :  { %1619 = vst.msk [vmem:[#allocation2 + $0xd0] sm:$0xff] %vm1592_vm9, %v1549_v31  ;;  %1620 = vst.msk [vmem:[#allocation2 + $0xd8] sm:$0xff] %vm1592_vm9, %v1551_v32  ;;  %4742 = vmatprep.mubr.msk.f32.mxu0 %vm3298_vm10, %v3251_v34  ;;  %v4370_v31 = vld [vmem:[%s7917_s0 + $0x31a] sm:$0xff] }
 0x26a   :  { %1987 = vrot.lane.b32.xlu0 %v4360_v27, %s4829_s14  ;;  %4743 = vmatmul.mubr.msk.f32.gmra.mrb[22].mxu0 %vm3298_vm10, %v3252_v38  ;;  %v4369_v27 = vld [vmem:[%s7917_s0 + $0x30a] sm:$0xff]  ;;  %v4371_v38 = vld [vmem:[%s7917_s0 + $0x322] sm:$0xff] }
 0x26b   :  { %1989 = vrot.lane.b32.xlu1 %v4361_v40, %s4829_s14 }
 0x26c   :  { %v1553_v45 = vpop.permute.xlu0 %1552  ;;  %v1555_v52 = vpop.permute.xlu1 %1554  ;;  %v3253_v53 = vld [vmem:[#allocation2 + $0xc0] sm:$0xff]  ;;  %v3254_v56 = vld [vmem:[#allocation2 + $0xc8] sm:$0xff] }
 0x26d   :  { %1621 = vst.msk [vmem:[#allocation2 + $0xe0] sm:$0xff] %vm1592_vm9, %v1553_v45  ;;  %1622 = vst.msk [vmem:[#allocation2 + $0xe8] sm:$0xff] %vm1592_vm9, %v1555_v52  ;;  %4745 = vmatprep.mubr.msk.f32.mxu0 %vm3298_vm10, %v3253_v53 }
 0x26e   :  { %1991 = vrot.lane.b32.xlu0 %v4362_v41, %s4829_s14  ;;  %4746 = vmatmul.mubr.msk.f32.gmra.mrb[24].mxu0 %vm3298_vm10, %v3254_v56 }
 0x26f   :  { %1993 = vrot.lane.b32.xlu1 %v4363_v57, %s4829_s14 }
 0x270   :  { %v1557_v9 = vpop.permute.xlu0 %1556  ;;  %v1559_v10 = vpop.permute.xlu1 %1558  ;;  %v3255_v14 = vld [vmem:[#allocation2 + $0xd0] sm:$0xff]  ;;  %v3256_v15 = vld [vmem:[#allocation2 + $0xd8] sm:$0xff] }
 0x271   :  { %1623 = vst.msk [vmem:[#allocation2 + $0xf0] sm:$0xff] %vm1592_vm9, %v1557_v9  ;;  %1624 = vst.msk [vmem:[#allocation2 + $0xf8] sm:$0xff] %vm1592_vm9, %v1559_v10  ;;  %4748 = vmatprep.mubr.msk.f32.mxu0 %vm3298_vm10, %v3255_v14 }
 0x272   :  { %1995 = vrot.lane.b32.xlu0 %v4364_v8, %s4829_s14  ;;  %4749 = vmatmul.mubr.msk.f32.gmra.mrb[26].mxu0 %vm3298_vm10, %v3256_v15 }
 0x273   :  { %1997 = vrot.lane.b32.xlu1 %v4365_v18, %s4829_s14 }
 0x274   :  { %v1756_v30 = vpop.permute.xlu0 %1755  ;;  %v1758_v0 = vpop.permute.xlu1 %1757  ;;  %v3257_v47 = vld [vmem:[#allocation2 + $0xe0] sm:$0xff]  ;;  %v3258_v12 = vld [vmem:[#allocation2 + $0xe8] sm:$0xff] }
 0x275   :  { %1851 = vst.msk [vmem:[#allocation2 + $0x100] sm:$0xff] %vm239_vm1, %v1756_v30  ;;  %1852 = vst.msk [vmem:[#allocation2 + $0x108] sm:$0xff] %vm239_vm1, %v1758_v0  ;;  %4751 = vmatprep.mubr.msk.f32.mxu0 %vm3298_vm10, %v3257_v47 }
 0x276   :  { %1999 = vrot.lane.b32.xlu0 %v4366_v29, %s4829_s14  ;;  %4752 = vmatmul.mubr.msk.f32.gmra.mrb[28].mxu0 %vm3298_vm10, %v3258_v12 }
 0x277   :  { %2001 = vrot.lane.b32.xlu1 %v4367_v58, %s4829_s14 }
 0x278   :  { %v1760_v6 = vpop.permute.xlu0 %1759  ;;  %v1762_v19 = vpop.permute.xlu1 %1761  ;;  %v3259_v20 = vld [vmem:[#allocation2 + $0xf0] sm:$0xff]  ;;  %v3260_v23 = vld [vmem:[#allocation2 + $0xf8] sm:$0xff] }
 0x279   :  { %1853 = vst.msk [vmem:[#allocation2 + $0x110] sm:$0xff] %vm239_vm1, %v1760_v6  ;;  %1854 = vst.msk [vmem:[#allocation2 + $0x118] sm:$0xff] %vm239_vm1, %v1762_v19  ;;  %4754 = vmatprep.mubr.msk.f32.mxu0 %vm3298_vm10, %v3259_v20 }
 0x27a   :  { %2003 = vrot.lane.b32.xlu0 %v4368_v16, %s4829_s14  ;;  %4755 = vmatmul.mubr.msk.f32.gmra.mrb[30].mxu0 %vm3298_vm10, %v3260_v23 }
 0x27b   :  { %2005 = vrot.lane.b32.xlu1 %v4369_v27, %s4829_s14 }
 0x27c   :  { %v1764_v32 = vpop.permute.xlu0 %1763  ;;  %v1766_v34 = vpop.permute.xlu1 %1765 }
 0x27d   :  { %1855 = vst.msk [vmem:[#allocation2 + $0x120] sm:$0xff] %vm239_vm1, %v1764_v32  ;;  %1856 = vst.msk [vmem:[#allocation2 + $0x128] sm:$0xff] %vm239_vm1, %v1766_v34 }
 0x27e   :  { %2007 = vrot.lane.b32.xlu0 %v4370_v31, %s4829_s14 }
 0x27f   :  { %2009 = vrot.lane.b32.xlu1 %v4371_v38, %s4829_s14 }
 0x280   :  { %v1768_v40 = vpop.permute.xlu0 %1767  ;;  %v1770_v41 = vpop.permute.xlu1 %1769 }
 0x281   :  { %1857 = vst.msk [vmem:[#allocation2 + $0x130] sm:$0xff] %vm239_vm1, %v1768_v40  ;;  %1858 = vst.msk [vmem:[#allocation2 + $0x138] sm:$0xff] %vm239_vm1, %v1770_v41 }
 0x282   :  { %2140 = vrot.lane.b32.xlu0 %v6256_v11, %s4830_s26 }
 0x283   :  { %2142 = vrot.lane.b32.xlu1 %v6263_v61, %s4830_s26 }
 0x284   :  { %v1772_v45 = vpop.permute.xlu0 %1771  ;;  %v1774_v52 = vpop.permute.xlu1 %1773 }
 0x285   :  { %1859 = vst.msk [vmem:[#allocation2 + $0x140] sm:$0xff] %vm239_vm1, %v1772_v45  ;;  %1860 = vst.msk [vmem:[#allocation2 + $0x148] sm:$0xff] %vm239_vm1, %v1774_v52 }
 0x286   :  { %2144 = vrot.lane.b32.xlu0 %v6282_v21, %s4830_s26 }
 0x287   :  { %2146 = vrot.lane.b32.xlu1 %v6289_v63, %s4830_s26 }
 0x288   :  { %v1776_v53 = vpop.permute.xlu0 %1775  ;;  %v1778_v56 = vpop.permute.xlu1 %1777 }
 0x289   :  { %1861 = vst.msk [vmem:[#allocation2 + $0x150] sm:$0xff] %vm239_vm1, %v1776_v53  ;;  %1862 = vst.msk [vmem:[#allocation2 + $0x158] sm:$0xff] %vm239_vm1, %v1778_v56 }
 0x28a   :  { %2148 = vrot.lane.b32.xlu0 %v6306_v43, %s4830_s26 }
 0x28b   :  { %2150 = vrot.lane.b32.xlu1 %v6313_v50, %s4830_s26 }
 0x28c   :  { %v1780_v11 = vpop.permute.xlu0 %1779  ;;  %v1782_v61 = vpop.permute.xlu1 %1781 }
 0x28d   :  { %1863 = vst.msk [vmem:[#allocation2 + $0x160] sm:$0xff] %vm239_vm1, %v1780_v11  ;;  %1864 = vst.msk [vmem:[#allocation2 + $0x168] sm:$0xff] %vm239_vm1, %v1782_v61 }
 0x28e   :  { %2152 = vrot.lane.b32.xlu0 %v6334_v55, %s4830_s26 }
 0x28f   :  { %2154 = vrot.lane.b32.xlu1 %v6341_v59, %s4830_s26 }
 0x290   :  { %v1784_v57 = vpop.permute.xlu0 %1783  ;;  %v1786_v8 = vpop.permute.xlu1 %1785 }
 0x291   :  { %1865 = vst.msk [vmem:[#allocation2 + $0x170] sm:$0xff] %vm239_vm1, %v1784_v57  ;;  %1866 = vst.msk [vmem:[#allocation2 + $0x178] sm:$0xff] %vm239_vm1, %v1786_v8 }
 0x292   :  { %2156 = vrot.lane.b32.xlu0 %v6364_v3, %s4830_s26 }
 0x293   :  { %2158 = vrot.lane.b32.xlu1 %v6371_v4, %s4830_s26 }
 0x294   :  { %v1788_v9 = vpop.permute.xlu0 %1787  ;;  %v1790_v10 = vpop.permute.xlu1 %1789 }
 0x295   :  { %1867 = vst.msk [vmem:[#allocation2 + $0x180] sm:$0xff] %vm239_vm1, %v1788_v9  ;;  %1868 = vst.msk [vmem:[#allocation2 + $0x188] sm:$0xff] %vm239_vm1, %v1790_v10 }
 0x296   :  { %2160 = vrot.lane.b32.xlu0 %v6390_v7, %s4830_s26 }
 0x297   :  { %2162 = vrot.lane.b32.xlu1 %v6397_v22, %s4830_s26 }
 0x298   :  { %v1792_v14 = vpop.permute.xlu0 %1791  ;;  %v1794_v15 = vpop.permute.xlu1 %1793 }
 0x299   :  { %1869 = vst.msk [vmem:[#allocation2 + $0x190] sm:$0xff] %vm239_vm1, %v1792_v14  ;;  %1870 = vst.msk [vmem:[#allocation2 + $0x198] sm:$0xff] %vm239_vm1, %v1794_v15 }
 0x29a   :  { %2164 = vrot.lane.b32.xlu0 %v6414_v25, %s4830_s26 }
 0x29b   :  { %2166 = vrot.lane.b32.xlu1 %v6421_v28, %s4830_s26 }
 0x29c   :  { %v1796_v18 = vpop.permute.xlu0 %1795  ;;  %v1798_v29 = vpop.permute.xlu1 %1797 }
 0x29d   :  { %1871 = vst.msk [vmem:[#allocation2 + $0x1a0] sm:$0xff] %vm239_vm1, %v1796_v18  ;;  %1872 = vst.msk [vmem:[#allocation2 + $0x1a8] sm:$0xff] %vm239_vm1, %v1798_v29 }
 0x29e   :  { %2168 = vrot.lane.b32.xlu0 %v6438_v33, %s4830_s26 }
 0x29f   :  { %2170 = vrot.lane.b32.xlu1 %v6445_v36, %s4830_s26 }
 0x2a0   :  { %v1800_v30 = vpop.permute.xlu0 %1799  ;;  %v1802_v0 = vpop.permute.xlu1 %1801 }
 0x2a1   :  { %1873 = vst.msk [vmem:[#allocation2 + $0x1b0] sm:$0xff] %vm239_vm1, %v1800_v30  ;;  %1874 = vst.msk [vmem:[#allocation2 + $0x1b8] sm:$0xff] %vm239_vm1, %v1802_v0 }
 0x2a2   :  { %2172 = vrot.lane.b32.xlu0 %v6462_v39, %s4830_s26 }
 0x2a3   :  { %2174 = vrot.lane.b32.xlu1 %v6469_v44, %s4830_s26 }
 0x2a4   :  { %v1804_v47 = vpop.permute.xlu0 %1803  ;;  %v1806_v12 = vpop.permute.xlu1 %1805 }
 0x2a5   :  { %1875 = vst.msk [vmem:[#allocation2 + $0x1c0] sm:$0xff] %vm239_vm1, %v1804_v47  ;;  %1876 = vst.msk [vmem:[#allocation2 + $0x1c8] sm:$0xff] %vm239_vm1, %v1806_v12 }
 0x2a6   :  { %2332 = vrot.lane.b32.xlu0 %v6324_v51, %s4831_s4 }
 0x2a7   :  { %2334 = vrot.lane.b32.xlu1 %v6329_v54, %s4831_s4 }
 0x2a8   :  { %v1808_v58 = vpop.permute.xlu0 %1807  ;;  %v1810_v16 = vpop.permute.xlu1 %1809 }
 0x2a9   :  { %1877 = vst.msk [vmem:[#allocation2 + $0x1d0] sm:$0xff] %vm239_vm1, %v1808_v58  ;;  %1878 = vst.msk [vmem:[#allocation2 + $0x1d8] sm:$0xff] %vm239_vm1, %v1810_v16 }
 0x2aa   :  { %2524 = vrot.lane.b32.xlu0 %v6632_v60, %s4832_s9 }
 0x2ab   :  { %2526 = vrot.lane.b32.xlu1 %v6637_v42, %s4832_s9 }
 0x2ac   :  { %v1812_v6 = vpop.permute.xlu0 %1811  ;;  %v1814_v19 = vpop.permute.xlu1 %1813 }
 0x2ad   :  { %1879 = vst.msk [vmem:[#allocation2 + $0x1e0] sm:$0xff] %vm239_vm1, %v1812_v6  ;;  %1880 = vst.msk [vmem:[#allocation2 + $0x1e8] sm:$0xff] %vm239_vm1, %v1814_v19 }
 0x2ae   :  { %2717 = vrot.lane.b32.xlu0 %v6282_v21, %s4833_s15 }
 0x2af   :  { %2719 = vrot.lane.b32.xlu1 %v6289_v63, %s4833_s15 }
 0x2b0   :  { %v1816_v51 = vpop.permute.xlu0 %1815 }
 0x2b1   :  { %1881 = vst.msk [vmem:[#allocation2 + $0x1f0] sm:$0xff] %vm239_vm1, %v1816_v51  ;;  %v1818_v54 = vpop.permute.xlu1 %1817 }
 0x2b2   :  { %1882 = vst.msk [vmem:[#allocation2 + $0x1f8] sm:$0xff] %vm239_vm1, %v1818_v54  ;;  %2909 = vrot.lane.b32.xlu0 %v6354_v2, %s4834_s25  ;;  %v7073_v54 = vld [vmem:[%s7919_s2] ss:$0 sm:$0xff] }
 0x2b3   :  { %2336 = vrot.lane.b32.xlu1 %v6354_v2, %s4831_s4 }
 0x2b4   :  { %v1948_v60 = vpop.permute.xlu0 %1947 }
 0x2b5   :  { %2043 = vst.msk [vmem:[#allocation2 + $0x100] sm:$0xff] %vm432_vm2, %v1948_v60  ;;  %v1950_v42 = vpop.permute.xlu1 %1949 }
 0x2b6   :  { %2044 = vst.msk [vmem:[#allocation2 + $0x108] sm:$0xff] %vm432_vm2, %v1950_v42  ;;  %2911 = vrot.lane.b32.xlu0 %v6359_v1, %s4834_s25 }
 0x2b7   :  { %3101 = vrot.lane.b32.xlu1 %v6650_v46, %s4835_s11 }
 0x2b8   :  { %v1952_v21 = vpop.permute.xlu0 %1951 }
 0x2b9   :  { %2045 = vst.msk [vmem:[#allocation2 + $0x110] sm:$0xff] %vm432_vm2, %v1952_v21  ;;  %v1954_v63 = vpop.permute.xlu1 %1953 }
 0x2ba   :  { %2046 = vst.msk [vmem:[#allocation2 + $0x118] sm:$0xff] %vm432_vm2, %v1954_v63  ;;  %2338 = vrot.lane.b32.xlu0 %v6359_v1, %s4831_s4  ;;  %v4502_v1 = vld [vmem:[%s7917_s0 + $0x1f9] sm:$0xff] }
 0x2bb   :  { %2528 = vrot.lane.b32.xlu1 %v6650_v46, %s4832_s9 }
 0x2bc   :  { %v1956_v2 = vpop.permute.xlu0 %1955 }
 0x2bd   :  { %2047 = vst.msk [vmem:[#allocation2 + $0x120] sm:$0xff] %vm432_vm2, %v1956_v2  ;;  %v1958_v20 = vpop.permute.xlu1 %1957  ;;  %v4510_v2 = vld [vmem:[%s7917_s0 + $0x259] sm:$0xff] }
 0x2be   :  { %2048 = vst.msk [vmem:[#allocation2 + $0x128] sm:$0xff] %vm432_vm2, %v1958_v20  ;;  %3103 = vrot.lane.b32.xlu0 %v6655_v62, %s4835_s11 }
 0x2bf   :  { %2530 = vrot.lane.b32.xlu1 %v6655_v62, %s4832_s9 }
 0x2c0   :  { %v1960_v23 = vpop.permute.xlu0 %1959 }
 0x2c1   :  { %2049 = vst.msk [vmem:[#allocation2 + $0x130] sm:$0xff] %vm432_vm2, %v1960_v23  ;;  %v1962_v27 = vpop.permute.xlu1 %1961 }
 0x2c2   :  { %2050 = vst.msk [vmem:[#allocation2 + $0x138] sm:$0xff] %vm432_vm2, %v1962_v27  ;;  %2721 = vrot.lane.b32.xlu0 %v6306_v43, %s4833_s15  ;;  %v4503_v43 = vld [vmem:[%s7917_s0 + $0x201] sm:$0xff] }
 0x2c3   :  { %2723 = vrot.lane.b32.xlu1 %v6313_v50, %s4833_s15 }
 0x2c4   :  { %v1964_v46 = vpop.permute.xlu0 %1963 }
 0x2c5   :  { %2051 = vst.msk [vmem:[#allocation2 + $0x140] sm:$0xff] %vm432_vm2, %v1964_v46  ;;  %v1966_v62 = vpop.permute.xlu1 %1965 }
 0x2c6   :  { %2052 = vst.msk [vmem:[#allocation2 + $0x148] sm:$0xff] %vm432_vm2, %v1966_v62  ;;  %2913 = vrot.lane.b32.xlu0 %v4502_v1, %s4834_s25 }
 0x2c7   :  { %2340 = vrot.lane.b32.xlu1 %v4502_v1, %s4831_s4 }
 0x2c8   :  { %v1968_v31 = vpop.permute.xlu0 %1967 }
 0x2c9   :  { %2053 = vst.msk [vmem:[#allocation2 + $0x150] sm:$0xff] %vm432_vm2, %v1968_v31  ;;  %v1970_v50 = vpop.permute.xlu1 %1969 }
 0x2ca   :  { %2054 = vst.msk [vmem:[#allocation2 + $0x158] sm:$0xff] %vm432_vm2, %v1970_v50  ;;  %2915 = vrot.lane.b32.xlu0 %v4503_v43, %s4834_s25 }
 0x2cb   :  { %3105 = vrot.lane.b32.xlu1 %v6668_v5, %s4835_s11 }
 0x2cc   :  { %v1972_v32 = vpop.permute.xlu0 %1971 }
 0x2cd   :  { %2055 = vst.msk [vmem:[#allocation2 + $0x160] sm:$0xff] %vm432_vm2, %v1972_v32  ;;  %v1974_v34 = vpop.permute.xlu1 %1973 }
 0x2ce   :  { %2056 = vst.msk [vmem:[#allocation2 + $0x168] sm:$0xff] %vm432_vm2, %v1974_v34  ;;  %2342 = vrot.lane.b32.xlu0 %v4503_v43, %s4831_s4  ;;  %v4511_v43 = vld [vmem:[%s7917_s0 + $0x261] sm:$0xff] }
 0x2cf   :  { %2532 = vrot.lane.b32.xlu1 %v6668_v5, %s4832_s9  ;;  %v4504_v5 = vld [vmem:[%s7917_s0 + $0x211] sm:$0xff] }
 0x2d0   :  { %v1976_v38 = vpop.permute.xlu0 %1975 }
 0x2d1   :  { %2057 = vst.msk [vmem:[#allocation2 + $0x170] sm:$0xff] %vm432_vm2, %v1976_v38  ;;  %v1978_v40 = vpop.permute.xlu1 %1977 }
 0x2d2   :  { %2058 = vst.msk [vmem:[#allocation2 + $0x178] sm:$0xff] %vm432_vm2, %v1978_v40  ;;  %3107 = vrot.lane.b32.xlu0 %v6673_v24, %s4835_s11 }
 0x2d3   :  { %2534 = vrot.lane.b32.xlu1 %v6673_v24, %s4832_s9 }
 0x2d4   :  { %v1980_v41 = vpop.permute.xlu0 %1979 }
 0x2d5   :  { %2059 = vst.msk [vmem:[#allocation2 + $0x180] sm:$0xff] %vm432_vm2, %v1980_v41  ;;  %v1982_v45 = vpop.permute.xlu1 %1981 }
 0x2d6   :  { %2060 = vst.msk [vmem:[#allocation2 + $0x188] sm:$0xff] %vm432_vm2, %v1982_v45  ;;  %2725 = vrot.lane.b32.xlu0 %v6334_v55, %s4833_s15  ;;  %v4505_v55 = vld [vmem:[%s7917_s0 + $0x219] sm:$0xff] }
 0x2d7   :  { %2727 = vrot.lane.b32.xlu1 %v6341_v59, %s4833_s15 }
 0x2d8   :  { %v1984_v52 = vpop.permute.xlu0 %1983 }
 0x2d9   :  { %2061 = vst.msk [vmem:[#allocation2 + $0x190] sm:$0xff] %vm432_vm2, %v1984_v52  ;;  %v1986_v24 = vpop.permute.xlu1 %1985 }
 0x2da   :  { %2062 = vst.msk [vmem:[#allocation2 + $0x198] sm:$0xff] %vm432_vm2, %v1986_v24  ;;  %2917 = vrot.lane.b32.xlu0 %v4504_v5, %s4834_s25  ;;  %v4448_v24 = vld [vmem:[%s7917_s0 + $0x25a] sm:$0xff] }
 0x2db   :  { %2344 = vrot.lane.b32.xlu1 %v4504_v5, %s4831_s4 }
 0x2dc   :  { %v1988_v53 = vpop.permute.xlu0 %1987 }
 0x2dd   :  { %2063 = vst.msk [vmem:[#allocation2 + $0x1a0] sm:$0xff] %vm432_vm2, %v1988_v53  ;;  %v1990_v59 = vpop.permute.xlu1 %1989 }
 0x2de   :  { %2064 = vst.msk [vmem:[#allocation2 + $0x1a8] sm:$0xff] %vm432_vm2, %v1990_v59  ;;  %2919 = vrot.lane.b32.xlu0 %v4505_v55, %s4834_s25 }
 0x2df   :  { %3109 = vrot.lane.b32.xlu1 %v6686_v26, %s4835_s11 }
 0x2e0   :  { %v1992_v56 = vpop.permute.xlu0 %1991 }
 0x2e1   :  { %2065 = vst.msk [vmem:[#allocation2 + $0x1b0] sm:$0xff] %vm432_vm2, %v1992_v56  ;;  %v1994_v11 = vpop.permute.xlu1 %1993 }
 0x2e2   :  { %2066 = vst.msk [vmem:[#allocation2 + $0x1b8] sm:$0xff] %vm432_vm2, %v1994_v11  ;;  %2346 = vrot.lane.b32.xlu0 %v4505_v55, %s4831_s4 }
 0x2e3   :  { %2536 = vrot.lane.b32.xlu1 %v6686_v26, %s4832_s9  ;;  %v4506_v26 = vld [vmem:[%s7917_s0 + $0x229] sm:$0xff] }
 0x2e4   :  { %v1996_v61 = vpop.permute.xlu0 %1995 }
 0x2e5   :  { %2067 = vst.msk [vmem:[#allocation2 + $0x1c0] sm:$0xff] %vm432_vm2, %v1996_v61  ;;  %v1998_v57 = vpop.permute.xlu1 %1997  ;;  %v4543_v61 = vld [vmem:[%s7917_s0 + $0x262] sm:$0xff] }
 0x2e6   :  { %2068 = vst.msk [vmem:[#allocation2 + $0x1c8] sm:$0xff] %vm432_vm2, %v1998_v57  ;;  %3111 = vrot.lane.b32.xlu0 %v6691_v35, %s4835_s11 }
 0x2e7   :  { %2538 = vrot.lane.b32.xlu1 %v6691_v35, %s4832_s9 }
 0x2e8   :  { %v2000_v8 = vpop.permute.xlu0 %1999 }
 0x2e9   :  { %2069 = vst.msk [vmem:[#allocation2 + $0x1d0] sm:$0xff] %vm432_vm2, %v2000_v8  ;;  %v2002_v9 = vpop.permute.xlu1 %2001 }
 0x2ea   :  { %2070 = vst.msk [vmem:[#allocation2 + $0x1d8] sm:$0xff] %vm432_vm2, %v2002_v9  ;;  %2729 = vrot.lane.b32.xlu0 %v6364_v3, %s4833_s15  ;;  %v4507_v3 = vld [vmem:[%s7917_s0 + $0x231] sm:$0xff] }
 0x2eb   :  { %2731 = vrot.lane.b32.xlu1 %v6371_v4, %s4833_s15 }
 0x2ec   :  { %v2004_v10 = vpop.permute.xlu0 %2003 }
 0x2ed   :  { %2071 = vst.msk [vmem:[#allocation2 + $0x1e0] sm:$0xff] %vm432_vm2, %v2004_v10  ;;  %v2006_v35 = vpop.permute.xlu1 %2005 }
 0x2ee   :  { %2072 = vst.msk [vmem:[#allocation2 + $0x1e8] sm:$0xff] %vm432_vm2, %v2006_v35  ;;  %2921 = vrot.lane.b32.xlu0 %v4506_v26, %s4834_s25 }
 0x2ef   :  { %2348 = vrot.lane.b32.xlu1 %v4506_v26, %s4831_s4 }
 0x2f0   :  { %v2008_v14 = vpop.permute.xlu0 %2007 }
 0x2f1   :  { %2073 = vst.msk [vmem:[#allocation2 + $0x1f0] sm:$0xff] %vm432_vm2, %v2008_v14  ;;  %v2010_v4 = vpop.permute.xlu1 %2009 }
 0x2f2   :  { %2074 = vst.msk [vmem:[#allocation2 + $0x1f8] sm:$0xff] %vm432_vm2, %v2010_v4  ;;  %2923 = vrot.lane.b32.xlu0 %v4507_v3, %s4834_s25 }
 0x2f3   :  { %3113 = vrot.lane.b32.xlu1 %v6704_v37, %s4835_s11 }
 0x2f4   :  { %v2141_v15 = vpop.permute.xlu0 %2140 }
 0x2f5   :  { %2236 = vst.msk [vmem:[#allocation2 + $0x100] sm:$0xff] %vm626_vm3, %v2141_v15  ;;  %v2143_v18 = vpop.permute.xlu1 %2142 }
 0x2f6   :  { %2237 = vst.msk [vmem:[#allocation2 + $0x108] sm:$0xff] %vm626_vm3, %v2143_v18  ;;  %2350 = vrot.lane.b32.xlu0 %v4507_v3, %s4831_s4 }
 0x2f7   :  { %2540 = vrot.lane.b32.xlu1 %v6704_v37, %s4832_s9  ;;  %v4508_v37 = vld [vmem:[%s7917_s0 + $0x241] sm:$0xff] }
 0x2f8   :  { %v2145_v29 = vpop.permute.xlu0 %2144 }
 0x2f9   :  { %2238 = vst.msk [vmem:[#allocation2 + $0x110] sm:$0xff] %vm626_vm3, %v2145_v29  ;;  %v2147_v30 = vpop.permute.xlu1 %2146 }
 0x2fa   :  { %2239 = vst.msk [vmem:[#allocation2 + $0x118] sm:$0xff] %vm626_vm3, %v2147_v30  ;;  %3115 = vrot.lane.b32.xlu0 %v6709_v48, %s4835_s11 }
 0x2fb   :  { %2542 = vrot.lane.b32.xlu1 %v6709_v48, %s4832_s9 }
 0x2fc   :  { %v2149_v0 = vpop.permute.xlu0 %2148 }
 0x2fd   :  { %2240 = vst.msk [vmem:[#allocation2 + $0x120] sm:$0xff] %vm626_vm3, %v2149_v0  ;;  %v2151_v47 = vpop.permute.xlu1 %2150 }
 0x2fe   :  { %2241 = vst.msk [vmem:[#allocation2 + $0x128] sm:$0xff] %vm626_vm3, %v2151_v47  ;;  %2733 = vrot.lane.b32.xlu0 %v6390_v7, %s4833_s15  ;;  %v4509_v7 = vld [vmem:[%s7917_s0 + $0x249] sm:$0xff] }
 0x2ff   :  { %2735 = vrot.lane.b32.xlu1 %v6397_v22, %s4833_s15 }
 0x300   :  { %v2153_v12 = vpop.permute.xlu0 %2152 }
 0x301   :  { %2242 = vst.msk [vmem:[#allocation2 + $0x130] sm:$0xff] %vm626_vm3, %v2153_v12  ;;  %v2155_v48 = vpop.permute.xlu1 %2154  ;;  %v4512_v12 = vld [vmem:[%s7917_s0 + $0x271] sm:$0xff] }
 0x302   :  { %2243 = vst.msk [vmem:[#allocation2 + $0x138] sm:$0xff] %vm626_vm3, %v2155_v48  ;;  %2925 = vrot.lane.b32.xlu0 %v4508_v37, %s4834_s25 }
 0x303   :  { %2352 = vrot.lane.b32.xlu1 %v4508_v37, %s4831_s4 }
 0x304   :  { %v2157_v58 = vpop.permute.xlu0 %2156 }
 0x305   :  { %2244 = vst.msk [vmem:[#allocation2 + $0x140] sm:$0xff] %vm626_vm3, %v2157_v58  ;;  %v2159_v22 = vpop.permute.xlu1 %2158 }
 0x306   :  { %2245 = vst.msk [vmem:[#allocation2 + $0x148] sm:$0xff] %vm626_vm3, %v2159_v22  ;;  %2927 = vrot.lane.b32.xlu0 %v4509_v7, %s4834_s25 }
 0x307   :  { %3117 = vrot.lane.b32.xlu1 %v6722_v49, %s4835_s11 }
 0x308   :  { %v2161_v16 = vpop.permute.xlu0 %2160 }
 0x309   :  { %2246 = vst.msk [vmem:[#allocation2 + $0x150] sm:$0xff] %vm626_vm3, %v2161_v16  ;;  %v2163_v6 = vpop.permute.xlu1 %2162 }
 0x30a   :  { %2247 = vst.msk [vmem:[#allocation2 + $0x158] sm:$0xff] %vm626_vm3, %v2163_v6  ;;  %2354 = vrot.lane.b32.xlu0 %v4509_v7, %s4831_s4 }
 0x30b   :  { %2544 = vrot.lane.b32.xlu1 %v6722_v49, %s4832_s9 }
 0x30c   :  { %v2165_v19 = vpop.permute.xlu0 %2164 }
 0x30d   :  { %2248 = vst.msk [vmem:[#allocation2 + $0x160] sm:$0xff] %vm626_vm3, %v2165_v19  ;;  %v2167_v51 = vpop.permute.xlu1 %2166  ;;  %v4513_v19 = vld [vmem:[%s7917_s0 + $0x279] sm:$0xff] }
 0x30e   :  { %2249 = vst.msk [vmem:[#allocation2 + $0x168] sm:$0xff] %vm626_vm3, %v2167_v51  ;;  %3119 = vrot.lane.b32.xlu0 %v6727_v13, %s4835_s11 }
 0x30f   :  { %2546 = vrot.lane.b32.xlu1 %v6727_v13, %s4832_s9 }
 0x310   :  { %v2169_v60 = vpop.permute.xlu0 %2168 }
 0x311   :  { %2250 = vst.msk [vmem:[#allocation2 + $0x170] sm:$0xff] %vm626_vm3, %v2169_v60  ;;  %v2171_v49 = vpop.permute.xlu1 %2170  ;;  %v4711_v42 = vpop.f32.mrb[0].mxu0 }
 0x312   :  { %2251 = vst.msk [vmem:[#allocation2 + $0x178] sm:$0xff] %vm626_vm3, %v2171_v49  ;;  %v3888_v21 = vadd.f32 %v4711_v42, %v7073_v54  ;;  %2737 = vrot.lane.b32.xlu0 %v6414_v25, %s4833_s15  ;;  %v3561_v63 = vpop.f32.mrb[1].mxu0  ;;  %v4544_v49 = vld [vmem:[%s7917_s0 + $0x272] sm:$0xff] }
 0x313   :  { %v3887_v13 = vadd.f32 %v7073_v54, %v3561_v63  ;;  %2739 = vrot.lane.b32.xlu1 %v6421_v28, %s4833_s15 }
 0x314   :  { %v3952_v20 = vmax.f32 %v3888_v21, 0.0  ;;  %v2173_v23 = vpop.permute.xlu0 %2172 }
 0x315   :  { %v3951_v27 = vmax.f32 %v3887_v13, 0.0  ;;  %2252 = vst.msk [vmem:[#allocation2 + $0x180] sm:$0xff] %vm626_vm3, %v2173_v23  ;;  %v2175_v1 = vpop.permute.xlu1 %2174  ;;  %v4714_v46 = vpop.f32.mrb[2].mxu0 }
 0x316   :  { %4017 = vst.msk [vmem:[%s7920_s3 + $0x8] sm:$0xff] %vm4015_vm11, %v3952_v20  ;;  %v3890_v25 = vadd.f32 %v4714_v46, %v7073_v54  ;;  %2929 = vrot.lane.b32.xlu0 %v4510_v2, %s4834_s25  ;;  %v3571_v28 = vpop.f32.mrb[3].mxu0 }
 0x317   :  { %2253 = vst.msk [vmem:[#allocation2 + $0x188] sm:$0xff] %vm626_vm3, %v2175_v1  ;;  %v3889_v62 = vadd.f32 %v7073_v54, %v3571_v28  ;;  %2356 = vrot.lane.b32.xlu1 %v4510_v2, %s4831_s4 }
 0x318   :  { %4016 = vst.msk [vmem:[%s7920_s3] sm:$0xff] %vm4015_vm11, %v3951_v27  ;;  %v3954_v31 = vmax.f32 %v3890_v25, 0.0  ;;  %v2333_v50 = vpop.permute.xlu0 %2332 }
 0x319   :  { %v3953_v32 = vmax.f32 %v3889_v62, 0.0  ;;  %2428 = vst.msk [vmem:[#allocation2 + $0x100] sm:$0xff] %vm819_vm4, %v2333_v50  ;;  %v2335_v34 = vpop.permute.xlu1 %2334  ;;  %v4717_v38 = vpop.f32.mrb[4].mxu0  ;;  %v4545_v50 = vld [vmem:[%s7917_s0 + $0x27a] sm:$0xff] }
 0x31a   :  { %4019 = vst.msk [vmem:[%s7920_s3 + $0x18] sm:$0xff] %vm4015_vm11, %v3954_v31  ;;  %v3892_v40 = vadd.f32 %v4717_v38, %v7073_v54  ;;  %2931 = vrot.lane.b32.xlu0 %v4511_v43, %s4834_s25  ;;  %v3581_v41 = vpop.f32.mrb[5].mxu0 }
 0x31b   :  { %2429 = vst.msk [vmem:[#allocation2 + $0x108] sm:$0xff] %vm819_vm4, %v2335_v34  ;;  %v3891_v45 = vadd.f32 %v7073_v54, %v3581_v41  ;;  %3121 = vrot.lane.b32.xlu1 %v6740_v17, %s4835_s11 }
 0x31c   :  { %4018 = vst.msk [vmem:[%s7920_s3 + $0x10] sm:$0xff] %vm4015_vm11, %v3953_v32  ;;  %v3956_v5 = vmax.f32 %v3892_v40, 0.0  ;;  %v2525_v52 = vpop.permute.xlu0 %2524 }
 0x31d   :  { %v3955_v55 = vmax.f32 %v3891_v45, 0.0  ;;  %2620 = vst.msk [vmem:[#allocation2 + $0x100] sm:$0xff] %vm1012_vm5, %v2525_v52  ;;  %v2527_v53 = vpop.permute.xlu1 %2526  ;;  %v4720_v59 = vpop.f32.mrb[6].mxu0 }
 0x31e   :  { %4021 = vst.msk [vmem:[%s7920_s3 + $0x28] sm:$0xff] %vm4015_vm11, %v3956_v5  ;;  %v3894_v17 = vadd.f32 %v4720_v59, %v7073_v54  ;;  %2358 = vrot.lane.b32.xlu0 %v4511_v43, %s4831_s4  ;;  %v3591_v56 = vpop.f32.mrb[7].mxu0 }
 0x31f   :  { %2621 = vst.msk [vmem:[#allocation2 + $0x108] sm:$0xff] %vm1012_vm5, %v2527_v53  ;;  %v3893_v11 = vadd.f32 %v7073_v54, %v3591_v56  ;;  %2548 = vrot.lane.b32.xlu1 %v4448_v24, %s4832_s9 }
 0x320   :  { %4020 = vst.msk [vmem:[%s7920_s3 + $0x20] sm:$0xff] %vm4015_vm11, %v3955_v55  ;;  %v3958_v57 = vmax.f32 %v3894_v17, 0.0  ;;  %v2718_v8 = vpop.permute.xlu0 %2717 }
 0x321   :  { %v3957_v9 = vmax.f32 %v3893_v11, 0.0  ;;  %2813 = vst.msk [vmem:[#allocation2 + $0x100] sm:$0xff] %vm1206_vm6, %v2718_v8  ;;  %v2720_v26 = vpop.permute.xlu1 %2719  ;;  %v4723_v10 = vpop.f32.mrb[8].mxu0  ;;  %v4514_v8 = vld [vmem:[%s7917_s0 + $0x289] sm:$0xff] }
 0x322   :  { %4023 = vst.msk [vmem:[%s7920_s3 + $0x38] sm:$0xff] %vm4015_vm11, %v3958_v57  ;;  %v3896_v35 = vadd.f32 %v4723_v10, %v7073_v54  ;;  %3123 = vrot.lane.b32.xlu0 %v4543_v61, %s4835_s11  ;;  %v3601_v3 = vpop.f32.mrb[9].mxu0 }
 0x323   :  { %2814 = vst.msk [vmem:[#allocation2 + $0x108] sm:$0xff] %vm1206_vm6, %v2720_v26  ;;  %v3895_v14 = vadd.f32 %v7073_v54, %v3601_v3  ;;  %2550 = vrot.lane.b32.xlu1 %v4543_v61, %s4832_s9 }
 0x324   :  { %4022 = vst.msk [vmem:[%s7920_s3 + $0x30] sm:$0xff] %vm4015_vm11, %v3957_v9  ;;  %v3960_v4 = vmax.f32 %v3896_v35, 0.0  ;;  %v2910_v15 = vpop.permute.xlu0 %2909 }
 0x325   :  { %v3959_v18 = vmax.f32 %v3895_v14, 0.0  ;;  %3005 = vst.msk [vmem:[#allocation2 + $0x100] sm:$0xff] %vm1399_vm8, %v2910_v15  ;;  %v2337_v29 = vpop.permute.xlu1 %2336  ;;  %v4726_v30 = vpop.f32.mrb[10].mxu0 }
 0x326   :  { %4025 = vst.msk [vmem:[%s7920_s3 + $0x48] sm:$0xff] %vm4015_vm11, %v3960_v4  ;;  %v3898_v0 = vadd.f32 %v4726_v30, %v7073_v54  ;;  %2741 = vrot.lane.b32.xlu0 %v6438_v33, %s4833_s15  ;;  %v3611_v47 = vpop.f32.mrb[11].mxu0  ;;  %v4515_v4 = vld [vmem:[%s7917_s0 + $0x291] sm:$0xff] }
 0x327   :  { %2430 = vst.msk [vmem:[#allocation2 + $0x110] sm:$0xff] %vm819_vm4, %v2337_v29  ;;  %v3897_v37 = vadd.f32 %v7073_v54, %v3611_v47  ;;  %2743 = vrot.lane.b32.xlu1 %v6445_v36, %s4833_s15  ;;  %v4546_v29 = vld [vmem:[%s7917_s0 + $0x28a] sm:$0xff] }
 0x328   :  { %4024 = vst.msk [vmem:[%s7920_s3 + $0x40] sm:$0xff] %vm4015_vm11, %v3959_v18  ;;  %v3962_v48 = vmax.f32 %v3898_v0, 0.0  ;;  %v2912_v7 = vpop.permute.xlu0 %2911 }
 0x329   :  { %v3961_v58 = vmax.f32 %v3897_v37, 0.0  ;;  %3006 = vst.msk [vmem:[#allocation2 + $0x108] sm:$0xff] %vm1399_vm8, %v2912_v7  ;;  %v3102_v33 = vpop.permute.xlu1 %3101  ;;  %v4729_v22 = vpop.f32.mrb[12].mxu0 }
 0x32a   :  { %4027 = vst.msk [vmem:[%s7920_s3 + $0x58] sm:$0xff] %vm4015_vm11, %v3962_v48  ;;  %v3900_v36 = vadd.f32 %v4729_v22, %v7073_v54  ;;  %2933 = vrot.lane.b32.xlu0 %v4512_v12, %s4834_s25  ;;  %v3621_v16 = vpop.f32.mrb[13].mxu0 }
 0x32b   :  { %3197 = vst.msk [vmem:[#allocation2 + $0x100] sm:$0xff] %vm1592_vm9, %v3102_v33  ;;  %v3899_v6 = vadd.f32 %v7073_v54, %v3621_v16  ;;  %2360 = vrot.lane.b32.xlu1 %v4512_v12, %s4831_s4 }
 0x32c   :  { %4026 = vst.msk [vmem:[%s7920_s3 + $0x50] sm:$0xff] %vm4015_vm11, %v3961_v58  ;;  %v3964_v51 = vmax.f32 %v3900_v36, 0.0  ;;  %v2339_v60 = vpop.permute.xlu0 %2338 }
 0x32d   :  { %v3963_v42 = vmax.f32 %v3899_v6, 0.0  ;;  %2431 = vst.msk [vmem:[#allocation2 + $0x118] sm:$0xff] %vm819_vm4, %v2339_v60  ;;  %v2529_v21 = vpop.permute.xlu1 %2528  ;;  %v4732_v63 = vpop.f32.mrb[14].mxu0  ;;  %v4547_v60 = vld [vmem:[%s7917_s0 + $0x292] sm:$0xff] }
 0x32e   :  { %4029 = vst.msk [vmem:[%s7920_s3 + $0x68] sm:$0xff] %vm4015_vm11, %v3964_v51  ;;  %v3902_v13 = vadd.f32 %v4732_v63, %v7073_v54  ;;  %2935 = vrot.lane.b32.xlu0 %v4513_v19, %s4834_s25  ;;  %v3631_v2 = vpop.f32.mrb[15].mxu0 }
 0x32f   :  { %2622 = vst.msk [vmem:[#allocation2 + $0x110] sm:$0xff] %vm1012_vm5, %v2529_v21  ;;  %v3901_v20 = vadd.f32 %v7073_v54, %v3631_v2  ;;  %3125 = vrot.lane.b32.xlu1 %v4544_v49, %s4835_s11 }
 0x330   :  { %4028 = vst.msk [vmem:[%s7920_s3 + $0x60] sm:$0xff] %vm4015_vm11, %v3963_v42  ;;  %v3966_v23 = vmax.f32 %v3902_v13, 0.0  ;;  %v3104_v27 = vpop.permute.xlu0 %3103 }
 0x331   :  { %v3965_v1 = vmax.f32 %v3901_v20, 0.0  ;;  %3198 = vst.msk [vmem:[#allocation2 + $0x108] sm:$0xff] %vm1592_vm9, %v3104_v27  ;;  %v2531_v46 = vpop.permute.xlu1 %2530  ;;  %v4735_v25 = vpop.f32.mrb[16].mxu0  ;;  %v4484_v27 = vld [vmem:[%s7917_s0 + $0x2a0] sm:$0xff] }
 0x332   :  { %v3261_v28 = vld [vmem:[#allocation2 + $0x100] sm:$0xff]  ;;  %4031 = vst.msk [vmem:[%s7920_s3 + $0x78] sm:$0xff] %vm4015_vm11, %v3966_v23  ;;  %v3904_v62 = vadd.f32 %v4735_v25, %v7073_v54  ;;  %2362 = vrot.lane.b32.xlu0 %v4513_v19, %s4831_s4  ;;  %v3641_v43 = vpop.f32.mrb[17].mxu0 }
 0x333   :  { %2623 = vst.msk [vmem:[#allocation2 + $0x118] sm:$0xff] %vm1012_vm5, %v2531_v46  ;;  %4757 = vmatprep.mubr.msk.f32.mxu1 %vm3298_vm10, %v3261_v28  ;;  %v3903_v31 = vadd.f32 %v7073_v54, %v3641_v43  ;;  %2552 = vrot.lane.b32.xlu1 %v4544_v49, %s4832_s9 }
 0x334   :  { %4030 = vst.msk [vmem:[%s7920_s3 + $0x70] sm:$0xff] %vm4015_vm11, %v3965_v1  ;;  %v3968_v32 = vmax.f32 %v3904_v62, 0.0  ;;  %v2722_v34 = vpop.permute.xlu0 %2721 }
 0x335   :  { %v3967_v38 = vmax.f32 %v3903_v31, 0.0  ;;  %2815 = vst.msk [vmem:[#allocation2 + $0x110] sm:$0xff] %vm1206_vm6, %v2722_v34  ;;  %v2724_v40 = vpop.permute.xlu1 %2723  ;;  %v4738_v41 = vpop.f32.mrb[18].mxu0  ;;  %v4485_v34 = vld [vmem:[%s7917_s0 + $0x2a8] sm:$0xff] }
 0x336   :  { %4033 = vst.msk [vmem:[%s7920_s3 + $0x88] sm:$0xff] %vm4015_vm11, %v3968_v32  ;;  %v3906_v45 = vadd.f32 %v4738_v41, %v7073_v54  ;;  %3127 = vrot.lane.b32.xlu0 %v4545_v50, %s4835_s11  ;;  %v3651_v5 = vpop.f32.mrb[19].mxu0  ;;  %v4516_v41 = vld [vmem:[%s7917_s0 + $0x2a1] sm:$0xff] }
 0x337   :  { %2816 = vst.msk [vmem:[#allocation2 + $0x118] sm:$0xff] %vm1206_vm6, %v2724_v40  ;;  %v3905_v52 = vadd.f32 %v7073_v54, %v3651_v5  ;;  %2554 = vrot.lane.b32.xlu1 %v4545_v50, %s4832_s9 }
 0x338   :  { %4032 = vst.msk [vmem:[%s7920_s3 + $0x80] sm:$0xff] %vm4015_vm11, %v3967_v38  ;;  %v3970_v24 = vmax.f32 %v3906_v45, 0.0  ;;  %v2914_v55 = vpop.permute.xlu0 %2913  ;;  %v3262_v53 = vld [vmem:[#allocation2 + $0x108] sm:$0xff] }
 0x339   :  { %v3969_v59 = vmax.f32 %v3905_v52, 0.0  ;;  %3007 = vst.msk [vmem:[#allocation2 + $0x110] sm:$0xff] %vm1399_vm8, %v2914_v55  ;;  %v2341_v17 = vpop.permute.xlu1 %2340  ;;  %v4741_v56 = vpop.f32.mrb[20].mxu0  ;;  %4758 = vmatmul.mubr.msk.f32.vlgmr.msra.gmra.mrb[0].mxu1 %vm3298_vm10, %v3262_v53  ;;  %v4548_v53 = vld [vmem:[%s7917_s0 + $0x2a2] sm:$0xff] }
 0x33a   :  { %4035 = vst.msk [vmem:[%s7920_s3 + $0x98] sm:$0xff] %vm4015_vm11, %v3970_v24  ;;  %v3908_v11 = vadd.f32 %v4741_v56, %v7073_v54  ;;  %2745 = vrot.lane.b32.xlu0 %v6462_v39, %s4833_s15  ;;  %v3661_v61 = vpop.f32.mrb[21].mxu0  ;;  %v4517_v24 = vld [vmem:[%s7917_s0 + $0x2a9] sm:$0xff] }
 0x33b   :  { %2432 = vst.msk [vmem:[#allocation2 + $0x120] sm:$0xff] %vm819_vm4, %v2341_v17  ;;  %v3907_v57 = vadd.f32 %v7073_v54, %v3661_v61  ;;  %2747 = vrot.lane.b32.xlu1 %v6469_v44, %s4833_s15  ;;  %v4549_v61 = vld [vmem:[%s7917_s0 + $0x2aa] sm:$0xff] }
 0x33c   :  { %4034 = vst.msk [vmem:[%s7920_s3 + $0x90] sm:$0xff] %vm4015_vm11, %v3969_v59  ;;  %v3972_v9 = vmax.f32 %v3908_v11, 0.0  ;;  %v2916_v26 = vpop.permute.xlu0 %2915 }
 0x33d   :  { %v3971_v10 = vmax.f32 %v3907_v57, 0.0  ;;  %3008 = vst.msk [vmem:[#allocation2 + $0x118] sm:$0xff] %vm1399_vm8, %v2916_v26  ;;  %v3106_v39 = vpop.permute.xlu1 %3105  ;;  %v4744_v35 = vpop.f32.mrb[22].mxu0  ;;  %v4486_v26 = vld [vmem:[%s7917_s0 + $0x2b8] sm:$0xff] }
 0x33e   :  { %4037 = vst.msk [vmem:[%s7920_s3 + $0xa8] sm:$0xff] %vm4015_vm11, %v3972_v9  ;;  %v3910_v44 = vadd.f32 %v4744_v35, %v7073_v54  ;;  %2937 = vrot.lane.b32.xlu0 %v4514_v8, %s4834_s25  ;;  %v3671_v3 = vpop.f32.mrb[23].mxu0  ;;  %v4487_v35 = vld [vmem:[%s7917_s0 + $0x2c0] sm:$0xff] }
 0x33f   :  { %3199 = vst.msk [vmem:[#allocation2 + $0x110] sm:$0xff] %vm1592_vm9, %v3106_v39  ;;  %v3909_v14 = vadd.f32 %v7073_v54, %v3671_v3  ;;  %2364 = vrot.lane.b32.xlu1 %v4514_v8, %s4831_s4  ;;  %v4518_v3 = vld [vmem:[%s7917_s0 + $0x2b9] sm:$0xff] }
 0x340   :  { %4036 = vst.msk [vmem:[%s7920_s3 + $0xa0] sm:$0xff] %vm4015_vm11, %v3971_v10  ;;  %v3974_v15 = vmax.f32 %v3910_v44, 0.0  ;;  %v2343_v18 = vpop.permute.xlu0 %2342 }
 0x341   :  { %v3973_v30 = vmax.f32 %v3909_v14, 0.0  ;;  %2433 = vst.msk [vmem:[#allocation2 + $0x128] sm:$0xff] %vm819_vm4, %v2343_v18  ;;  %v2533_v0 = vpop.permute.xlu1 %2532  ;;  %v4747_v47 = vpop.f32.mrb[24].mxu0 }
 0x342   :  { %4039 = vst.msk [vmem:[%s7920_s3 + $0xb8] sm:$0xff] %vm4015_vm11, %v3974_v15  ;;  %v3912_v37 = vadd.f32 %v4747_v47, %v7073_v54  ;;  %2939 = vrot.lane.b32.xlu0 %v4515_v4, %s4834_s25  ;;  %v3681_v12 = vpop.f32.mrb[25].mxu0 }
 0x343   :  { %2624 = vst.msk [vmem:[#allocation2 + $0x120] sm:$0xff] %vm1012_vm5, %v2533_v0  ;;  %v3911_v48 = vadd.f32 %v7073_v54, %v3681_v12  ;;  %3129 = vrot.lane.b32.xlu1 %v4546_v29, %s4835_s11  ;;  %v4550_v0 = vld [vmem:[%s7917_s0 + $0x2ba] sm:$0xff] }
 0x344   :  { %4038 = vst.msk [vmem:[%s7920_s3 + $0xb0] sm:$0xff] %vm4015_vm11, %v3973_v30  ;;  %v3976_v7 = vmax.f32 %v3912_v37, 0.0  ;;  %v3108_v58 = vpop.permute.xlu0 %3107 }
 0x345   :  { %v3975_v33 = vmax.f32 %v3911_v48, 0.0  ;;  %3200 = vst.msk [vmem:[#allocation2 + $0x118] sm:$0xff] %vm1592_vm9, %v3108_v58  ;;  %v2535_v22 = vpop.permute.xlu1 %2534  ;;  %v4750_v36 = vpop.f32.mrb[26].mxu0 }
 0x346   :  { %v3263_v16 = vld [vmem:[#allocation2 + $0x110] sm:$0xff]  ;;  %4041 = vst.msk [vmem:[%s7920_s3 + $0xc8] sm:$0xff] %vm4015_vm11, %v3976_v7  ;;  %v3914_v6 = vadd.f32 %v4750_v36, %v7073_v54  ;;  %2366 = vrot.lane.b32.xlu0 %v4515_v4, %s4831_s4  ;;  %v3691_v19 = vpop.f32.mrb[27].mxu0  ;;  %v4551_v7 = vld [vmem:[%s7917_s0 + $0x2c2] sm:$0xff] }
 0x347   :  { %2625 = vst.msk [vmem:[#allocation2 + $0x128] sm:$0xff] %vm1012_vm5, %v2535_v22  ;;  %4760 = vmatprep.mubr.msk.f32.mxu1 %vm3298_vm10, %v3263_v16  ;;  %v3913_v51 = vadd.f32 %v7073_v54, %v3691_v19  ;;  %2556 = vrot.lane.b32.xlu1 %v4546_v29, %s4832_s9  ;;  %v4519_v29 = vld [vmem:[%s7917_s0 + $0x2c1] sm:$0xff]  ;;  %v4488_v22 = vld [vmem:[%s7917_s0 + $0x2d0] sm:$0xff] }
 0x348   :  { %4040 = vst.msk [vmem:[%s7920_s3 + $0xc0] sm:$0xff] %vm4015_vm11, %v3975_v33  ;;  %v3978_v49 = vmax.f32 %v3914_v6, 0.0  ;;  %v2726_v42 = vpop.permute.xlu0 %2725  ;;  %v4489_v6 = vld [vmem:[%s7917_s0 + $0x2d8] sm:$0xff] }
 0x349   :  { %v3977_v21 = vmax.f32 %v3913_v51, 0.0  ;;  %2817 = vst.msk [vmem:[#allocation2 + $0x120] sm:$0xff] %vm1206_vm6, %v2726_v42  ;;  %v2728_v63 = vpop.permute.xlu1 %2727  ;;  %v4753_v13 = vpop.f32.mrb[28].mxu0  ;;  %v4520_v51 = vld [vmem:[%s7917_s0 + $0x2d1] sm:$0xff] }
 0x34a   :  { %4043 = vst.msk [vmem:[%s7920_s3 + $0xd8] sm:$0xff] %vm4015_vm11, %v3978_v49  ;;  %v3916_v2 = vadd.f32 %v4753_v13, %v7073_v54  ;;  %3131 = vrot.lane.b32.xlu0 %v4547_v60, %s4835_s11  ;;  %v3701_v20 = vpop.f32.mrb[29].mxu0 }
 0x34b   :  { %2818 = vst.msk [vmem:[#allocation2 + $0x128] sm:$0xff] %vm1206_vm6, %v2728_v63  ;;  %v3915_v23 = vadd.f32 %v7073_v54, %v3701_v20  ;;  %2558 = vrot.lane.b32.xlu1 %v4547_v60, %s4832_s9  ;;  %v4521_v63 = vld [vmem:[%s7917_s0 + $0x2d9] sm:$0xff] }
 0x34c   :  { %4042 = vst.msk [vmem:[%s7920_s3 + $0xd0] sm:$0xff] %vm4015_vm11, %v3977_v21  ;;  %v3980_v1 = vmax.f32 %v3916_v2, 0.0  ;;  %v2918_v46 = vpop.permute.xlu0 %2917  ;;  %v3264_v25 = vld [vmem:[#allocation2 + $0x118] sm:$0xff] }
 0x34d   :  { %v3979_v28 = vmax.f32 %v3915_v23, 0.0  ;;  %3009 = vst.msk [vmem:[#allocation2 + $0x120] sm:$0xff] %vm1399_vm8, %v2918_v46  ;;  %v2345_v62 = vpop.permute.xlu1 %2344  ;;  %v4756_v43 = vpop.f32.mrb[30].mxu0  ;;  %4761 = vmatmul.mubr.msk.f32.gmra.mrb[2].mxu1 %vm3298_vm10, %v3264_v25  ;;  %v4552_v20 = vld [vmem:[%s7917_s0 + $0x2d2] sm:$0xff]  ;;  %v4553_v46 = vld [vmem:[%s7917_s0 + $0x2da] sm:$0xff] }
 0x34e   :  { %4045 = vst.msk [vmem:[%s7920_s3 + $0xe8] sm:$0xff] %vm4015_vm11, %v3980_v1  ;;  %v3918_v31 = vadd.f32 %v4756_v43, %v7073_v54  ;;  %2749 = vrot.lane.b32.xlu0 %v4484_v27, %s4833_s15  ;;  %v3711_v50 = vpop.f32.mrb[31].mxu0 }
 0x34f   :  { %2434 = vst.msk [vmem:[#allocation2 + $0x130] sm:$0xff] %vm819_vm4, %v2345_v62  ;;  %v3917_v32 = vadd.f32 %v7073_v54, %v3711_v50  ;;  %2176 = vrot.lane.b32.xlu1 %v4484_v27, %s4830_s26  ;;  %v4490_v62 = vld [vmem:[%s7917_s0 + $0x2e8] sm:$0xff] }
 0x350   :  { %4044 = vst.msk [vmem:[%s7920_s3 + $0xe0] sm:$0xff] %vm4015_vm11, %v3979_v28  ;;  %v3982_v38 = vmax.f32 %v3918_v31, 0.0  ;;  %v2920_v40 = vpop.permute.xlu0 %2919 }
 0x351   :  { %v3981_v45 = vmax.f32 %v3917_v32, 0.0  ;;  %3010 = vst.msk [vmem:[#allocation2 + $0x128] sm:$0xff] %vm1399_vm8, %v2920_v40  ;;  %v3110_v5 = vpop.permute.xlu1 %3109  ;;  %v4491_v32 = vld [vmem:[%s7917_s0 + $0x2f0] sm:$0xff] }
 0x352   :  { %4047 = vst.msk [vmem:[%s7920_s3 + $0xf8] sm:$0xff] %vm4015_vm11, %v3982_v38  ;;  %2751 = vrot.lane.b32.xlu0 %v4485_v34, %s4833_s15  ;;  %v4522_v38 = vld [vmem:[%s7917_s0 + $0x2e9] sm:$0xff] }
 0x353   :  { %3201 = vst.msk [vmem:[#allocation2 + $0x120] sm:$0xff] %vm1592_vm9, %v3110_v5  ;;  %2941 = vrot.lane.b32.xlu1 %v4516_v41, %s4834_s25 }
 0x354   :  { %4046 = vst.msk [vmem:[%s7920_s3 + $0xf0] sm:$0xff] %vm4015_vm11, %v3981_v45  ;;  %v2347_v54 = vpop.permute.xlu0 %2346 }
 0x355   :  { %2435 = vst.msk [vmem:[#allocation2 + $0x138] sm:$0xff] %vm819_vm4, %v2347_v54  ;;  %v2537_v52 = vpop.permute.xlu1 %2536  ;;  %v4523_v54 = vld [vmem:[%s7917_s0 + $0x2f1] sm:$0xff] }
 0x356   :  { %2626 = vst.msk [vmem:[#allocation2 + $0x130] sm:$0xff] %vm1012_vm5, %v2537_v52  ;;  %2178 = vrot.lane.b32.xlu0 %v4485_v34, %s4830_s26 }
 0x357   :  { %2368 = vrot.lane.b32.xlu1 %v4516_v41, %s4831_s4 }
 0x358   :  { %v3112_v55 = vpop.permute.xlu0 %3111 }
 0x359   :  { %3202 = vst.msk [vmem:[#allocation2 + $0x128] sm:$0xff] %vm1592_vm9, %v3112_v55  ;;  %v2539_v59 = vpop.permute.xlu1 %2538 }
 0x35a   :  { %v3265_v17 = vld [vmem:[#allocation2 + $0x120] sm:$0xff]  ;;  %2627 = vst.msk [vmem:[#allocation2 + $0x138] sm:$0xff] %vm1012_vm5, %v2539_v59  ;;  %2943 = vrot.lane.b32.xlu0 %v4517_v24, %s4834_s25 }
 0x35b   :  { %4763 = vmatprep.mubr.msk.f32.mxu1 %vm3298_vm10, %v3265_v17  ;;  %3133 = vrot.lane.b32.xlu1 %v4548_v53, %s4835_s11  ;;  %v4555_v17 = vld [vmem:[%s7917_s0 + $0x2f2] sm:$0xff] }
 0x35c   :  { %v2730_v56 = vpop.permute.xlu0 %2729 }
 0x35d   :  { %2819 = vst.msk [vmem:[#allocation2 + $0x130] sm:$0xff] %vm1206_vm6, %v2730_v56  ;;  %v2732_v11 = vpop.permute.xlu1 %2731 }
 0x35e   :  { %2820 = vst.msk [vmem:[#allocation2 + $0x138] sm:$0xff] %vm1206_vm6, %v2732_v11  ;;  %2370 = vrot.lane.b32.xlu0 %v4517_v24, %s4831_s4  ;;  %v4554_v24 = vld [vmem:[%s7917_s0 + $0x2ea] sm:$0xff] }
 0x35f   :  { %2560 = vrot.lane.b32.xlu1 %v4548_v53, %s4832_s9 }
 0x360   :  { %v2922_v57 = vpop.permute.xlu0 %2921  ;;  %v3266_v8 = vld [vmem:[#allocation2 + $0x128] sm:$0xff] }
 0x361   :  { %3011 = vst.msk [vmem:[#allocation2 + $0x130] sm:$0xff] %vm1399_vm8, %v2922_v57  ;;  %v2349_v9 = vpop.permute.xlu1 %2348  ;;  %4764 = vmatmul.mubr.msk.f32.gmra.mrb[4].mxu1 %vm3298_vm10, %v3266_v8  ;;  %v4492_v57 = vld [vmem:[%s7917_s0 + $0x300] sm:$0xff] }
 0x362   :  { %2436 = vst.msk [vmem:[#allocation2 + $0x140] sm:$0xff] %vm819_vm4, %v2349_v9  ;;  %3135 = vrot.lane.b32.xlu0 %v4549_v61, %s4835_s11 }
 0x363   :  { %2562 = vrot.lane.b32.xlu1 %v4549_v61, %s4832_s9 }
 0x364   :  { %v2924_v10 = vpop.permute.xlu0 %2923 }
 0x365   :  { %3012 = vst.msk [vmem:[#allocation2 + $0x138] sm:$0xff] %vm1399_vm8, %v2924_v10  ;;  %v3114_v39 = vpop.permute.xlu1 %3113 }
 0x366   :  { %3203 = vst.msk [vmem:[#allocation2 + $0x130] sm:$0xff] %vm1592_vm9, %v3114_v39  ;;  %2753 = vrot.lane.b32.xlu0 %v4486_v26, %s4833_s15 }
 0x367   :  { %2180 = vrot.lane.b32.xlu1 %v4486_v26, %s4830_s26  ;;  %v4493_v26 = vld [vmem:[%s7917_s0 + $0x308] sm:$0xff] }
 0x368   :  { %v2351_v44 = vpop.permute.xlu0 %2350 }
 0x369   :  { %2437 = vst.msk [vmem:[#allocation2 + $0x148] sm:$0xff] %vm819_vm4, %v2351_v44  ;;  %v2541_v14 = vpop.permute.xlu1 %2540 }
 0x36a   :  { %2628 = vst.msk [vmem:[#allocation2 + $0x140] sm:$0xff] %vm1012_vm5, %v2541_v14  ;;  %2755 = vrot.lane.b32.xlu0 %v4487_v35, %s4833_s15 }
 0x36b   :  { %2945 = vrot.lane.b32.xlu1 %v4518_v3, %s4834_s25 }
 0x36c   :  { %v3116_v4 = vpop.permute.xlu0 %3115 }
 0x36d   :  { %3204 = vst.msk [vmem:[#allocation2 + $0x138] sm:$0xff] %vm1592_vm9, %v3116_v4  ;;  %v2543_v15 = vpop.permute.xlu1 %2542  ;;  %v3267_v18 = vld [vmem:[#allocation2 + $0x130] sm:$0xff] }
 0x36e   :  { %2629 = vst.msk [vmem:[#allocation2 + $0x148] sm:$0xff] %vm1012_vm5, %v2543_v15  ;;  %2182 = vrot.lane.b32.xlu0 %v4487_v35, %s4830_s26  ;;  %4766 = vmatprep.mubr.msk.f32.mxu1 %vm3298_vm10, %v3267_v18  ;;  %v4524_v35 = vld [vmem:[%s7917_s0 + $0x301] sm:$0xff]  ;;  %v4525_v4 = vld [vmem:[%s7917_s0 + $0x309] sm:$0xff] }
 0x36f   :  { %2372 = vrot.lane.b32.xlu1 %v4518_v3, %s4831_s4  ;;  %v4556_v18 = vld [vmem:[%s7917_s0 + $0x302] sm:$0xff] }
 0x370   :  { %v2734_v30 = vpop.permute.xlu0 %2733 }
 0x371   :  { %2821 = vst.msk [vmem:[#allocation2 + $0x140] sm:$0xff] %vm1206_vm6, %v2734_v30  ;;  %v2736_v47 = vpop.permute.xlu1 %2735 }
 0x372   :  { %2822 = vst.msk [vmem:[#allocation2 + $0x148] sm:$0xff] %vm1206_vm6, %v2736_v47  ;;  %2947 = vrot.lane.b32.xlu0 %v4519_v29, %s4834_s25 }
 0x373   :  { %3137 = vrot.lane.b32.xlu1 %v4550_v0, %s4835_s11 }
 0x374   :  { %v2926_v37 = vpop.permute.xlu0 %2925  ;;  %v3268_v12 = vld [vmem:[#allocation2 + $0x138] sm:$0xff] }
 0x375   :  { %3013 = vst.msk [vmem:[#allocation2 + $0x140] sm:$0xff] %vm1399_vm8, %v2926_v37  ;;  %v2353_v48 = vpop.permute.xlu1 %2352  ;;  %4767 = vmatmul.mubr.msk.f32.gmra.mrb[6].mxu1 %vm3298_vm10, %v3268_v12  ;;  %v4557_v37 = vld [vmem:[%s7917_s0 + $0x30a] sm:$0xff] }
 0x376   :  { %2438 = vst.msk [vmem:[#allocation2 + $0x150] sm:$0xff] %vm819_vm4, %v2353_v48  ;;  %2374 = vrot.lane.b32.xlu0 %v4519_v29, %s4831_s4 }
 0x377   :  { %2564 = vrot.lane.b32.xlu1 %v4550_v0, %s4832_s9 }
 0x378   :  { %v2928_v58 = vpop.permute.xlu0 %2927 }
 0x379   :  { %3014 = vst.msk [vmem:[#allocation2 + $0x148] sm:$0xff] %vm1399_vm8, %v2928_v58  ;;  %v3118_v33 = vpop.permute.xlu1 %3117 }
 0x37a   :  { %3205 = vst.msk [vmem:[#allocation2 + $0x140] sm:$0xff] %vm1592_vm9, %v3118_v33  ;;  %3139 = vrot.lane.b32.xlu0 %v4551_v7, %s4835_s11 }
 0x37b   :  { %2566 = vrot.lane.b32.xlu1 %v4551_v7, %s4832_s9  ;;  %v4494_v7 = vld [vmem:[%s7917_s0 + $0x318] sm:$0xff] }
 0x37c   :  { %v2355_v36 = vpop.permute.xlu0 %2354 }
 0x37d   :  { %2439 = vst.msk [vmem:[#allocation2 + $0x158] sm:$0xff] %vm819_vm4, %v2355_v36  ;;  %v2545_v16 = vpop.permute.xlu1 %2544  ;;  %v4495_v36 = vld [vmem:[%s7917_s0 + $0x320] sm:$0xff] }
 0x37e   :  { %2630 = vst.msk [vmem:[#allocation2 + $0x150] sm:$0xff] %vm1012_vm5, %v2545_v16  ;;  %2757 = vrot.lane.b32.xlu0 %v4488_v22, %s4833_s15 }
 0x37f   :  { %2184 = vrot.lane.b32.xlu1 %v4488_v22, %s4830_s26 }
 0x380   :  { %v3120_v19 = vpop.permute.xlu0 %3119 }
 0x381   :  { %3206 = vst.msk [vmem:[#allocation2 + $0x148] sm:$0xff] %vm1592_vm9, %v3120_v19  ;;  %v2547_v60 = vpop.permute.xlu1 %2546  ;;  %v3269_v49 = vld [vmem:[#allocation2 + $0x140] sm:$0xff] }
 0x382   :  { %2631 = vst.msk [vmem:[#allocation2 + $0x158] sm:$0xff] %vm1012_vm5, %v2547_v60  ;;  %2759 = vrot.lane.b32.xlu0 %v4489_v6, %s4833_s15  ;;  %4769 = vmatprep.mubr.msk.f32.mxu1 %vm3298_vm10, %v3269_v49  ;;  %v4527_v49 = vld [vmem:[%s7917_s0 + $0x321] sm:$0xff] }
 0x383   :  { %2949 = vrot.lane.b32.xlu1 %v4520_v51, %s4834_s25 }
 0x384   :  { %v2738_v42 = vpop.permute.xlu0 %2737 }
 0x385   :  { %2823 = vst.msk [vmem:[#allocation2 + $0x150] sm:$0xff] %vm1206_vm6, %v2738_v42  ;;  %v2740_v21 = vpop.permute.xlu1 %2739 }
 0x386   :  { %2824 = vst.msk [vmem:[#allocation2 + $0x158] sm:$0xff] %vm1206_vm6, %v2740_v21  ;;  %2186 = vrot.lane.b32.xlu0 %v4489_v6, %s4830_s26  ;;  %v4526_v6 = vld [vmem:[%s7917_s0 + $0x319] sm:$0xff] }
 0x387   :  { %2376 = vrot.lane.b32.xlu1 %v4520_v51, %s4831_s4  ;;  %v4558_v21 = vld [vmem:[%s7917_s0 + $0x31a] sm:$0xff] }
 0x388   :  { %v2930_v13 = vpop.permute.xlu0 %2929  ;;  %v3270_v2 = vld [vmem:[#allocation2 + $0x148] sm:$0xff] }
 0x389   :  { %3015 = vst.msk [vmem:[#allocation2 + $0x150] sm:$0xff] %vm1399_vm8, %v2930_v13  ;;  %v2357_v23 = vpop.permute.xlu1 %2356  ;;  %4770 = vmatmul.mubr.msk.f32.gmra.mrb[8].mxu1 %vm3298_vm10, %v3270_v2 }
 0x38a   :  { %2440 = vst.msk [vmem:[#allocation2 + $0x160] sm:$0xff] %vm819_vm4, %v2357_v23  ;;  %2951 = vrot.lane.b32.xlu0 %v4521_v63, %s4834_s25  ;;  %v4559_v23 = vld [vmem:[%s7917_s0 + $0x322] sm:$0xff] }
 0x38b   :  { %3141 = vrot.lane.b32.xlu1 %v4552_v20, %s4835_s11 }
 0x38c   :  { %v2932_v27 = vpop.permute.xlu0 %2931 }
 0x38d   :  { %3016 = vst.msk [vmem:[#allocation2 + $0x158] sm:$0xff] %vm1399_vm8, %v2932_v27  ;;  %v3122_v1 = vpop.permute.xlu1 %3121 }
 0x38e   :  { %3207 = vst.msk [vmem:[#allocation2 + $0x150] sm:$0xff] %vm1592_vm9, %v3122_v1  ;;  %2378 = vrot.lane.b32.xlu0 %v4521_v63, %s4831_s4 }
 0x38f   :  { %2568 = vrot.lane.b32.xlu1 %v4552_v20, %s4832_s9 }
 0x390   :  { %v2359_v25 = vpop.permute.xlu0 %2358 }
 0x391   :  { %2441 = vst.msk [vmem:[#allocation2 + $0x168] sm:$0xff] %vm819_vm4, %v2359_v25  ;;  %v2549_v28 = vpop.permute.xlu1 %2548 }
 0x392   :  { %2632 = vst.msk [vmem:[#allocation2 + $0x160] sm:$0xff] %vm1012_vm5, %v2549_v28  ;;  %3143 = vrot.lane.b32.xlu0 %v4553_v46, %s4835_s11 }
 0x393   :  { %2570 = vrot.lane.b32.xlu1 %v4553_v46, %s4832_s9  ;;  %v4496_v46 = vld [vmem:[%s7917_s0 + $0x330] sm:$0xff] }
 0x394   :  { %v3124_v43 = vpop.permute.xlu0 %3123 }
 0x395   :  { %3208 = vst.msk [vmem:[#allocation2 + $0x158] sm:$0xff] %vm1592_vm9, %v3124_v43  ;;  %v2551_v31 = vpop.permute.xlu1 %2550  ;;  %v3271_v50 = vld [vmem:[#allocation2 + $0x150] sm:$0xff]  ;;  %v4497_v43 = vld [vmem:[%s7917_s0 + $0x338] sm:$0xff] }
 0x396   :  { %2633 = vst.msk [vmem:[#allocation2 + $0x168] sm:$0xff] %vm1012_vm5, %v2551_v31  ;;  %2761 = vrot.lane.b32.xlu0 %v4490_v62, %s4833_s15  ;;  %4772 = vmatprep.mubr.msk.f32.mxu1 %vm3298_vm10, %v3271_v50  ;;  %v4528_v50 = vld [vmem:[%s7917_s0 + $0x331] sm:$0xff] }
 0x397   :  { %2188 = vrot.lane.b32.xlu1 %v4490_v62, %s4830_s26 }
 0x398   :  { %v2742_v34 = vpop.permute.xlu0 %2741 }
 0x399   :  { %2825 = vst.msk [vmem:[#allocation2 + $0x160] sm:$0xff] %vm1206_vm6, %v2742_v34  ;;  %v2744_v40 = vpop.permute.xlu1 %2743 }
 0x39a   :  { %2826 = vst.msk [vmem:[#allocation2 + $0x168] sm:$0xff] %vm1206_vm6, %v2744_v40  ;;  %2763 = vrot.lane.b32.xlu0 %v4491_v32, %s4833_s15  ;;  %v4529_v40 = vld [vmem:[%s7917_s0 + $0x339] sm:$0xff] }
 0x39b   :  { %2953 = vrot.lane.b32.xlu1 %v4522_v38, %s4834_s25 }
 0x39c   :  { %v2934_v41 = vpop.permute.xlu0 %2933  ;;  %v3272_v45 = vld [vmem:[#allocation2 + $0x158] sm:$0xff] }
 0x39d   :  { %3017 = vst.msk [vmem:[#allocation2 + $0x160] sm:$0xff] %vm1399_vm8, %v2934_v41  ;;  %v2361_v5 = vpop.permute.xlu1 %2360  ;;  %4773 = vmatmul.mubr.msk.f32.gmra.mrb[10].mxu1 %vm3298_vm10, %v3272_v45  ;;  %v4560_v45 = vld [vmem:[%s7917_s0 + $0x332] sm:$0xff] }
 0x39e   :  { %2442 = vst.msk [vmem:[#allocation2 + $0x170] sm:$0xff] %vm819_vm4, %v2361_v5  ;;  %2190 = vrot.lane.b32.xlu0 %v4491_v32, %s4830_s26 }
 0x39f   :  { %2380 = vrot.lane.b32.xlu1 %v4522_v38, %s4831_s4 }
 0x3a0   :  { %v2936_v52 = vpop.permute.xlu0 %2935 }
 0x3a1   :  { %3018 = vst.msk [vmem:[#allocation2 + $0x168] sm:$0xff] %vm1399_vm8, %v2936_v52  ;;  %v3126_v55 = vpop.permute.xlu1 %3125 }
 0x3a2   :  { %3209 = vst.msk [vmem:[#allocation2 + $0x160] sm:$0xff] %vm1592_vm9, %v3126_v55  ;;  %2955 = vrot.lane.b32.xlu0 %v4523_v54, %s4834_s25  ;;  %v4561_v55 = vld [vmem:[%s7917_s0 + $0x33a] sm:$0xff] }
 0x3a3   :  { %3145 = vrot.lane.b32.xlu1 %v4554_v24, %s4835_s11 }
 0x3a4   :  { %v2363_v53 = vpop.permute.xlu0 %2362 }
 0x3a5   :  { %2443 = vst.msk [vmem:[#allocation2 + $0x178] sm:$0xff] %vm819_vm4, %v2363_v53  ;;  %v2553_v59 = vpop.permute.xlu1 %2552 }
 0x3a6   :  { %2634 = vst.msk [vmem:[#allocation2 + $0x170] sm:$0xff] %vm1012_vm5, %v2553_v59  ;;  %2382 = vrot.lane.b32.xlu0 %v4523_v54, %s4831_s4 }
 0x3a7   :  { %2572 = vrot.lane.b32.xlu1 %v4554_v24, %s4832_s9 }
 0x3a8   :  { %v3128_v56 = vpop.permute.xlu0 %3127 }
 0x3a9   :  { %3210 = vst.msk [vmem:[#allocation2 + $0x168] sm:$0xff] %vm1592_vm9, %v3128_v56  ;;  %v2555_v11 = vpop.permute.xlu1 %2554  ;;  %v3273_v61 = vld [vmem:[#allocation2 + $0x160] sm:$0xff] }
 0x3aa   :  { %2635 = vst.msk [vmem:[#allocation2 + $0x178] sm:$0xff] %vm1012_vm5, %v2555_v11  ;;  %3147 = vrot.lane.b32.xlu0 %v4555_v17, %s4835_s11  ;;  %4775 = vmatprep.mubr.msk.f32.mxu1 %vm3298_vm10, %v3273_v61  ;;  %v4499_v61 = vld [vmem:[%s7917_s0 + $0x350] sm:$0xff] }
 0x3ab   :  { %2574 = vrot.lane.b32.xlu1 %v4555_v17, %s4832_s9  ;;  %v4498_v17 = vld [vmem:[%s7917_s0 + $0x348] sm:$0xff] }
 0x3ac   :  { %v2746_v8 = vpop.permute.xlu0 %2745 }
 0x3ad   :  { %2827 = vst.msk [vmem:[#allocation2 + $0x170] sm:$0xff] %vm1206_vm6, %v2746_v8  ;;  %v2748_v9 = vpop.permute.xlu1 %2747  ;;  %v4530_v8 = vld [vmem:[%s7917_s0 + $0x349] sm:$0xff] }
 0x3ae   :  { %2828 = vst.msk [vmem:[#allocation2 + $0x178] sm:$0xff] %vm1206_vm6, %v2748_v9  ;;  %2765 = vrot.lane.b32.xlu0 %v4492_v57, %s4833_s15 }
 0x3af   :  { %2192 = vrot.lane.b32.xlu1 %v4492_v57, %s4830_s26 }
 0x3b0   :  { %v2938_v10 = vpop.permute.xlu0 %2937  ;;  %v3274_v39 = vld [vmem:[#allocation2 + $0x168] sm:$0xff] }
 0x3b1   :  { %3019 = vst.msk [vmem:[#allocation2 + $0x170] sm:$0xff] %vm1399_vm8, %v2938_v10  ;;  %v2365_v44 = vpop.permute.xlu1 %2364  ;;  %4776 = vmatmul.mubr.msk.f32.gmra.mrb[12].mxu1 %vm3298_vm10, %v3274_v39  ;;  %v4562_v39 = vld [vmem:[%s7917_s0 + $0x34a] sm:$0xff] }
 0x3b2   :  { %2444 = vst.msk [vmem:[#allocation2 + $0x180] sm:$0xff] %vm819_vm4, %v2365_v44  ;;  %2767 = vrot.lane.b32.xlu0 %v4493_v26, %s4833_s15  ;;  %v4563_v44 = vld [vmem:[%s7917_s0 + $0x352] sm:$0xff] }
 0x3b3   :  { %2957 = vrot.lane.b32.xlu1 %v4524_v35, %s4834_s25 }
 0x3b4   :  { %v2940_v3 = vpop.permute.xlu0 %2939 }
 0x3b5   :  { %3020 = vst.msk [vmem:[#allocation2 + $0x178] sm:$0xff] %vm1399_vm8, %v2940_v3  ;;  %v3130_v14 = vpop.permute.xlu1 %3129 }
 0x3b6   :  { %3211 = vst.msk [vmem:[#allocation2 + $0x170] sm:$0xff] %vm1592_vm9, %v3130_v14  ;;  %2194 = vrot.lane.b32.xlu0 %v4493_v26, %s4830_s26  ;;  %v4531_v26 = vld [vmem:[%s7917_s0 + $0x351] sm:$0xff] }
 0x3b7   :  { %2384 = vrot.lane.b32.xlu1 %v4524_v35, %s4831_s4 }
 0x3b8   :  { %v2367_v15 = vpop.permute.xlu0 %2366 }
 0x3b9   :  { %2445 = vst.msk [vmem:[#allocation2 + $0x188] sm:$0xff] %vm819_vm4, %v2367_v15  ;;  %v2557_v29 = vpop.permute.xlu1 %2556 }
 0x3ba   :  { %2636 = vst.msk [vmem:[#allocation2 + $0x180] sm:$0xff] %vm1012_vm5, %v2557_v29  ;;  %2959 = vrot.lane.b32.xlu0 %v4525_v4, %s4834_s25 }
 0x3bb   :  { %3149 = vrot.lane.b32.xlu1 %v4556_v18, %s4835_s11 }
 0x3bc   :  { %v3132_v30 = vpop.permute.xlu0 %3131 }
 0x3bd   :  { %3212 = vst.msk [vmem:[#allocation2 + $0x178] sm:$0xff] %vm1592_vm9, %v3132_v30  ;;  %v2559_v0 = vpop.permute.xlu1 %2558  ;;  %v3275_v47 = vld [vmem:[#allocation2 + $0x170] sm:$0xff] }
 0x3be   :  { %2637 = vst.msk [vmem:[#allocation2 + $0x188] sm:$0xff] %vm1012_vm5, %v2559_v0  ;;  %2386 = vrot.lane.b32.xlu0 %v4525_v4, %s4831_s4  ;;  %4778 = vmatprep.mubr.msk.f32.mxu1 %vm3298_vm10, %v3275_v47 }
 0x3bf   :  { %2576 = vrot.lane.b32.xlu1 %v4556_v18, %s4832_s9 }
 0x3c0   :  { %v2750_v12 = vpop.permute.xlu0 %2749 }
 0x3c1   :  { %2829 = vst.msk [vmem:[#allocation2 + $0x180] sm:$0xff] %vm1206_vm6, %v2750_v12  ;;  %v2177_v48 = vpop.permute.xlu1 %2176 }
 0x3c2   :  { %2254 = vst.msk [vmem:[#allocation2 + $0x190] sm:$0xff] %vm626_vm3, %v2177_v48  ;;  %3151 = vrot.lane.b32.xlu0 %v4557_v37, %s4835_s11  ;;  %v7692_v48 = vld [vmem:[%s7919_s2] ss:$0 sm:$0xff] }
 0x3c3   :  { %2578 = vrot.lane.b32.xlu1 %v4557_v37, %s4832_s9 }
 0x3c4   :  { %v2752_v58 = vpop.permute.xlu0 %2751  ;;  %v3276_v33 = vld [vmem:[#allocation2 + $0x178] sm:$0xff] }
 0x3c5   :  { %2830 = vst.msk [vmem:[#allocation2 + $0x188] sm:$0xff] %vm1206_vm6, %v2752_v58  ;;  %v2942_v22 = vpop.permute.xlu1 %2941  ;;  %4779 = vmatmul.mubr.msk.f32.gmra.mrb[14].mxu1 %vm3298_vm10, %v3276_v33 }
 0x3c6   :  { %3021 = vst.msk [vmem:[#allocation2 + $0x180] sm:$0xff] %vm1399_vm8, %v2942_v22  ;;  %2769 = vrot.lane.b32.xlu0 %v4494_v7, %s4833_s15 }
 0x3c7   :  { %2196 = vrot.lane.b32.xlu1 %v4494_v7, %s4830_s26 }
 0x3c8   :  { %v2179_v16 = vpop.permute.xlu0 %2178 }
 0x3c9   :  { %2255 = vst.msk [vmem:[#allocation2 + $0x198] sm:$0xff] %vm626_vm3, %v2179_v16  ;;  %v2369_v19 = vpop.permute.xlu1 %2368 }
 0x3ca   :  { %2446 = vst.msk [vmem:[#allocation2 + $0x190] sm:$0xff] %vm819_vm4, %v2369_v19  ;;  %2771 = vrot.lane.b32.xlu0 %v4495_v36, %s4833_s15 }
 0x3cb   :  { %2961 = vrot.lane.b32.xlu1 %v4526_v6, %s4834_s25 }
 0x3cc   :  { %v2944_v51 = vpop.permute.xlu0 %2943 }
 0x3cd   :  { %3022 = vst.msk [vmem:[#allocation2 + $0x188] sm:$0xff] %vm1399_vm8, %v2944_v51  ;;  %v3134_v60 = vpop.permute.xlu1 %3133 }
 0x3ce   :  { %3213 = vst.msk [vmem:[#allocation2 + $0x180] sm:$0xff] %vm1592_vm9, %v3134_v60  ;;  %2198 = vrot.lane.b32.xlu0 %v4495_v36, %s4830_s26 }
 0x3cf   :  { %2388 = vrot.lane.b32.xlu1 %v4526_v6, %s4831_s4 }
 0x3d0   :  { %v2371_v42 = vpop.permute.xlu0 %2370 }
 0x3d1   :  { %2447 = vst.msk [vmem:[#allocation2 + $0x198] sm:$0xff] %vm819_vm4, %v2371_v42  ;;  %v2561_v63 = vpop.permute.xlu1 %2560 }
 0x3d2   :  { %2638 = vst.msk [vmem:[#allocation2 + $0x190] sm:$0xff] %vm1012_vm5, %v2561_v63  ;;  %2963 = vrot.lane.b32.xlu0 %v4527_v49, %s4834_s25 }
 0x3d3   :  { %3153 = vrot.lane.b32.xlu1 %v4558_v21, %s4835_s11 }
 0x3d4   :  { %v3136_v13 = vpop.permute.xlu0 %3135 }
 0x3d5   :  { %3214 = vst.msk [vmem:[#allocation2 + $0x188] sm:$0xff] %vm1592_vm9, %v3136_v13  ;;  %v2563_v2 = vpop.permute.xlu1 %2562  ;;  %v3277_v20 = vld [vmem:[#allocation2 + $0x180] sm:$0xff] }
 0x3d6   :  { %2639 = vst.msk [vmem:[#allocation2 + $0x198] sm:$0xff] %vm1012_vm5, %v2563_v2  ;;  %2390 = vrot.lane.b32.xlu0 %v4527_v49, %s4831_s4  ;;  %4781 = vmatprep.mubr.msk.f32.mxu1 %vm3298_vm10, %v3277_v20 }
 0x3d7   :  { %2580 = vrot.lane.b32.xlu1 %v4558_v21, %s4832_s9 }
 0x3d8   :  { %v2754_v27 = vpop.permute.xlu0 %2753 }
 0x3d9   :  { %2831 = vst.msk [vmem:[#allocation2 + $0x190] sm:$0xff] %vm1206_vm6, %v2754_v27  ;;  %v2181_v1 = vpop.permute.xlu1 %2180 }
 0x3da   :  { %2256 = vst.msk [vmem:[#allocation2 + $0x1a0] sm:$0xff] %vm626_vm3, %v2181_v1  ;;  %3155 = vrot.lane.b32.xlu0 %v4559_v23, %s4835_s11 }
 0x3db   :  { %2582 = vrot.lane.b32.xlu1 %v4559_v23, %s4832_s9 }
 0x3dc   :  { %v2756_v25 = vpop.permute.xlu0 %2755  ;;  %v3278_v28 = vld [vmem:[#allocation2 + $0x188] sm:$0xff] }
 0x3dd   :  { %2832 = vst.msk [vmem:[#allocation2 + $0x198] sm:$0xff] %vm1206_vm6, %v2756_v25  ;;  %v2946_v62 = vpop.permute.xlu1 %2945  ;;  %4782 = vmatmul.mubr.msk.f32.gmra.mrb[16].mxu1 %vm3298_vm10, %v3278_v28 }
 0x3de   :  { %3023 = vst.msk [vmem:[#allocation2 + $0x190] sm:$0xff] %vm1399_vm8, %v2946_v62  ;;  %2773 = vrot.lane.b32.xlu0 %v4496_v46, %s4833_s15 }
 0x3df   :  { %2200 = vrot.lane.b32.xlu1 %v4496_v46, %s4830_s26 }
 0x3e0   :  { %v2183_v31 = vpop.permute.xlu0 %2182 }
 0x3e1   :  { %2257 = vst.msk [vmem:[#allocation2 + $0x1a8] sm:$0xff] %vm626_vm3, %v2183_v31  ;;  %v2373_v32 = vpop.permute.xlu1 %2372 }
 0x3e2   :  { %2448 = vst.msk [vmem:[#allocation2 + $0x1a0] sm:$0xff] %vm819_vm4, %v2373_v32  ;;  %2775 = vrot.lane.b32.xlu0 %v4497_v43, %s4833_s15 }
 0x3e3   :  { %2965 = vrot.lane.b32.xlu1 %v4528_v50, %s4834_s25 }
 0x3e4   :  { %v2948_v34 = vpop.permute.xlu0 %2947 }
 0x3e5   :  { %3024 = vst.msk [vmem:[#allocation2 + $0x198] sm:$0xff] %vm1399_vm8, %v2948_v34  ;;  %v3138_v38 = vpop.permute.xlu1 %3137 }
 0x3e6   :  { %3215 = vst.msk [vmem:[#allocation2 + $0x190] sm:$0xff] %vm1592_vm9, %v3138_v38  ;;  %2202 = vrot.lane.b32.xlu0 %v4497_v43, %s4830_s26 }
 0x3e7   :  { %2392 = vrot.lane.b32.xlu1 %v4528_v50, %s4831_s4 }
 0x3e8   :  { %v2375_v41 = vpop.permute.xlu0 %2374 }
 0x3e9   :  { %2449 = vst.msk [vmem:[#allocation2 + $0x1a8] sm:$0xff] %vm819_vm4, %v2375_v41  ;;  %v2565_v5 = vpop.permute.xlu1 %2564 }
 0x3ea   :  { %2640 = vst.msk [vmem:[#allocation2 + $0x1a0] sm:$0xff] %vm1012_vm5, %v2565_v5  ;;  %2967 = vrot.lane.b32.xlu0 %v4529_v40, %s4834_s25 }
 0x3eb   :  { %3157 = vrot.lane.b32.xlu1 %v4560_v45, %s4835_s11 }
 0x3ec   :  { %v3140_v54 = vpop.permute.xlu0 %3139 }
 0x3ed   :  { %3216 = vst.msk [vmem:[#allocation2 + $0x198] sm:$0xff] %vm1592_vm9, %v3140_v54  ;;  %v2567_v52 = vpop.permute.xlu1 %2566  ;;  %v3279_v24 = vld [vmem:[#allocation2 + $0x190] sm:$0xff] }
 0x3ee   :  { %2641 = vst.msk [vmem:[#allocation2 + $0x1a8] sm:$0xff] %vm1012_vm5, %v2567_v52  ;;  %2394 = vrot.lane.b32.xlu0 %v4529_v40, %s4831_s4  ;;  %4784 = vmatprep.mubr.msk.f32.mxu1 %vm3298_vm10, %v3279_v24 }
 0x3ef   :  { %2584 = vrot.lane.b32.xlu1 %v4560_v45, %s4832_s9 }
 0x3f0   :  { %v2758_v53 = vpop.permute.xlu0 %2757 }
 0x3f1   :  { %2833 = vst.msk [vmem:[#allocation2 + $0x1a0] sm:$0xff] %vm1206_vm6, %v2758_v53  ;;  %v2185_v59 = vpop.permute.xlu1 %2184 }
 0x3f2   :  { %2258 = vst.msk [vmem:[#allocation2 + $0x1b0] sm:$0xff] %vm626_vm3, %v2185_v59  ;;  %3159 = vrot.lane.b32.xlu0 %v4561_v55, %s4835_s11 }
 0x3f3   :  { %2586 = vrot.lane.b32.xlu1 %v4561_v55, %s4832_s9 }
 0x3f4   :  { %v2760_v56 = vpop.permute.xlu0 %2759  ;;  %v3280_v11 = vld [vmem:[#allocation2 + $0x198] sm:$0xff] }
 0x3f5   :  { %2834 = vst.msk [vmem:[#allocation2 + $0x1a8] sm:$0xff] %vm1206_vm6, %v2760_v56  ;;  %v2950_v57 = vpop.permute.xlu1 %2949  ;;  %4785 = vmatmul.mubr.msk.f32.gmra.mrb[18].mxu1 %vm3298_vm10, %v3280_v11 }
 0x3f6   :  { %3025 = vst.msk [vmem:[#allocation2 + $0x1a0] sm:$0xff] %vm1399_vm8, %v2950_v57  ;;  %2777 = vrot.lane.b32.xlu0 %v4498_v17, %s4833_s15 }
 0x3f7   :  { %2779 = vrot.lane.b32.xlu1 %v4499_v61, %s4833_s15 }
 0x3f8   :  { %v2187_v9 = vpop.permute.xlu0 %2186 }
 0x3f9   :  { %2259 = vst.msk [vmem:[#allocation2 + $0x1b8] sm:$0xff] %vm626_vm3, %v2187_v9  ;;  %v2377_v10 = vpop.permute.xlu1 %2376 }
 0x3fa   :  { %2450 = vst.msk [vmem:[#allocation2 + $0x1b0] sm:$0xff] %vm819_vm4, %v2377_v10  ;;  %2969 = vrot.lane.b32.xlu0 %v4530_v8, %s4834_s25 }
 0x3fb   :  { %2971 = vrot.lane.b32.xlu1 %v4531_v26, %s4834_s25 }
 0x3fc   :  { %v2952_v35 = vpop.permute.xlu0 %2951 }
 0x3fd   :  { %3026 = vst.msk [vmem:[#allocation2 + $0x1a8] sm:$0xff] %vm1399_vm8, %v2952_v35  ;;  %v3142_v3 = vpop.permute.xlu1 %3141 }
 0x3fe   :  { %3217 = vst.msk [vmem:[#allocation2 + $0x1a0] sm:$0xff] %vm1592_vm9, %v3142_v3  ;;  %3161 = vrot.lane.b32.xlu0 %v4562_v39, %s4835_s11 }
 0x3ff   :  { %3163 = vrot.lane.b32.xlu1 %v4563_v44, %s4835_s11 }
 0x400   :  { %v2379_v14 = vpop.permute.xlu0 %2378 }
 0x401   :  { %2451 = vst.msk [vmem:[#allocation2 + $0x1b8] sm:$0xff] %vm819_vm4, %v2379_v14  ;;  %v2569_v4 = vpop.permute.xlu1 %2568 }
 0x402   :  { %2642 = vst.msk [vmem:[#allocation2 + $0x1b0] sm:$0xff] %vm1012_vm5, %v2569_v4 }
 0x404   :  { %v3144_v15 = vpop.permute.xlu0 %3143 }
 0x405   :  { %3218 = vst.msk [vmem:[#allocation2 + $0x1a8] sm:$0xff] %vm1592_vm9, %v3144_v15  ;;  %v2571_v18 = vpop.permute.xlu1 %2570  ;;  %v3281_v29 = vld [vmem:[#allocation2 + $0x1a0] sm:$0xff] }
 0x406   :  { %2643 = vst.msk [vmem:[#allocation2 + $0x1b8] sm:$0xff] %vm1012_vm5, %v2571_v18  ;;  %4787 = vmatprep.mubr.msk.f32.mxu1 %vm3298_vm10, %v3281_v29 }
 0x408   :  { %v2762_v30 = vpop.permute.xlu0 %2761 }
 0x409   :  { %2835 = vst.msk [vmem:[#allocation2 + $0x1b0] sm:$0xff] %vm1206_vm6, %v2762_v30  ;;  %v2189_v0 = vpop.permute.xlu1 %2188 }
 0x40a   :  { %2260 = vst.msk [vmem:[#allocation2 + $0x1c0] sm:$0xff] %vm626_vm3, %v2189_v0 }
 0x40c   :  { %v4759_v47 = vpop.f32.mrb[0].mxu1  ;;  %v2764_v37 = vpop.permute.xlu0 %2763  ;;  %v3282_v12 = vld [vmem:[#allocation2 + $0x1a8] sm:$0xff] }
 0x40d   :  { %v3920_v7 = vadd.f32 %v7692_v48, %v4759_v47  ;;  %2836 = vst.msk [vmem:[#allocation2 + $0x1b8] sm:$0xff] %vm1206_vm6, %v2764_v37  ;;  %v2954_v58 = vpop.permute.xlu1 %2953  ;;  %v3721_v33 = vpop.f32.mrb[1].mxu1  ;;  %4788 = vmatmul.mubr.msk.f32.gmra.mrb[20].mxu1 %vm3298_vm10, %v3282_v12 }
 0x40e   :  { %3027 = vst.msk [vmem:[#allocation2 + $0x1b0] sm:$0xff] %vm1399_vm8, %v2954_v58  ;;  %v3919_v22 = vadd.f32 %v7692_v48, %v3721_v33 }
 0x40f   :  { %v3984_v36 = vmax.f32 %v3920_v7, 0.0 }
 0x410   :  { %v3983_v16 = vmax.f32 %v3919_v22, 0.0  ;;  %v2191_v6 = vpop.permute.xlu0 %2190 }
 0x411   :  { %4049 = vst.msk [vmem:[%s7920_s3 + $0x108] sm:$0xff] %vm4015_vm11, %v3984_v36  ;;  %v2381_v19 = vpop.permute.xlu1 %2380 }
 0x412   :  { %2261 = vst.msk [vmem:[#allocation2 + $0x1c8] sm:$0xff] %vm626_vm3, %v2191_v6 }
 0x413   :  { %4048 = vst.msk [vmem:[%s7920_s3 + $0x100] sm:$0xff] %vm4015_vm11, %v3983_v16 }
 0x414   :  { %2452 = vst.msk [vmem:[#allocation2 + $0x1c0] sm:$0xff] %vm819_vm4, %v2381_v19  ;;  %v2956_v51 = vpop.permute.xlu0 %2955 }
 0x415   :  { %3028 = vst.msk [vmem:[#allocation2 + $0x1b8] sm:$0xff] %vm1399_vm8, %v2956_v51  ;;  %v3146_v60 = vpop.permute.xlu1 %3145 }
 0x416   :  { %3219 = vst.msk [vmem:[#allocation2 + $0x1b0] sm:$0xff] %vm1592_vm9, %v3146_v60 }
 0x418   :  { %v2383_v49 = vpop.permute.xlu0 %2382 }
 0x419   :  { %2453 = vst.msk [vmem:[#allocation2 + $0x1c8] sm:$0xff] %vm819_vm4, %v2383_v49  ;;  %v2573_v42 = vpop.permute.xlu1 %2572 }
 0x41a   :  { %2644 = vst.msk [vmem:[#allocation2 + $0x1c0] sm:$0xff] %vm1012_vm5, %v2573_v42 }
 0x41c   :  { %v3148_v21 = vpop.permute.xlu0 %3147 }
 0x41d   :  { %3220 = vst.msk [vmem:[#allocation2 + $0x1b8] sm:$0xff] %vm1592_vm9, %v3148_v21  ;;  %v2575_v63 = vpop.permute.xlu1 %2574  ;;  %v3283_v13 = vld [vmem:[#allocation2 + $0x1b0] sm:$0xff] }
 0x41e   :  { %2645 = vst.msk [vmem:[#allocation2 + $0x1c8] sm:$0xff] %vm1012_vm5, %v2575_v63  ;;  %4790 = vmatprep.mubr.msk.f32.mxu1 %vm3298_vm10, %v3283_v13 }
 0x420   :  { %v4762_v2 = vpop.f32.mrb[2].mxu1  ;;  %v2766_v20 = vpop.permute.xlu0 %2765 }
 0x421   :  { %v3922_v23 = vadd.f32 %v7692_v48, %v4762_v2  ;;  %2837 = vst.msk [vmem:[#allocation2 + $0x1c0] sm:$0xff] %vm1206_vm6, %v2766_v20  ;;  %v2193_v27 = vpop.permute.xlu1 %2192  ;;  %v3731_v1 = vpop.f32.mrb[3].mxu1 }
 0x422   :  { %2262 = vst.msk [vmem:[#allocation2 + $0x1d0] sm:$0xff] %vm626_vm3, %v2193_v27  ;;  %v3921_v46 = vadd.f32 %v7692_v48, %v3731_v1 }
 0x423   :  { %v3986_v25 = vmax.f32 %v3922_v23, 0.0 }
 0x424   :  { %v3985_v28 = vmax.f32 %v3921_v46, 0.0  ;;  %v2768_v62 = vpop.permute.xlu0 %2767  ;;  %v3284_v43 = vld [vmem:[#allocation2 + $0x1b8] sm:$0xff] }
 0x425   :  { %4051 = vst.msk [vmem:[%s7920_s3 + $0x118] sm:$0xff] %vm4015_vm11, %v3986_v25  ;;  %v2958_v31 = vpop.permute.xlu1 %2957  ;;  %4791 = vmatmul.mubr.msk.f32.gmra.mrb[22].mxu1 %vm3298_vm10, %v3284_v43 }
 0x426   :  { %2838 = vst.msk [vmem:[#allocation2 + $0x1c8] sm:$0xff] %vm1206_vm6, %v2768_v62 }
 0x427   :  { %4050 = vst.msk [vmem:[%s7920_s3 + $0x110] sm:$0xff] %vm4015_vm11, %v3985_v28 }
 0x428   :  { %3029 = vst.msk [vmem:[#allocation2 + $0x1c0] sm:$0xff] %vm1399_vm8, %v2958_v31  ;;  %v2195_v50 = vpop.permute.xlu0 %2194 }
 0x429   :  { %2263 = vst.msk [vmem:[#allocation2 + $0x1d8] sm:$0xff] %vm626_vm3, %v2195_v50  ;;  %v2385_v32 = vpop.permute.xlu1 %2384 }
 0x42a   :  { %2454 = vst.msk [vmem:[#allocation2 + $0x1d0] sm:$0xff] %vm819_vm4, %v2385_v32 }
 0x42c   :  { %v2960_v34 = vpop.permute.xlu0 %2959 }
 0x42d   :  { %3030 = vst.msk [vmem:[#allocation2 + $0x1c8] sm:$0xff] %vm1399_vm8, %v2960_v34  ;;  %v3150_v38 = vpop.permute.xlu1 %3149 }
 0x42e   :  { %3221 = vst.msk [vmem:[#allocation2 + $0x1c0] sm:$0xff] %vm1592_vm9, %v3150_v38 }
 0x430   :  { %v2387_v40 = vpop.permute.xlu0 %2386 }
 0x431   :  { %2455 = vst.msk [vmem:[#allocation2 + $0x1d8] sm:$0xff] %vm819_vm4, %v2387_v40  ;;  %v2577_v41 = vpop.permute.xlu1 %2576 }
 0x432   :  { %2646 = vst.msk [vmem:[#allocation2 + $0x1d0] sm:$0xff] %vm1012_vm5, %v2577_v41 }
 0x434   :  { %v4765_v45 = vpop.f32.mrb[4].mxu1  ;;  %v3152_v5 = vpop.permute.xlu0 %3151 }
 0x435   :  { %v3924_v54 = vadd.f32 %v7692_v48, %v4765_v45  ;;  %3222 = vst.msk [vmem:[#allocation2 + $0x1c8] sm:$0xff] %vm1592_vm9, %v3152_v5  ;;  %v2579_v52 = vpop.permute.xlu1 %2578  ;;  %v3741_v24 = vpop.f32.mrb[5].mxu1  ;;  %v3285_v55 = vld [vmem:[#allocation2 + $0x1c0] sm:$0xff] }
 0x436   :  { %2647 = vst.msk [vmem:[#allocation2 + $0x1d8] sm:$0xff] %vm1012_vm5, %v2579_v52  ;;  %v3923_v53 = vadd.f32 %v7692_v48, %v3741_v24  ;;  %4793 = vmatprep.mubr.msk.f32.mxu1 %vm3298_vm10, %v3285_v55 }
 0x437   :  { %v3988_v59 = vmax.f32 %v3924_v54, 0.0 }
 0x438   :  { %v3987_v17 = vmax.f32 %v3923_v53, 0.0  ;;  %v2770_v56 = vpop.permute.xlu0 %2769 }
 0x439   :  { %4053 = vst.msk [vmem:[%s7920_s3 + $0x128] sm:$0xff] %vm4015_vm11, %v3988_v59  ;;  %v2197_v11 = vpop.permute.xlu1 %2196 }
 0x43a   :  { %2839 = vst.msk [vmem:[#allocation2 + $0x1d0] sm:$0xff] %vm1206_vm6, %v2770_v56 }
 0x43b   :  { %4052 = vst.msk [vmem:[%s7920_s3 + $0x120] sm:$0xff] %vm4015_vm11, %v3987_v17 }
 0x43c   :  { %2264 = vst.msk [vmem:[#allocation2 + $0x1e0] sm:$0xff] %vm626_vm3, %v2197_v11  ;;  %v2772_v61 = vpop.permute.xlu0 %2771  ;;  %v3286_v57 = vld [vmem:[#allocation2 + $0x1c8] sm:$0xff] }
 0x43d   :  { %2840 = vst.msk [vmem:[#allocation2 + $0x1d8] sm:$0xff] %vm1206_vm6, %v2772_v61  ;;  %v2962_v8 = vpop.permute.xlu1 %2961  ;;  %4794 = vmatmul.mubr.msk.f32.gmra.mrb[24].mxu1 %vm3298_vm10, %v3286_v57 }
 0x43e   :  { %3031 = vst.msk [vmem:[#allocation2 + $0x1d0] sm:$0xff] %vm1399_vm8, %v2962_v8 }
 0x440   :  { %v2199_v9 = vpop.permute.xlu0 %2198 }
 0x441   :  { %2265 = vst.msk [vmem:[#allocation2 + $0x1e8] sm:$0xff] %vm626_vm3, %v2199_v9  ;;  %v2389_v26 = vpop.permute.xlu1 %2388 }
 0x442   :  { %2456 = vst.msk [vmem:[#allocation2 + $0x1e0] sm:$0xff] %vm819_vm4, %v2389_v26 }
 0x444   :  { %v2964_v10 = vpop.permute.xlu0 %2963 }
 0x445   :  { %3032 = vst.msk [vmem:[#allocation2 + $0x1d8] sm:$0xff] %vm1399_vm8, %v2964_v10  ;;  %v3154_v39 = vpop.permute.xlu1 %3153 }
 0x446   :  { %3223 = vst.msk [vmem:[#allocation2 + $0x1d0] sm:$0xff] %vm1592_vm9, %v3154_v39 }
 0x448   :  { %v4768_v35 = vpop.f32.mrb[6].mxu1  ;;  %v2391_v44 = vpop.permute.xlu0 %2390 }
 0x449   :  { %v3926_v3 = vadd.f32 %v7692_v48, %v4768_v35  ;;  %2457 = vst.msk [vmem:[#allocation2 + $0x1e8] sm:$0xff] %vm819_vm4, %v2391_v44  ;;  %v2581_v14 = vpop.permute.xlu1 %2580  ;;  %v3751_v4 = vpop.f32.mrb[7].mxu1 }
 0x44a   :  { %2648 = vst.msk [vmem:[#allocation2 + $0x1e0] sm:$0xff] %vm1012_vm5, %v2581_v14  ;;  %v3925_v15 = vadd.f32 %v7692_v48, %v3751_v4 }
 0x44b   :  { %v3990_v18 = vmax.f32 %v3926_v3, 0.0 }
 0x44c   :  { %v3989_v29 = vmax.f32 %v3925_v15, 0.0  ;;  %v3156_v30 = vpop.permute.xlu0 %3155 }
 0x44d   :  { %4055 = vst.msk [vmem:[%s7920_s3 + $0x138] sm:$0xff] %vm4015_vm11, %v3990_v18  ;;  %v2583_v0 = vpop.permute.xlu1 %2582  ;;  %v3287_v47 = vld [vmem:[#allocation2 + $0x1d0] sm:$0xff] }
 0x44e   :  { %3224 = vst.msk [vmem:[#allocation2 + $0x1d8] sm:$0xff] %vm1592_vm9, %v3156_v30  ;;  %4796 = vmatprep.mubr.msk.f32.mxu1 %vm3298_vm10, %v3287_v47 }
 0x44f   :  { %4054 = vst.msk [vmem:[%s7920_s3 + $0x130] sm:$0xff] %vm4015_vm11, %v3989_v29 }
 0x450   :  { %2649 = vst.msk [vmem:[#allocation2 + $0x1e8] sm:$0xff] %vm1012_vm5, %v2583_v0  ;;  %v2774_v37 = vpop.permute.xlu0 %2773 }
 0x451   :  { %2841 = vst.msk [vmem:[#allocation2 + $0x1e0] sm:$0xff] %vm1206_vm6, %v2774_v37  ;;  %v2201_v12 = vpop.permute.xlu1 %2200 }
 0x452   :  { %2266 = vst.msk [vmem:[#allocation2 + $0x1f0] sm:$0xff] %vm626_vm3, %v2201_v12 }
 0x454   :  { %v2776_v7 = vpop.permute.xlu0 %2775 }
 0x455   :  { %v3288_v58 = vld [vmem:[#allocation2 + $0x1d8] sm:$0xff]  ;;  %2842 = vst.msk [vmem:[#allocation2 + $0x1e8] sm:$0xff] %vm1206_vm6, %v2776_v7  ;;  %v2966_v33 = vpop.permute.xlu1 %2965 }
 0x456   :  { %4797 = vmatmul.mubr.msk.f32.gmra.mrb[26].mxu1 %vm3298_vm10, %v3288_v58  ;;  %3033 = vst.msk [vmem:[#allocation2 + $0x1e0] sm:$0xff] %vm1399_vm8, %v2966_v33 }
 0x458   :  { %v2203_v22 = vpop.permute.xlu0 %2202 }
 0x459   :  { %2267 = vst.msk [vmem:[#allocation2 + $0x1f8] sm:$0xff] %vm626_vm3, %v2203_v22  ;;  %v2393_v36 = vpop.permute.xlu1 %2392 }
 0x45a   :  { %2458 = vst.msk [vmem:[#allocation2 + $0x1f0] sm:$0xff] %vm819_vm4, %v2393_v36 }
 0x45c   :  { %v4771_v16 = vpop.f32.mrb[8].mxu1  ;;  %v2968_v6 = vpop.permute.xlu0 %2967 }
 0x45d   :  { %v3928_v19 = vadd.f32 %v7692_v48, %v4771_v16  ;;  %3034 = vst.msk [vmem:[#allocation2 + $0x1e8] sm:$0xff] %vm1399_vm8, %v2968_v6  ;;  %v3158_v51 = vpop.permute.xlu1 %3157  ;;  %v3761_v60 = vpop.f32.mrb[9].mxu1 }
 0x45e   :  { %3225 = vst.msk [vmem:[#allocation2 + $0x1e0] sm:$0xff] %vm1592_vm9, %v3158_v51  ;;  %v3927_v49 = vadd.f32 %v7692_v48, %v3761_v60 }
 0x45f   :  { %v3992_v42 = vmax.f32 %v3928_v19, 0.0 }
 0x460   :  { %v3991_v21 = vmax.f32 %v3927_v49, 0.0  ;;  %v2395_v63 = vpop.permute.xlu0 %2394 }
 0x461   :  { %4057 = vst.msk [vmem:[%s7920_s3 + $0x148] sm:$0xff] %vm4015_vm11, %v3992_v42  ;;  %v2585_v13 = vpop.permute.xlu1 %2584 }
 0x462   :  { %2459 = vst.msk [vmem:[#allocation2 + $0x1f8] sm:$0xff] %vm819_vm4, %v2395_v63 }
 0x463   :  { %4056 = vst.msk [vmem:[%s7920_s3 + $0x140] sm:$0xff] %vm4015_vm11, %v3991_v21 }
 0x464   :  { %2650 = vst.msk [vmem:[#allocation2 + $0x1f0] sm:$0xff] %vm1012_vm5, %v2585_v13  ;;  %v3160_v2 = vpop.permute.xlu0 %3159 }
 0x465   :  { %3226 = vst.msk [vmem:[#allocation2 + $0x1e8] sm:$0xff] %vm1592_vm9, %v3160_v2  ;;  %v2587_v20 = vpop.permute.xlu1 %2586  ;;  %v3289_v23 = vld [vmem:[#allocation2 + $0x1e0] sm:$0xff] }
 0x466   :  { %2651 = vst.msk [vmem:[#allocation2 + $0x1f8] sm:$0xff] %vm1012_vm5, %v2587_v20  ;;  %4799 = vmatprep.mubr.msk.f32.mxu1 %vm3298_vm10, %v3289_v23 }
 0x468   :  { %v2778_v27 = vpop.permute.xlu0 %2777 }
 0x469   :  { %2843 = vst.msk [vmem:[#allocation2 + $0x1f0] sm:$0xff] %vm1206_vm6, %v2778_v27  ;;  %v2780_v1 = vpop.permute.xlu1 %2779 }
 0x46a   :  { %2844 = vst.msk [vmem:[#allocation2 + $0x1f8] sm:$0xff] %vm1206_vm6, %v2780_v1 }
 0x46c   :  { %v2970_v46 = vpop.permute.xlu0 %2969  ;;  %v3290_v25 = vld [vmem:[#allocation2 + $0x1e8] sm:$0xff] }
 0x46d   :  { %3035 = vst.msk [vmem:[#allocation2 + $0x1f0] sm:$0xff] %vm1399_vm8, %v2970_v46  ;;  %v2972_v28 = vpop.permute.xlu1 %2971  ;;  %4800 = vmatmul.mubr.msk.f32.gmra.mrb[28].mxu1 %vm3298_vm10, %v3290_v25 }
 0x46e   :  { %3036 = vst.msk [vmem:[#allocation2 + $0x1f8] sm:$0xff] %vm1399_vm8, %v2972_v28 }
 0x470   :  { %v4774_v62 = vpop.f32.mrb[10].mxu1  ;;  %v3162_v43 = vpop.permute.xlu0 %3161 }
 0x471   :  { %v3930_v31 = vadd.f32 %v7692_v48, %v4774_v62  ;;  %3227 = vst.msk [vmem:[#allocation2 + $0x1f0] sm:$0xff] %vm1592_vm9, %v3162_v43  ;;  %v3164_v50 = vpop.permute.xlu1 %3163  ;;  %v3771_v32 = vpop.f32.mrb[11].mxu1 }
 0x472   :  { %3228 = vst.msk [vmem:[#allocation2 + $0x1f8] sm:$0xff] %vm1592_vm9, %v3164_v50  ;;  %v3929_v34 = vadd.f32 %v7692_v48, %v3771_v32 }
 0x473   :  { %v3994_v38 = vmax.f32 %v3930_v31, 0.0 }
 0x474   :  { %v3993_v40 = vmax.f32 %v3929_v34, 0.0 }
 0x475   :  { %4059 = vst.msk [vmem:[%s7920_s3 + $0x158] sm:$0xff] %vm4015_vm11, %v3994_v38 }
 0x476   :  { %4058 = vst.msk [vmem:[%s7920_s3 + $0x150] sm:$0xff] %vm4015_vm11, %v3993_v40 }
 0x478   :  { %v3291_v41 = vld [vmem:[#allocation2 + $0x1f0] sm:$0xff] }
 0x479   :  { %4802 = vmatprep.mubr.msk.f32.mxu1 %vm3298_vm10, %v3291_v41  ;;  %v3292_v45 = vld [vmem:[#allocation2 + $0x1f8] sm:$0xff] }
 0x47a   :  { %4803 = vmatmul.mubr.msk.f32.gmra.mrb[30].mxu1 %vm3298_vm10, %v3292_v45 }
 0x484   :  { %v4777_v5 = vpop.f32.mrb[12].mxu1 }
 0x485   :  { %v3932_v54 = vadd.f32 %v7692_v48, %v4777_v5  ;;  %v3781_v52 = vpop.f32.mrb[13].mxu1 }
 0x486   :  { %v3931_v24 = vadd.f32 %v7692_v48, %v3781_v52 }
 0x487   :  { %v3996_v55 = vmax.f32 %v3932_v54, 0.0 }
 0x488   :  { %v3995_v53 = vmax.f32 %v3931_v24, 0.0 }
 0x489   :  { %4061 = vst.msk [vmem:[%s7920_s3 + $0x168] sm:$0xff] %vm4015_vm11, %v3996_v55 }
 0x48a   :  { %4060 = vst.msk [vmem:[%s7920_s3 + $0x160] sm:$0xff] %vm4015_vm11, %v3995_v53 }
 0x498   :  { %v4780_v59 = vpop.f32.mrb[14].mxu1 }
 0x499   :  { %v3934_v17 = vadd.f32 %v7692_v48, %v4780_v59  ;;  %v3791_v56 = vpop.f32.mrb[15].mxu1 }
 0x49a   :  { %v3933_v11 = vadd.f32 %v7692_v48, %v3791_v56 }
 0x49b   :  { %v3998_v61 = vmax.f32 %v3934_v17, 0.0 }
 0x49c   :  { %v3997_v57 = vmax.f32 %v3933_v11, 0.0 }
 0x49d   :  { %4063 = vst.msk [vmem:[%s7920_s3 + $0x178] sm:$0xff] %vm4015_vm11, %v3998_v61 }
 0x49e   :  { %4062 = vst.msk [vmem:[%s7920_s3 + $0x170] sm:$0xff] %vm4015_vm11, %v3997_v57 }
 0x4b0   :  { %v4783_v8 = vpop.f32.mrb[16].mxu1 }
 0x4b1   :  { %v3936_v9 = vadd.f32 %v7692_v48, %v4783_v8  ;;  %v3801_v26 = vpop.f32.mrb[17].mxu1 }
 0x4b2   :  { %v3935_v10 = vadd.f32 %v7692_v48, %v3801_v26 }
 0x4b3   :  { %v4000_v39 = vmax.f32 %v3936_v9, 0.0 }
 0x4b4   :  { %v3999_v35 = vmax.f32 %v3935_v10, 0.0 }
 0x4b5   :  { %4065 = vst.msk [vmem:[%s7920_s3 + $0x188] sm:$0xff] %vm4015_vm11, %v4000_v39 }
 0x4b6   :  { %4064 = vst.msk [vmem:[%s7920_s3 + $0x180] sm:$0xff] %vm4015_vm11, %v3999_v35 }
 0x4c8   :  { %v4786_v44 = vpop.f32.mrb[18].mxu1 }
 0x4c9   :  { %v3938_v3 = vadd.f32 %v7692_v48, %v4786_v44  ;;  %v3811_v14 = vpop.f32.mrb[19].mxu1 }
 0x4ca   :  { %v3937_v4 = vadd.f32 %v7692_v48, %v3811_v14 }
 0x4cb   :  { %v4002_v15 = vmax.f32 %v3938_v3, 0.0 }
 0x4cc   :  { %v4001_v18 = vmax.f32 %v3937_v4, 0.0 }
 0x4cd   :  { %4067 = vst.msk [vmem:[%s7920_s3 + $0x198] sm:$0xff] %vm4015_vm11, %v4002_v15 }
 0x4ce   :  { %4066 = vst.msk [vmem:[%s7920_s3 + $0x190] sm:$0xff] %vm4015_vm11, %v4001_v18 }
 0x4e0   :  { %v4789_v29 = vpop.f32.mrb[20].mxu1 }
 0x4e1   :  { %v3940_v30 = vadd.f32 %v7692_v48, %v4789_v29  ;;  %v3821_v0 = vpop.f32.mrb[21].mxu1 }
 0x4e2   :  { %v3939_v47 = vadd.f32 %v7692_v48, %v3821_v0 }
 0x4e3   :  { %v4004_v37 = vmax.f32 %v3940_v30, 0.0 }
 0x4e4   :  { %v4003_v12 = vmax.f32 %v3939_v47, 0.0 }
 0x4e5   :  { %4069 = vst.msk [vmem:[%s7920_s3 + $0x1a8] sm:$0xff] %vm4015_vm11, %v4004_v37 }
 0x4e6   :  { %4068 = vst.msk [vmem:[%s7920_s3 + $0x1a0] sm:$0xff] %vm4015_vm11, %v4003_v12 }
 0x4f8   :  { %v4792_v7 = vpop.f32.mrb[22].mxu1 }
 0x4f9   :  { %v3942_v58 = vadd.f32 %v7692_v48, %v4792_v7  ;;  %v3831_v33 = vpop.f32.mrb[23].mxu1 }
 0x4fa   :  { %v3941_v22 = vadd.f32 %v7692_v48, %v3831_v33 }
 0x4fb   :  { %v4006_v36 = vmax.f32 %v3942_v58, 0.0 }
 0x4fc   :  { %v4005_v16 = vmax.f32 %v3941_v22, 0.0 }
 0x4fd   :  { %4071 = vst.msk [vmem:[%s7920_s3 + $0x1b8] sm:$0xff] %vm4015_vm11, %v4006_v36 }
 0x4fe   :  { %4070 = vst.msk [vmem:[%s7920_s3 + $0x1b0] sm:$0xff] %vm4015_vm11, %v4005_v16 }
 0x510   :  { %v4795_v6 = vpop.f32.mrb[24].mxu1 }
 0x511   :  { %v3944_v19 = vadd.f32 %v7692_v48, %v4795_v6  ;;  %v3841_v51 = vpop.f32.mrb[25].mxu1 }
 0x512   :  { %v3943_v60 = vadd.f32 %v7692_v48, %v3841_v51 }
 0x513   :  { %v4008_v49 = vmax.f32 %v3944_v19, 0.0 }
 0x514   :  { %v4007_v42 = vmax.f32 %v3943_v60, 0.0 }
 0x515   :  { %4073 = vst.msk [vmem:[%s7920_s3 + $0x1c8] sm:$0xff] %vm4015_vm11, %v4008_v49 }
 0x516   :  { %4072 = vst.msk [vmem:[%s7920_s3 + $0x1c0] sm:$0xff] %vm4015_vm11, %v4007_v42 }
 0x529   :  { %v4798_v21 = vpop.f32.mrb[26].mxu1 }
 0x52a   :  { %v3946_v63 = vadd.f32 %v7692_v48, %v4798_v21  ;;  %v3851_v13 = vpop.f32.mrb[27].mxu1 }
 0x52b   :  { %v3945_v2 = vadd.f32 %v7692_v48, %v3851_v13 }
 0x52c   :  { %v4010_v20 = vmax.f32 %v3946_v63, 0.0 }
 0x52d   :  { %v4009_v23 = vmax.f32 %v3945_v2, 0.0 }
 0x52e   :  { %4075 = vst.msk [vmem:[%s7920_s3 + $0x1d8] sm:$0xff] %vm4015_vm11, %v4010_v20 }
 0x52f   :  { %4074 = vst.msk [vmem:[%s7920_s3 + $0x1d0] sm:$0xff] %vm4015_vm11, %v4009_v23 }
 0x540   :  { %v4801_v27 = vpop.f32.mrb[28].mxu1 }
 0x541   :  { %v3948_v1 = vadd.f32 %v7692_v48, %v4801_v27  ;;  %v3861_v46 = vpop.f32.mrb[29].mxu1 }
 0x542   :  { %v3947_v25 = vadd.f32 %v7692_v48, %v3861_v46 }
 0x543   :  { %v4012_v28 = vmax.f32 %v3948_v1, 0.0 }
 0x544   :  { %v4011_v62 = vmax.f32 %v3947_v25, 0.0 }
 0x545   :  { %4077 = vst.msk [vmem:[%s7920_s3 + $0x1e8] sm:$0xff] %vm4015_vm11, %v4012_v28 }
 0x546   :  { %4076 = vst.msk [vmem:[%s7920_s3 + $0x1e0] sm:$0xff] %vm4015_vm11, %v4011_v62 }
 0x54d   :  { %v4804_v43 = vpop.f32.mrb[30].mxu1 }
 0x54e   :  { %v3950_v31 = vadd.f32 %v7692_v48, %v4804_v43  ;;  %v3871_v50 = vpop.f32.mrb[31].mxu1 }
 0x54f   :  { %v3949_v32 = vadd.f32 %v7692_v48, %v3871_v50 }
 0x550   :  { %v4014_v34 = vmax.f32 %v3950_v31, 0.0 }
 0x551   :  { %v4013_v38 = vmax.f32 %v3949_v32, 0.0 }
 0x552   :  { %4079 = vst.msk [vmem:[%s7920_s3 + $0x1f8] sm:$0xff] %vm4015_vm11, %v4014_v34 }
 0x553   :  { %4078 = vst.msk [vmem:[%s7920_s3 + $0x1f0] sm:$0xff] %vm4015_vm11, %v4013_v38 }

</bundles_post_ra>
